<compile_context>
chip_gen: v7x
topology: tpu7x:2x2x1
jax: 0.10.0
libtpu: 0.0.40
codegen_flags: <defaults>
</compile_context>

<pallas_src>
import math
import functools
import numpy as np

import jax
import jax.numpy as jnp
from jax.experimental import pallas as pl
from jax.experimental.pallas import tpu as pltpu

EPS = 1e-5
NEG = float(np.finfo(np.float32).min)
VMEM_LIMIT = 64 * 1024 * 1024   # explicit scoped-VMEM limit for the larger tiles


def mosaic_params(dims):
    return pltpu.CompilerParams(dimension_semantics=dims,
                                vmem_limit_bytes=VMEM_LIMIT)


# ----------------------------------------------------------------------------
# Kernels
# ----------------------------------------------------------------------------
def qkv_rope_kernel(x_ref, ln1_ref, wqkv_ref, cos_ref, sina_ref, sinb_ref,
                    q_ref, k_ref, v_ref, *, head_dim):
    """RMSNorm -> fused (H,3H) QKV projection (bf16 MXU) -> RoPE via rolls."""
    x = x_ref[0].astype(jnp.float32)                       # (tS, H), bf16 residual
    H = x.shape[-1]
    var = jnp.mean(x * x, axis=-1, keepdims=True)
    hn = (x * jax.lax.rsqrt(var + EPS) * ln1_ref[0]).astype(jnp.bfloat16)

    qkv = jnp.dot(hn, wqkv_ref[...], preferred_element_type=jnp.float32)  # (tS, 3H)
    q = qkv[:, :H]
    k = qkv[:, H:2 * H]
    v = qkv[:, 2 * H:]

    cos = cos_ref[...]          # bf16 cos tiled per head, (tS, H)
    sin_a = sina_ref[...]       # bf16 -sin on first half of each head, 0 elsewhere
    sin_b = sinb_ref[...]       # bf16 +sin on second half of each head, 0 elsewhere
    sh_b = head_dim // 2        # roll: out[c] = t[c - dh/2]  (feeds second halves)
    sh_a = H - head_dim // 2    # roll: out[c] = t[c + dh/2]  (feeds first halves)

    def rope(t):
        # q*cos + rotate_half(q)*sin, expressed with XLU rolls + masked sin.
        # Correct only because sin_a/sin_b zero out the wrap-around columns.
        return (t * cos
                + pltpu.roll(t, sh_b, 1) * sin_b
                + pltpu.roll(t, sh_a, 1) * sin_a)

    q_ref[0] = rope(q).astype(jnp.bfloat16)
    k_ref[0] = rope(k).astype(jnp.bfloat16)
    v_ref[0] = v.astype(jnp.bfloat16)


def flash_attn_kernel(q_ref, k_ref, v_ref, o_ref, m_sc, l_sc, acc_sc,
                      *, scale, block_q, block_k):
    """Causal flash attention for one (batch, head, q-tile); KV tiles innermost."""
    qi = pl.program_id(2)
    ki = pl.program_id(3)

    @pl.when(ki == 0)
    def _init():
        m_sc[...] = jnp.full_like(m_sc, -jnp.inf)
        l_sc[...] = jnp.zeros_like(l_sc)
        acc_sc[...] = jnp.zeros_like(acc_sc)

    q_start = qi * block_q
    kv_start = ki * block_k
    needed = kv_start <= q_start + (block_q - 1)

    @pl.when(needed)
    def _compute():
        q = q_ref[0]                                       # (tQ, dh) bf16
        k = k_ref[0]                                       # (tK, dh) bf16
        v = v_ref[0]                                       # (tK, dh) bf16
        s = jax.lax.dot_general(q, k, (((1,), (1,)), ((), ())),
                                preferred_element_type=jnp.float32) * scale

        def update(s_val):
            m_prev = m_sc[...]
            m_new = jnp.maximum(m_prev, jnp.max(s_val, axis=-1, keepdims=True))
            alpha = jnp.exp(m_prev - m_new)
            p = jnp.exp(s_val - m_new)
            l_sc[...] = alpha * l_sc[...] + jnp.sum(p, axis=-1, keepdims=True)
            acc_sc[...] = alpha * acc_sc[...] + jnp.dot(
                p.astype(jnp.bfloat16), v, preferred_element_type=jnp.float32)
            m_sc[...] = m_new

        # Tile straddles the causal diagonal iff its max column exceeds its
        # min row; only then do we pay for the iota/compare/select mask.
        on_diag = kv_start + (block_k - 1) > q_start

        @pl.when(jnp.logical_not(on_diag))
        def _fast():
            update(s)

        @pl.when(on_diag)
        def _masked():
            row = q_start + jax.lax.broadcasted_iota(jnp.int32, s.shape, 0)
            col = kv_start + jax.lax.broadcasted_iota(jnp.int32, s.shape, 1)
            update(jnp.where(col <= row, s, NEG))

    @pl.when(ki == pl.num_programs(3) - 1)
    def _finalize():
        # approx reciprocal (~1e-3 rel error) is acceptable at the test tolerance
        o_ref[0] = (acc_sc[...] * pl.reciprocal(l_sc[...], approx=True)
                    ).astype(o_ref.dtype)


def attn_mlp_kernel(x_ref, ctx_ref, wo_ref, ln2_ref, wgu_ref, wd_ref, *rest,
                    block_i, apply_final_norm):
    """o_proj + residual -> RMSNorm -> SwiGLU (I-tiled, accumulated) -> residual.

    Grid axis 2 runs over intermediate (I) tiles; the output row tile stays
    resident.  When `apply_final_norm`, the model's final RMSNorm is fused into
    the finalize step (so the lm_head kernel never re-normalizes)."""
    if apply_final_norm:
        fnorm_ref, o_ref, hn_sc, acc_sc = rest
    else:
        o_ref, hn_sc, acc_sc = rest
        fnorm_ref = None

    ii = pl.program_id(2)

    @pl.when(ii == 0)
    def _prologue():
        x = x_ref[0].astype(jnp.float32)                   # bf16 residual -> f32
        x1 = x + jnp.dot(ctx_ref[0], wo_ref[...],
                         preferred_element_type=jnp.float32)
        var = jnp.mean(x1 * x1, axis=-1, keepdims=True)
        hn_sc[...] = (x1 * jax.lax.rsqrt(var + EPS) * ln2_ref[0]
                      ).astype(jnp.bfloat16)
        acc_sc[...] = x1                                   # residual seed of acc

    hn = hn_sc[...]
    gu = jnp.dot(hn, wgu_ref[0], preferred_element_type=jnp.float32)  # (tS, 2*bI)
    g = gu[:, :block_i]
    u = gu[:, block_i:]
    act = (g * jax.nn.sigmoid(g) * u).astype(jnp.bfloat16)            # SiLU(g)*u
    acc_sc[...] += jnp.dot(act, wd_ref[0], preferred_element_type=jnp.float32)

    @pl.when(ii == pl.num_programs(2) - 1)
    def _finalize():
        y = acc_sc[...]
        if apply_final_norm:
            var = jnp.mean(y * y, axis=-1, keepdims=True)
            y = y * jax.lax.rsqrt(var + EPS) * fnorm_ref[0]
        o_ref[0] = y.astype(o_ref.dtype)


def lm_head_kernel(x_ref, e_ref, o_ref):
    """Tied lm_head on one (S-tile, V-tile); input is already final-normalized."""
    # Contract last dims -> no on-chip transpose of the (tV, H) embedding tile.
    o_ref[0] = jax.lax.dot_general(x_ref[0], e_ref[...], (((1,), (1,)), ((), ())),
                                   preferred_element_type=jnp.float32)


# ----------------------------------------------------------------------------
# Wrappers (pallas_call plumbing)
# ----------------------------------------------------------------------------
def qkv_rope(x, ln1, wqkv, cos_f, sin_a, sin_b, *, head_dim, block_s):
    B, S, H = x.shape
    block_s = min(block_s, S)
    assert S % block_s == 0
    grid = (B, S // block_s)
    row_spec = pl.BlockSpec((1, block_s, H), lambda b, si: (b, si, 0))
    tab_spec = pl.BlockSpec((block_s, H), lambda b, si: (si, 0))
    out = jax.ShapeDtypeStruct((B, S, H), jnp.bfloat16)
    return pl.pallas_call(
        functools.partial(qkv_rope_kernel, head_dim=head_dim),
        out_shape=(out, out, out),
        grid=grid,
        in_specs=[row_spec,
                  pl.BlockSpec((1, H), lambda b, si: (0, 0)),
                  pl.BlockSpec((H, 3 * H), lambda b, si: (0, 0)),
                  tab_spec, tab_spec, tab_spec],
        out_specs=(row_spec, row_spec, row_spec),
        compiler_params=mosaic_params(("parallel", "parallel")),
    )(x, ln1, wqkv, cos_f, sin_a, sin_b)


def flash_attention(q, k, v, *, num_heads, head_dim, block_q, block_k):
    B, S, H = q.shape
    block_q = min(block_q, S)
    block_k = min(block_k, S)
    assert S % block_q == 0 and S % block_k == 0
    # TODO(synk): head_dim not a multiple of 128 (and != H) would need padding
    # of the head axis to keep the per-head column blocks lane-aligned.
    grid = (B, num_heads, S // block_q, S // block_k)
    q_spec = pl.BlockSpec((1, block_q, head_dim), lambda b, h, qi, ki: (b, qi, h))

    def kv_index(b, h, qi, ki):
        # Clamp causally-skipped kv tiles to the last valid block so Pallas
        # never issues their HBM fetch (the pl.when in the kernel skips compute).
        last_valid = (qi * block_q + block_q - 1) // block_k
        return (b, jnp.minimum(ki, last_valid), h)

    kv_spec = pl.BlockSpec((1, block_k, head_dim), kv_index)
    return pl.pallas_call(
        functools.partial(flash_attn_kernel, scale=1.0 / math.sqrt(head_dim),
                          block_q=block_q, block_k=block_k),
        out_shape=jax.ShapeDtypeStruct((B, S, H), jnp.bfloat16),
        grid=grid,
        in_specs=[q_spec, kv_spec, kv_spec],
        out_specs=q_spec,
        scratch_shapes=[pltpu.VMEM((block_q, 1), jnp.float32),
                        pltpu.VMEM((block_q, 1), jnp.float32),
                        pltpu.VMEM((block_q, head_dim), jnp.float32)],
        compiler_params=mosaic_params(
            ("parallel", "parallel", "parallel", "arbitrary")),
    )(q, k, v)


def attn_out_mlp(x, ctx, wo, ln2, wgu3, wd3, *, block_s, block_i,
                 final_norm_w=None):
    B, S, H = x.shape
    block_s = min(block_s, S)
    assert S % block_s == 0
    nI = wgu3.shape[0]
    grid = (B, S // block_s, nI)
    row_spec = pl.BlockSpec((1, block_s, H), lambda b, si, ii: (b, si, 0))
    vec_spec = pl.BlockSpec((1, H), lambda b, si, ii: (0, 0))
    in_specs = [row_spec, row_spec,
                pl.BlockSpec((H, H), lambda b, si, ii: (0, 0)),
                vec_spec,
                pl.BlockSpec((1, H, 2 * block_i), lambda b, si, ii: (ii, 0, 0)),
                pl.BlockSpec((1, block_i, H), lambda b, si, ii: (ii, 0, 0))]
    args = [x, ctx, wo, ln2, wgu3, wd3]
    if final_norm_w is not None:
        in_specs.append(vec_spec)
        args.append(final_norm_w)
    return pl.pallas_call(
        functools.partial(attn_mlp_kernel, block_i=block_i,
                          apply_final_norm=final_norm_w is not None),
        out_shape=jax.ShapeDtypeStruct((B, S, H), jnp.bfloat16),
        grid=grid,
        in_specs=in_specs,
        out_specs=row_spec,
        scratch_shapes=[pltpu.VMEM((block_s, H), jnp.bfloat16),   # normalized hn
                        pltpu.VMEM((block_s, H), jnp.float32)],   # residual + acc
        compiler_params=mosaic_params(("parallel", "parallel", "arbitrary")),
    )(*args)


def lm_head(x, embed_bf16, *, block_s, block_v):
    B, S, H = x.shape
    V = embed_bf16.shape[0]
    block_s = min(block_s, S)
    block_v = min(block_v, V)
    assert V % block_v == 0 and S % block_s == 0
    # Vocab tile is kept resident across the innermost S loop.
    grid = (B, V // block_v, S // block_s)
    return pl.pallas_call(
        lm_head_kernel,
        out_shape=jax.ShapeDtypeStruct((B, S, V), jnp.float32),
        grid=grid,
        in_specs=[pl.BlockSpec((1, block_s, H), lambda b, vi, si: (b, si, 0)),
                  pl.BlockSpec((block_v, H), lambda b, vi, si: (vi, 0))],
        out_specs=pl.BlockSpec((1, block_s, block_v),
                               lambda b, vi, si: (b, si, vi)),
        compiler_params=mosaic_params(("parallel", "parallel", "parallel")),
    )(x, embed_bf16)


# ----------------------------------------------------------------------------
# Weight preparation (fused QKV, fused + zero-padded + I-tiled SwiGLU weights)
# ----------------------------------------------------------------------------
def prepare_weights(params, *, block_i):
    H = params['layers'][0]['wq'].shape[0]
    I = params['layers'][0]['wg'].shape[1]
    nI = -(-I // block_i)
    I_pad = nI * block_i                   # zero-padding is numerically identical
    pad = I_pad - I
    prepped = []
    for lw in params['layers']:
        wqkv = jnp.concatenate([lw['wq'], lw['wk'], lw['wv']], axis=1)  # (H, 3H)
        wg = jnp.pad(lw['wg'], ((0, 0), (0, pad)))
        wu = jnp.pad(lw['wu'], ((0, 0), (0, pad)))
        wd = jnp.pad(lw['wd'], ((0, pad), (0, 0)))
        wg3 = wg.reshape(H, nI, block_i).transpose(1, 0, 2)   # (nI, H, bI)
        wu3 = wu.reshape(H, nI, block_i).transpose(1, 0, 2)
        wgu3 = jnp.concatenate([wg3, wu3], axis=-1)           # (nI, H, 2*bI)
        wd3 = wd.reshape(nI, block_i, H)                      # (nI, bI, H)
        prepped.append(dict(ln1=lw['ln1'], ln2=lw['ln2'], wqkv=wqkv,
                            wo=lw['wo'], wgu3=wgu3, wd3=wd3))
    return prepped


def retriever_forward(input_ids, params, rope_tabs, *, num_heads, head_dim,
                      block_s=256, block_q=256, block_k=256, block_v=512,
                      block_i=512):
    cos_f, sin_a, sin_b = rope_tabs
    layers = prepare_weights(params, block_i=block_i)
    # TODO(synk): embedding gather stays in plain JAX (data-dependent gather).
    x = params['embed'][input_ids].astype(jnp.bfloat16)     # bf16 residual stream
    n_layers = len(layers)
    for li, lw in enumerate(layers):
        q, k, v = qkv_rope(x, lw['ln1'], lw['wqkv'], cos_f, sin_a, sin_b,
                           head_dim=head_dim, block_s=block_s)
        ctx = flash_attention(q, k, v, num_heads=num_heads, head_dim=head_dim,
                              block_q=block_q, block_k=block_k)
        x = attn_out_mlp(
            x, ctx, lw['wo'], lw['ln2'], lw['wgu3'], lw['wd3'],
            block_s=block_s, block_i=block_i,
            final_norm_w=params['norm_w'] if li == n_layers - 1 else None)
    return lm_head(x, params['embed_bf16'], block_s=block_s, block_v=block_v)


# ----------------------------------------------------------------------------
# RoPE tables & deterministic parameters
# ----------------------------------------------------------------------------
def rope_tables(seq_len, hidden, head_dim, base=10000.0):
    inv_freq = 1.0 / (base ** (np.arange(0, head_dim, 2, dtype=np.float32)
                               / head_dim))
    t = np.arange(seq_len, dtype=np.float32)
    freqs = np.einsum('i,j->ij', t, inv_freq)
    emb = np.concatenate([freqs, freqs], axis=-1)          # (S, dh)
    cos = np.cos(emb).astype(np.float32)
    sin = np.sin(emb).astype(np.float32)
    nh = hidden // head_dim
    cos_f = np.tile(cos, (1, nh))                          # (S, H)
    sin_f = np.tile(sin, (1, nh))
    first = (np.arange(hidden) % head_dim) < (head_dim // 2)
    sin_a = np.where(first[None, :], -sin_f, 0.0)
    sin_b = np.where(first[None, :], 0.0, sin_f)
    # bf16 tables for the kernel (quarter the side-input DMA); the reference
    # uses the same bf16-rounded values upcast to f32, so both paths match.
    cos_bf = jnp.asarray(cos_f, jnp.bfloat16)
    sin_a_bf = jnp.asarray(sin_a, jnp.bfloat16)
    sin_b_bf = jnp.asarray(sin_b, jnp.bfloat16)
    cos_hd = jnp.asarray(cos, jnp.bfloat16).astype(jnp.float32)   # (S, dh)
    sin_hd = jnp.asarray(sin, jnp.bfloat16).astype(jnp.float32)
    return cos_bf, sin_a_bf, sin_b_bf, cos_hd, sin_hd


def init_params(key, vocab, hidden, inter, num_layers):
    std = 0.02
    std_res = 0.02 / math.sqrt(2 * num_layers)   # o_proj / down_proj scaling
    keys = jax.random.split(key, 1 + 7 * num_layers)
    embed = std * jax.random.normal(keys[0], (vocab, hidden), jnp.float32)
    layers, ki = [], 1
    bf = lambda a: a.astype(jnp.bfloat16)
    for _ in range(num_layers):
        layers.append(dict(
            ln1=jnp.ones((1, hidden), jnp.float32),
            wq=bf(std * jax.random.normal(keys[ki + 0], (hidden, hidden), jnp.float32)),
            wk=bf(std * jax.random.normal(keys[ki + 1], (hidden, hidden), jnp.float32)),
            wv=bf(std * jax.random.normal(keys[ki + 2], (hidden, hidden), jnp.float32)),
            wo=bf(std_res * jax.random.normal(keys[ki + 3], (hidden, hidden), jnp.float32)),
            ln2=jnp.ones((1, hidden), jnp.float32),
            wg=bf(std * jax.random.normal(keys[ki + 4], (hidden, inter), jnp.float32)),
            wu=bf(std * jax.random.normal(keys[ki + 5], (hidden, inter), jnp.float32)),
            wd=bf(std_res * jax.random.normal(keys[ki + 6], (inter, hidden), jnp.float32)),
        ))
        ki += 7
    return dict(embed=embed, embed_bf16=embed.astype(jnp.bfloat16),
                layers=layers, norm_w=jnp.ones((1, hidden), jnp.float32))


# ----------------------------------------------------------------------------
# Pure-JAX reference (mirrors the kernel precision: bf16 matmul inputs, f32
# accumulation, bf16 residual stream between fused kernels)
# ----------------------------------------------------------------------------
def ref_rmsnorm(x, w):
    var = jnp.mean(x * x, axis=-1, keepdims=True)
    return x * jax.lax.rsqrt(var + EPS) * w.reshape(-1)


def ref_forward(input_ids, params, cos, sin, num_heads, head_dim):
    x = params['embed'][input_ids].astype(jnp.bfloat16).astype(jnp.float32)
    B, S, H = x.shape
    row = jnp.arange(S)[:, None]
    col = jnp.arange(S)[None, :]
    mask = jnp.where(col <= row, 0.0, NEG).astype(jnp.float32)

    def rot_half(t):
        t1, t2 = t[..., :head_dim // 2], t[..., head_dim // 2:]
        return jnp.concatenate([-t2, t1], axis=-1)

    def mm(a, b):   # bf16 matmul inputs, f32 accumulation (mirrors the kernels)
        return jnp.dot(a.astype(jnp.bfloat16), b,
                       preferred_element_type=jnp.float32)

    n_layers = len(params['layers'])
    for li, lw in enumerate(params['layers']):
        hn = ref_rmsnorm(x, lw['ln1'])
        q = mm(hn, lw['wq']).reshape(B, S, num_heads, head_dim).transpose(0, 2, 1, 3)
        k = mm(hn, lw['wk']).reshape(B, S, num_heads, head_dim).transpose(0, 2, 1, 3)
        v = mm(hn, lw['wv']).reshape(B, S, num_heads, head_dim).transpose(0, 2, 1, 3)
        q = (q * cos + rot_half(q) * sin).astype(jnp.bfloat16)
        k = (k * cos + rot_half(k) * sin).astype(jnp.bfloat16)
        v = v.astype(jnp.bfloat16)
        scores = jnp.einsum('bhqd,bhkd->bhqk', q, k,
                            preferred_element_type=jnp.float32) / math.sqrt(head_dim)
        p = jax.nn.softmax(scores + mask, axis=-1)
        ctx = jnp.einsum('bhqk,bhkd->bhqd', p.astype(jnp.bfloat16), v,
                         preferred_element_type=jnp.float32)
        ctx = ctx.transpose(0, 2, 1, 3).reshape(B, S, H)
        x = x + mm(ctx, lw['wo'])
        hn2 = ref_rmsnorm(x, lw['ln2'])
        g = mm(hn2, lw['wg'])
        u = mm(hn2, lw['wu'])
        x = x + mm(jax.nn.silu(g) * u, lw['wd'])
        if li < n_layers - 1:
            # residual stream is carried in bf16 between fused kernels
            x = x.astype(jnp.bfloat16).astype(jnp.float32)
    hn = ref_rmsnorm(x, params['norm_w'])
    return jax.lax.dot_general(hn.astype(jnp.bfloat16), params['embed_bf16'],
                               (((2,), (1,)), ((), ())),
                               preferred_element_type=jnp.float32)


# ----------------------------------------------------------------------------
if __name__ == "__main__":
    # Small, lane-aligned config consistent with the module's forward.
    B, S, H, NH, V, L = 2, 128, 256, 2, 512, 2
    DH = H // NH                      # 128 -> lane-aligned head blocks
    I = int(H * 2.68)                 # 686; zero-padded to 768 inside the kernels

    key = jax.random.PRNGKey(0)
    k_params, k_ids = jax.random.split(key)
    params = init_params(k_params, V, H, I, L)
    input_ids = jax.random.randint(k_ids, (B, S), 0, V, dtype=jnp.int32)

    cos_f, sin_a, sin_b, cos_hd, sin_hd = rope_tables(S, H, DH)

    # Requested blocks follow the large-tile defaults; the wrappers clamp them
    # to these toy shapes.  block_i=384 exercises the I-accumulation axis.
    logits = retriever_forward(input_ids, params, (cos_f, sin_a, sin_b),
                               num_heads=NH, head_dim=DH,
                               block_s=256, block_q=256, block_k=256,
                               block_v=512, block_i=384)
    logits = jax.block_until_ready(logits)

    ref = ref_forward(input_ids, params, cos_hd, sin_hd, NH, DH)
    np.testing.assert_allclose(np.asarray(logits), np.asarray(ref),
                               rtol=2e-2, atol=2e-2)
    print("KERNEL_OK")
</pallas_src>

<mosaic_0001>
module attributes {stable_mosaic.version = 11 : i64} {
  func.func @qkv_rope_kernel(%arg0: i32, %arg1: i32, %arg2: memref<1x128x256xbf16, #tpu.memory_space<vmem>>, %arg3: memref<1x256xf32, #tpu.memory_space<vmem>>, %arg4: memref<256x768xbf16, #tpu.memory_space<vmem>>, %arg5: memref<128x256xbf16, #tpu.memory_space<vmem>>, %arg6: memref<128x256xbf16, #tpu.memory_space<vmem>>, %arg7: memref<128x256xbf16, #tpu.memory_space<vmem>>, %arg8: memref<1x128x256xbf16, #tpu.memory_space<vmem>>, %arg9: memref<1x128x256xbf16, #tpu.memory_space<vmem>>, %arg10: memref<1x128x256xbf16, #tpu.memory_space<vmem>>) attributes {dimension_semantics = [#tpu.dimension_semantics<parallel>, #tpu.dimension_semantics<parallel>], iteration_bounds = array<i64: 2, 1>, scalar_prefetch = 0 : i64, scratch_operands = 0 : i64, tpu.core_type = #tpu.core_type<tc>, window_params = [{transform_indices = @transform_0, window_bounds = array<i64: 1, 128, 256>}, {pipeline_mode = #tpu.pipeline_mode<synchronous>, transform_indices = @transform_1, window_bounds = array<i64: 1, 256>}, {pipeline_mode = #tpu.pipeline_mode<synchronous>, transform_indices = @transform_2, window_bounds = array<i64: 256, 768>}, {transform_indices = @transform_3, window_bounds = array<i64: 128, 256>}, {transform_indices = @transform_4, window_bounds = array<i64: 128, 256>}, {transform_indices = @transform_5, window_bounds = array<i64: 128, 256>}, {transform_indices = @transform_6, window_bounds = array<i64: 1, 128, 256>}, {transform_indices = @transform_7, window_bounds = array<i64: 1, 128, 256>}, {transform_indices = @transform_8, window_bounds = array<i64: 1, 128, 256>}]} {
    %c0 = arith.constant 0 : index
    %c0_0 = arith.constant 0 : index
    %c0_1 = arith.constant 0 : index
    %0 = vector.load %arg2[%c0, %c0_0, %c0_1] : memref<1x128x256xbf16, #tpu.memory_space<vmem>>, vector<1x128x256xbf16>
    %1 = vector.shape_cast %0 : vector<1x128x256xbf16> to vector<128x256xbf16>
    %2 = arith.extf %1 : vector<128x256xbf16> to vector<128x256xf32>
    %3 = arith.mulf %2, %2 : vector<128x256xf32>
    %cst = arith.constant dense<0.000000e+00> : vector<128xf32>
    %4 = vector.multi_reduction <add>, %3, %cst [1] : vector<128x256xf32> to vector<128xf32>
    %5 = vector.shape_cast %4 : vector<128xf32> to vector<128x1xf32>
    %cst_2 = arith.constant 2.560000e+02 : f32
    %6 = vector.broadcast %cst_2 : f32 to vector<128x1xf32>
    %7 = arith.divf %5, %6 : vector<128x1xf32>
    %cst_3 = arith.constant 9.99999974E-6 : f32
    %8 = vector.broadcast %cst_3 : f32 to vector<128x1xf32>
    %9 = arith.addf %7, %8 : vector<128x1xf32>
    %10 = math.rsqrt %9 : vector<128x1xf32>
    %11 = vector.broadcast %10 : vector<128x1xf32> to vector<128x256xf32>
    %12 = arith.mulf %2, %11 : vector<128x256xf32>
    %c0_4 = arith.constant 0 : index
    %c0_5 = arith.constant 0 : index
    %13 = vector.load %arg3[%c0_4, %c0_5] : memref<1x256xf32, #tpu.memory_space<vmem>>, vector<1x256xf32>
    %14 = vector.shape_cast %13 : vector<1x256xf32> to vector<256xf32>
    %15 = vector.shape_cast %14 : vector<256xf32> to vector<1x256xf32>
    %16 = vector.broadcast %15 : vector<1x256xf32> to vector<128x256xf32>
    %17 = arith.mulf %12, %16 : vector<128x256xf32>
    %18 = arith.truncf %17 : vector<128x256xf32> to vector<128x256xbf16>
    %c0_6 = arith.constant 0 : index
    %c0_7 = arith.constant 0 : index
    %19 = vector.load %arg4[%c0_6, %c0_7] : memref<256x768xbf16, #tpu.memory_space<vmem>>, vector<256x768xbf16>
    %cst_8 = arith.constant dense<0.000000e+00> : vector<128x768xf32>
    %20 = tpu.matmul %18, %19, %cst_8 {dimension_numbers = #tpu.dot_dimension_numbers<[1], [0], [0], [1], [0, 0, 1, 1], [], []>} : vector<128x256xbf16>, vector<256x768xbf16>, vector<128x768xf32> -> vector<128x768xf32>
    %21 = vector.extract_strided_slice %20 {offsets = [0, 0], sizes = [128, 256], strides = [1, 1]} : vector<128x768xf32> to vector<128x256xf32>
    %22 = vector.extract_strided_slice %20 {offsets = [0, 256], sizes = [128, 256], strides = [1, 1]} : vector<128x768xf32> to vector<128x256xf32>
    %23 = vector.extract_strided_slice %20 {offsets = [0, 512], sizes = [128, 256], strides = [1, 1]} : vector<128x768xf32> to vector<128x256xf32>
    %c0_9 = arith.constant 0 : index
    %c0_10 = arith.constant 0 : index
    %24 = vector.load %arg5[%c0_9, %c0_10] : memref<128x256xbf16, #tpu.memory_space<vmem>>, vector<128x256xbf16>
    %c0_11 = arith.constant 0 : index
    %c0_12 = arith.constant 0 : index
    %25 = vector.load %arg6[%c0_11, %c0_12] : memref<128x256xbf16, #tpu.memory_space<vmem>>, vector<128x256xbf16>
    %c0_13 = arith.constant 0 : index
    %c0_14 = arith.constant 0 : index
    %26 = vector.load %arg7[%c0_13, %c0_14] : memref<128x256xbf16, #tpu.memory_space<vmem>>, vector<128x256xbf16>
    %27 = arith.extf %24 : vector<128x256xbf16> to vector<128x256xf32>
    %28 = arith.mulf %21, %27 : vector<128x256xf32>
    %c64_i32 = arith.constant 64 : i32
    %29 = tpu.dynamic_rotate %21 by %c64_i32 dim 1 : vector<128x256xf32>, i32 -> vector<128x256xf32>
    %30 = arith.extf %26 : vector<128x256xbf16> to vector<128x256xf32>
    %31 = arith.mulf %29, %30 : vector<128x256xf32>
    %32 = arith.addf %28, %31 : vector<128x256xf32>
    %c192_i32 = arith.constant 192 : i32
    %33 = tpu.dynamic_rotate %21 by %c192_i32 dim 1 : vector<128x256xf32>, i32 -> vector<128x256xf32>
    %34 = arith.extf %25 : vector<128x256xbf16> to vector<128x256xf32>
    %35 = arith.mulf %33, %34 : vector<128x256xf32>
    %36 = arith.addf %32, %35 : vector<128x256xf32>
    %37 = arith.truncf %36 : vector<128x256xf32> to vector<128x256xbf16>
    %c0_15 = arith.constant 0 : index
    %c0_16 = arith.constant 0 : index
    %c0_17 = arith.constant 0 : index
    %38 = vector.load %arg8[%c0_15, %c0_16, %c0_17] : memref<1x128x256xbf16, #tpu.memory_space<vmem>>, vector<1x128x256xbf16>
    %39 = vector.shape_cast %38 : vector<1x128x256xbf16> to vector<128x256xbf16>
    %40 = vector.shape_cast %37 : vector<128x256xbf16> to vector<1x128x256xbf16>
    tpu.vector_store %arg8[%c0_15, %c0_16, %c0_17], %40 {strides = array<i32>} : memref<1x128x256xbf16, #tpu.memory_space<vmem>>, vector<1x128x256xbf16>,
    %41 = arith.extf %24 : vector<128x256xbf16> to vector<128x256xf32>
    %42 = arith.mulf %22, %41 : vector<128x256xf32>
    %c64_i32_18 = arith.constant 64 : i32
    %43 = tpu.dynamic_rotate %22 by %c64_i32_18 dim 1 : vector<128x256xf32>, i32 -> vector<128x256xf32>
    %44 = arith.extf %26 : vector<128x256xbf16> to vector<128x256xf32>
    %45 = arith.mulf %43, %44 : vector<128x256xf32>
    %46 = arith.addf %42, %45 : vector<128x256xf32>
    %c192_i32_19 = arith.constant 192 : i32
    %47 = tpu.dynamic_rotate %22 by %c192_i32_19 dim 1 : vector<128x256xf32>, i32 -> vector<128x256xf32>
    %48 = arith.extf %25 : vector<128x256xbf16> to vector<128x256xf32>
    %49 = arith.mulf %47, %48 : vector<128x256xf32>
    %50 = arith.addf %46, %49 : vector<128x256xf32>
    %51 = arith.truncf %50 : vector<128x256xf32> to vector<128x256xbf16>
    %c0_20 = arith.constant 0 : index
    %c0_21 = arith.constant 0 : index
    %c0_22 = arith.constant 0 : index
    %52 = vector.load %arg9[%c0_20, %c0_21, %c0_22] : memref<1x128x256xbf16, #tpu.memory_space<vmem>>, vector<1x128x256xbf16>
    %53 = vector.shape_cast %52 : vector<1x128x256xbf16> to vector<128x256xbf16>
    %54 = vector.shape_cast %51 : vector<128x256xbf16> to vector<1x128x256xbf16>
    tpu.vector_store %arg9[%c0_20, %c0_21, %c0_22], %54 {strides = array<i32>} : memref<1x128x256xbf16, #tpu.memory_space<vmem>>, vector<1x128x256xbf16>,
    %55 = arith.truncf %23 : vector<128x256xf32> to vector<128x256xbf16>
    %c0_23 = arith.constant 0 : index
    %c0_24 = arith.constant 0 : index
    %c0_25 = arith.constant 0 : index
    %56 = vector.load %arg10[%c0_23, %c0_24, %c0_25] : memref<1x128x256xbf16, #tpu.memory_space<vmem>>, vector<1x128x256xbf16>
    %57 = vector.shape_cast %56 : vector<1x128x256xbf16> to vector<128x256xbf16>
    %58 = vector.shape_cast %55 : vector<128x256xbf16> to vector<1x128x256xbf16>
    tpu.vector_store %arg10[%c0_23, %c0_24, %c0_25], %58 {strides = array<i32>} : memref<1x128x256xbf16, #tpu.memory_space<vmem>>, vector<1x128x256xbf16>,
    return
  }
  func.func @transform_0(%arg0: i32, %arg1: i32) -> (i32, i32, i32) {
    %c0_i32 = arith.constant 0 : i32
    %c0_i32_0 = arith.constant 0 : i32
    return %arg0, %arg1, %c0_i32 : i32, i32, i32
  }
  func.func @transform_1(%arg0: i32, %arg1: i32) -> (i32, i32) {
    %c0_i32 = arith.constant 0 : i32
    %c0_i32_0 = arith.constant 0 : i32
    %c0_i32_1 = arith.constant 0 : i32
    return %c0_i32, %c0_i32_0 : i32, i32
  }
  func.func @transform_2(%arg0: i32, %arg1: i32) -> (i32, i32) {
    %c0_i32 = arith.constant 0 : i32
    %c0_i32_0 = arith.constant 0 : i32
    %c0_i32_1 = arith.constant 0 : i32
    return %c0_i32, %c0_i32_0 : i32, i32
  }
  func.func @transform_3(%arg0: i32, %arg1: i32) -> (i32, i32) {
    %c0_i32 = arith.constant 0 : i32
    %c0_i32_0 = arith.constant 0 : i32
    return %arg1, %c0_i32 : i32, i32
  }
  func.func @transform_4(%arg0: i32, %arg1: i32) -> (i32, i32) {
    %c0_i32 = arith.constant 0 : i32
    %c0_i32_0 = arith.constant 0 : i32
    return %arg1, %c0_i32 : i32, i32
  }
  func.func @transform_5(%arg0: i32, %arg1: i32) -> (i32, i32) {
    %c0_i32 = arith.constant 0 : i32
    %c0_i32_0 = arith.constant 0 : i32
    return %arg1, %c0_i32 : i32, i32
  }
  func.func @transform_6(%arg0: i32, %arg1: i32) -> (i32, i32, i32) {
    %c0_i32 = arith.constant 0 : i32
    %c0_i32_0 = arith.constant 0 : i32
    return %arg0, %arg1, %c0_i32 : i32, i32, i32
  }
  func.func @transform_7(%arg0: i32, %arg1: i32) -> (i32, i32, i32) {
    %c0_i32 = arith.constant 0 : i32
    %c0_i32_0 = arith.constant 0 : i32
    return %arg0, %arg1, %c0_i32 : i32, i32, i32
  }
  func.func @transform_8(%arg0: i32, %arg1: i32) -> (i32, i32, i32) {
    %c0_i32 = arith.constant 0 : i32
    %c0_i32_0 = arith.constant 0 : i32
    return %arg0, %arg1, %c0_i32 : i32, i32, i32
  }
}

</mosaic_0001>

<bundles_post_ra>
// kernel: tpu_custom_call.1
= control target key start
LH: loop header
LB: loop body
LE: loop exit
PB: predicated region body
PF: predicated region fallthrough
CT: control target
= control target key end

     0   :  { %s5186_s0 = inlined_call_operand.hbm [shape: bf16[2,128,256], index: 0, kind: input, shape index: {}]   ;;  %s5187_s1 = inlined_call_operand.hbm [shape: f32[1,256], index: 1, kind: input, shape index: {}]   ;;  %s5188_s2 = inlined_call_operand.hbm [shape: bf16[256,768], index: 2, kind: input, shape index: {}]   ;;  %s5189_s3 = inlined_call_operand.hbm [shape: bf16[128,256], index: 3, kind: input, shape index: {}]   ;;  %s5190_s4 = inlined_call_operand.hbm [shape: bf16[128,256], index: 4, kind: input, shape index: {}]   ;;  %s5191_s5 = inlined_call_operand.hbm [shape: bf16[128,256], index: 5, kind: input, shape index: {}]   ;;  %s5192_s6 = inlined_call_operand.hbm [shape: bf16[2,128,256], index: 6, kind: output, shape index: {0}]   ;;  %s5193_s7 = inlined_call_operand.hbm [shape: bf16[2,128,256], index: 7, kind: output, shape index: {1}]   ;;  %s5194_s8 = inlined_call_operand.hbm [shape: bf16[2,128,256], index: 8, kind: output, shape index: {2}]  }
   0x1   :  { %5242 = sst [smem:[#allocation59_spill]] %s5186_s0 }
   0x2   :  { %5243 = sst [smem:[#allocation60_spill]] %s5187_s1 }
   0x3   :  { %5244 = sst [smem:[#allocation61_spill]] %s5188_s2 }
   0x4   :  { %5245 = sst [smem:[#allocation62_spill]] %s5189_s3 }
   0x5   :  { %5246 = sst [smem:[#allocation63_spill]] %s5190_s4 }
   0x6   :  { %5247 = sst [smem:[#allocation64_spill]] %s5192_s6 }
   0x7   :  { %5248 = sst [smem:[#allocation65_spill]] %s5194_s8 }
   0x8   :  { %14 = vsyncpa [#allocation3], 0 }
   0x9   :  { %16 = vsyncpa [#allocation3 + $0x1], 0 }
   0xa   :  { %17 = vsyncpa [#allocation6], 0 }
   0xb   :  { %18 = vsyncpa [#allocation9], 0 }
   0xc   :  { %19 = vsyncpa [#allocation12], 0 }
   0xd   :  { %20 = vsyncpa [#allocation4], 0 }
   0xe   :  { %22 = vsyncpa [#allocation4 + $0x1], 0 }
   0xf   :  { %23 = vsyncpa [#allocation15], 0 }
  0x10   :  { %25 = vsyncpa [#allocation15 + $0x1], 0  ;;  %s3876_s27 = smov 0   ;;  %s3878_s28 = smov 0  }
  0x11   :  { %s3880_s29 = smov 0   ;;  %s3882_s30 = smov 0  }
  0x12   :  { %s3884_s9 = smov 0   ;;  %s3886_s10 = smov 0  }
  0x13 LB: > { %s3907_s11 = sadd.s32 4294967295, %s3813_s10   ;;  %p2924_p0 = scmp.ge.s32.totalorder %s3813_s10, 1  ;;  %s3813_s10 = sphi %s3886_s10, %s31_s10   ;;  %s3809_s9 = sphi %s3884_s9, %s5364_s9   ;;  %s3805_s30 = sphi %s3882_s30, %s5363_s30   ;;  %s3801_s29 = sphi %s3880_s29, %s5362_s29   ;;  %s3797_s28 = sphi %s3878_s28, %s5361_s28   ;;  %s3793_s27 = sphi %s3876_s27, %s5360_s27  }
  0x14   : > { %p5195_p1 = scmp.eq.s32.totalorder %s3907_s11, 0  ;;  %p280_p2 = scmp.lt.s32.totalorder %s3813_s10, 3 }
  0x15   : > { %s3815_s13 = smov [#allocation5]   ;;  %s3816_s15 = smov [#allocation8]  }
  0x16   : > { %p3912_p3 = pnand %p2924_p0, %p280_p2  ;;  %s293_s14 = sshll.u32 %s3815_s13, 4  ;;  %s294_s14 = int_to_ptr.vmem [resolvable:$true] %s293_s14 }
  0x17   : > { %s320_s16 = sshll.u32 %s3816_s15, 4  ;;  %s3817_s18 = smov [#allocation7]   ;;  %s3925_s16 = int_to_ptr.vmem [resolvable:$true] %s320_s16 }
  0x18   : > { %s5249_s12 = scalar_select %p3912_p3, 1, 0 }
  0x19   : > { %p3211_p5 = pneg %p3912_p3  ;;  %s3927_s19 = sshll.u32 %s3817_s18, 4  ;;  %s304_s19 = int_to_ptr.vmem [resolvable:$true] %s3927_s19 }
  0x1a   : > { %s5251_s1 = sld [smem:[#allocation60_spill]] }
  0x1b   : > { %p3921_p6 = pnand %p3211_p5, %p5195_p1 }
  0x1d   : > { %p3937_p8 = pneg %p3921_p6 }
  0x20   : > { %s3489_s22 = scalar_lea.hbm %s5251_s1, 32 }
  0x21   : > { %p3490_p7 = scmp.ne.s32.totalorder %s5251_s1, %s3489_s22  ;;  %p3496_p11 = scmp.lt.u32.totalorder %s3489_s22, %s5251_s1 }
  0x23   : > { %p3492_p9 = pnand %p3937_p8, %p3490_p7 }
  0x25   : > { %p3493_p10 = pneg %p3492_p9 }
  0x27   : > { %p3498_p12 = pnand %p3496_p11, %p3493_p10 }
  0x29   : > { %3501 = shalt.err (!%p3498_p12)
}
  0x2a   : > { %s3502_s15 = scalar_lea.vmem %s294_s14, 32  ;;  %p3510_p5 = scmp.lt.s32.totalorder %s294_s14, %s294_s14 }
  0x2b   : > { %p3503_p13 = scmp.ne.s32.totalorder %s294_s14, %s3502_s15  ;;  %p3511_p4 = scmp.lt.s32.totalorder %s3502_s15, %s3502_s15 }
  0x2d   : > { %p3505_p0 = pnand %p3503_p13, %p3937_p8  ;;  %p3512_p1 = por %p3511_p4, %p3510_p5 }
  0x2f   : > { %p3506_p2 = pneg %p3505_p0 }
  0x31   : > { %p3513_p3 = pnand %p3512_p1, %p3506_p2 }
  0x33   : > { %3516 = shalt.err (!%p3513_p3)
}
  0x34   : > { %3214 = dma.hbm_to_vmem [thread:$0]  (!%p3921_p6), %s5251_s1, 32, %s294_s14, [#allocation6]  }
  0x35   : > { %s5253_s3 = sld [smem:[#allocation62_spill]] }
  0x3b   : > { %s3517_s23 = scalar_lea.hbm %s5253_s3, 2048 }
  0x3c   : > { %p3518_p7 = scmp.ne.s32.totalorder %s5253_s3, %s3517_s23  ;;  %p3524_p1 = scmp.lt.u32.totalorder %s3517_s23, %s5253_s3 }
  0x3e   : > { %p3520_p9 = pnand %p3518_p7, %p3937_p8 }
  0x40   : > { %p3521_p4 = pneg %p3520_p9 }
  0x42   : > { %p3526_p3 = pnand %p3524_p1, %p3521_p4 }
  0x44   : > { %3529 = shalt.err (!%p3526_p3)
}
  0x45   : > { %s3530_s14 = scalar_lea.vmem %s3925_s16, 2048  ;;  %p3538_p13 = scmp.lt.s32.totalorder %s3925_s16, %s3925_s16 }
  0x46   : > { %p3531_p10 = scmp.ne.s32.totalorder %s3925_s16, %s3530_s14  ;;  %p3539_p0 = scmp.lt.s32.totalorder %s3530_s14, %s3530_s14 }
  0x48   : > { %p3533_p11 = pnand %p3531_p10, %p3937_p8  ;;  %p3540_p2 = por %p3539_p0, %p3538_p13 }
  0x4a   : > { %p3534_p12 = pneg %p3533_p11 }
  0x4c   : > { %p3541_p5 = pnand %p3540_p2, %p3534_p12 }
  0x4e   : > { %3544 = shalt.err (!%p3541_p5)
}
  0x4f   : > { %s5197_s18 = smov 128   ;;  %s5199_s20 = smov 8  }
  0x50   : > { %3220 = dma.hbm_to_vmem [thread:$0]  (!%p3921_p6), %s5253_s3, 2048, %s3925_s16, [#allocation9], %s5197_s18, %s5197_s18, %s5199_s20  }
  0x51   : > { %s5254_s2 = sld [smem:[#allocation61_spill]] }
  0x57   : > { %s3545_s26 = scalar_lea.hbm %s5254_s2, 12288 }
  0x58   : > { %p3546_p7 = scmp.ne.s32.totalorder %s5254_s2, %s3545_s26  ;;  %p3552_p1 = scmp.lt.u32.totalorder %s3545_s26, %s5254_s2 }
  0x5a   : > { %p3548_p9 = pnand %p3546_p7, %p3937_p8 }
  0x5c   : > { %p3549_p4 = pneg %p3548_p9 }
  0x5e   : > { %p3554_p3 = pnand %p3552_p1, %p3549_p4 }
  0x60   : > { %3557 = shalt.err (!%p3554_p3)
}
  0x61   : > { %s3558_s21 = scalar_lea.vmem %s304_s19, 12288  ;;  %p3566_p13 = scmp.lt.s32.totalorder %s304_s19, %s304_s19 }
  0x62   : > { %p3559_p10 = scmp.ne.s32.totalorder %s304_s19, %s3558_s21  ;;  %p3567_p0 = scmp.lt.s32.totalorder %s3558_s21, %s3558_s21 }
  0x64   : > { %p3561_p11 = pnand %p3559_p10, %p3937_p8  ;;  %p3568_p2 = por %p3567_p0, %p3566_p13 }
  0x66   : > { %p3562_p12 = pneg %p3561_p11 }
  0x68   : > { %p3569_p5 = pnand %p3568_p2, %p3562_p12 }
  0x6a   : > { %3572 = shalt.err (!%p3569_p5)
}
  0x6b   : > { %s3820_s16 = smov 384   ;;  %s3821_s22 = smov 24  }
  0x6c   : > { %3217 = dma.hbm_to_vmem [thread:$0]  (!%p3921_p6), %s5254_s2, 12288, %s304_s19, [#allocation6], %s3820_s16, %s3820_s16, %s3821_s22  }
  0x6d   : > { %s3822_s24 = smov [#allocation10]   ;;  %s3823_s13 = smov [#allocation11]  }
  0x6e   : > { %s337_s26 = sshll.u32 %s3822_s24, 4  ;;  %s354_s15 = sshll.u32 %s3823_s13, 4  ;;  %s338_s26 = int_to_ptr.vmem [resolvable:$true] %s337_s26  ;;  %s355_s15 = int_to_ptr.vmem [resolvable:$true] %s354_s15 }
  0x6f   : > { %s5255_s4 = sld [smem:[#allocation63_spill]] }
  0x75   : > { %s3573_s21 = scalar_lea.hbm %s5255_s4, 2048 }
  0x76   : > { %p3574_p7 = scmp.ne.s32.totalorder %s5255_s4, %s3573_s21  ;;  %p3580_p1 = scmp.lt.u32.totalorder %s3573_s21, %s5255_s4 }
  0x78   : > { %p3576_p9 = pnand %p3574_p7, %p3937_p8 }
  0x7a   : > { %p3577_p4 = pneg %p3576_p9 }
  0x7c   : > { %p3582_p3 = pnand %p3580_p1, %p3577_p4 }
  0x7e   : > { %3585 = shalt.err (!%p3582_p3)
}
  0x7f   : > { %s3586_s19 = scalar_lea.vmem %s338_s26, 2048  ;;  %p3594_p13 = scmp.lt.s32.totalorder %s338_s26, %s338_s26 }
  0x80   : > { %p3587_p10 = scmp.ne.s32.totalorder %s338_s26, %s3586_s19  ;;  %p3595_p0 = scmp.lt.s32.totalorder %s3586_s19, %s3586_s19 }
  0x82   : > { %p3589_p11 = pnand %p3587_p10, %p3937_p8  ;;  %p3596_p2 = por %p3595_p0, %p3594_p13 }
  0x84   : > { %p3590_p12 = pneg %p3589_p11 }
  0x86   : > { %p3597_p5 = pnand %p3596_p2, %p3590_p12 }
  0x88   : > { %3600 = shalt.err (!%p3597_p5)
}
  0x89   : > { %s5256_s3 = smov 8   ;;  %s5257_s18 = smov 128  }
  0x8a   : > { %3223 = dma.hbm_to_vmem [thread:$0]  (!%p3921_p6), %s5255_s4, 2048, %s338_s26, [#allocation9], %s5257_s18, %s5257_s18, %s5256_s3  }
  0x8b   : > { %s3601_s22 = scalar_lea.hbm %s5191_s5, 2048 }
  0x8c   : > { %p3602_p7 = scmp.ne.s32.totalorder %s5191_s5, %s3601_s22  ;;  %p3608_p1 = scmp.lt.u32.totalorder %s3601_s22, %s5191_s5 }
  0x8e   : > { %p3604_p9 = pnand %p3602_p7, %p3937_p8 }
  0x90   : > { %p3605_p4 = pneg %p3604_p9 }
  0x92   : > { %p3610_p3 = pnand %p3608_p1, %p3605_p4 }
  0x94   : > { %3613 = shalt.err (!%p3610_p3)
}
  0x95   : > { %s3614_s14 = scalar_lea.vmem %s355_s15, 2048  ;;  %p3622_p13 = scmp.lt.s32.totalorder %s355_s15, %s355_s15 }
  0x96   : > { %p3615_p10 = scmp.ne.s32.totalorder %s355_s15, %s3614_s14  ;;  %p3623_p0 = scmp.lt.s32.totalorder %s3614_s14, %s3614_s14 }
  0x98   : > { %p3617_p11 = pnand %p3615_p10, %p3937_p8  ;;  %p3624_p2 = por %p3623_p0, %p3622_p13 }
  0x9a   : > { %p3618_p12 = pneg %p3617_p11 }
  0x9c   : > { %p3625_p5 = pnand %p3624_p2, %p3618_p12 }
  0x9e   : > { %3628 = shalt.err (!%p3625_p5)
}
  0x9f   : > { %3226 = dma.hbm_to_vmem [thread:$0]  (!%p3921_p6), %s5191_s5, 2048, %s355_s15, [#allocation12], %s5257_s18, %s5257_s18, %s5256_s3  }
  0xa0   : > { %s5203_s17 = sadd.s32 4294967294, %s3813_s10   ;;  %s43_s25 = sadd.s32 1, %s3809_s9 }
  0xa1   : > { %s52_s19 = sadd.s32 1, %s3801_s29  ;;  %p45_p8 = scmp.ge.s32.totalorder %s43_s25, 2 }
  0xa2   : > { %p59_p7 = scmp.ne.s32.totalorder %s3801_s29, %s3797_s28  ;;  %p60_p9 = scmp.eq.s32.totalorder %s3813_s10, 0 }
  0xa3   : > { %p65_p4 = scmp.ne.s32.totalorder %s3797_s28, %s3793_s27  ;;  %s5366_s25 = smov (%p45_p8, %s43_s25), 0 }
  0xa4   : > { %p4050_p1 = por %p60_p9, %p59_p7  ;;  %p5259_p3 = scmp.eq.s32.totalorder %s3907_s11, 0 }
  0xa5   : > { %s47_s8 = ssub.s32 %s3809_s9, %s5366_s25  ;;  %p211_p10 = scmp.eq.s32.totalorder %s3907_s11, 1 }
  0xa6   : > { %p4056_p6 = por %p5259_p3, %p65_p4  ;;  %p50_p11 = scmp.eq.s32.totalorder %s47_s8, 0 }
  0xa7   : > { %p217_p12 = scmp.eq.s32.totalorder %s5203_s17, 1  ;;  %p4065_p13 = por %p211_p10, %p59_p7 }
  0xa8   : > { %p3246_p0 = scmp.lt.s32.totalorder %s3813_s10, 2  ;;  %s368_s1 = sand.u32 1, %s3801_s29  }
  0xa9   : > { %s5261_s20 = scalar_select %p4065_p13, 1, 0 }
  0xaa   : > { %s4071_s16 = scalar_select %p50_p11, %s3801_s29, %s52_s19  }
  0xab   : > { %p4073_p2 = por %p217_p12, %p65_p4  ;;  %s2931_s23 = sshll.u32 %s368_s1, 7 }
  0xac   : > { %s3099_s24 = sshll.u32 %s3809_s9, 11  ;;  %s5263_s0 = sld [smem:[#allocation59_spill]] }
  0xad   : > { %s5262_s22 = scalar_select %p4073_p2, 1, 0 }
  0xae   : > { %s372_s21 = scalar_lea.vmem [#allocation2], %s2931_s23  ;;  %p4088_p5 = pnand %p3246_p0, %p4050_p1 }
  0xaf   : > { %s382_s8 = sshll.u32 %s372_s21, 4  ;;  %s4092_s17 = scalar_lea.sflag [#allocation3], %s368_s1  ;;  %s4084_s8 = int_to_ptr.vmem [resolvable:$true] %s382_s8 }
  0xb0   : > { %p3631_p7 = pneg %p4088_p5 }
  0xb2   : > { %s4082_s26 = scalar_lea.hbm %s5263_s0, %s3099_s24  ;;  %s3634_s6 = scalar_lea.hbm %s5263_s0, 4096 }
  0xb3   : > { %s3629_s13 = scalar_lea.hbm %s4082_s26, 2048  ;;  %p3635_p1 = scmp.lt.u32.totalorder %s4082_s26, %s5263_s0 }
  0xb4   : > { %p3630_p8 = scmp.ne.s32.totalorder %s4082_s26, %s3629_s13  ;;  %p3636_p3 = scmp.lt.u32.totalorder %s3634_s6, %s3629_s13 }
  0xb5   : > { %p3638_p11 = scmp.lt.u32.totalorder %s3629_s13, %s4082_s26 }
  0xb6   : > { %p3632_p9 = pnand %p3631_p7, %p3630_p8  ;;  %p3637_p10 = por %p3636_p3, %p3635_p1 }
  0xb8   : > { %p3633_p4 = pneg %p3632_p9  ;;  %p3639_p12 = por %p3638_p11, %p3637_p10 }
  0xba   : > { %p3640_p0 = pnand %p3639_p12, %p3633_p4 }
  0xbc   : > { %3643 = shalt.err (!%p3640_p0)
}
  0xbd   : > { %s3644_s1 = scalar_lea.vmem %s4084_s8, 2048  ;;  %s3824_s23 = smov [#allocation2]  }
  0xbe   : > { %p3645_p8 = scmp.ne.s32.totalorder %s4084_s8, %s3644_s1  ;;  %s3649_s24 = sshll.u32 %s3824_s23, 4  ;;  %s3650_s24 = int_to_ptr.vmem [resolvable:$false] %s3649_s24 }
  0xbf   : > { %s3651_s14 = scalar_lea.vmem %s3650_s24, 4096  ;;  %p3652_p13 = scmp.lt.s32.totalorder %s4084_s8, %s3650_s24 }
  0xc0   : > { %p3647_p9 = pnand %p3645_p8, %p3631_p7  ;;  %p3653_p1 = scmp.lt.s32.totalorder %s3651_s14, %s3644_s1 }
  0xc2   : > { %p3648_p2 = pneg %p3647_p9  ;;  %p3654_p3 = por %p3653_p1, %p3652_p13 }
  0xc4   : > { %p3655_p10 = pnand %p3654_p3, %p3648_p2 }
  0xc6   : > { %3658 = shalt.err (!%p3655_p10)
}
  0xc7   : > { %3230 = dma.hbm_to_vmem [thread:$0]  (!%p4088_p5), %s4082_s26, 2048, %s4084_s8, %s4092_s17, %s5257_s18, %s5257_s18, %s5256_s3  }
  0xc8   : > { %p5265_p7 = scmp.ne.s32.totalorder %s5249_s12, 0 }
  0xca   : > { %394 = sbr.rel (%p5265_p7) target bundleno = 926 (0x39e), region = 44 }
  0xd1   : > { %s4126_s13 = sand.u32 1, %s3797_s28  }
  0xd2   : > { %s4129_s6 = sshll.u32 %s4126_s13, 7  ;;  %s397_s19 = scalar_lea.sflag [#allocation3], %s4126_s13 }
  0xd3   : > { %s4133_s21 = scalar_lea.vmem [#allocation2], %s4129_s6 }
  0xd4   : > { %3768 = dma.done.wait (%p4056_p6), %s397_s19, 2048  }
  0xd5   : > { %3770 = vsyncadd (%p4056_p6), %s397_s19, 4294965248  ;;  %p5266_p13 = scmp.eq.s32.totalorder %s3907_s11, 0 }
  0xd7   : > { %3772 = dma.done.wait (%p5266_p13), [#allocation6], 12320   ;;  %p5267_p2 = pmov %p5266_p13 }
  0xd9   : > { %3774 = vsyncadd (%p5267_p2), [#allocation6], 4294954976  ;;  %p5268_p5 = pmov %p5267_p2 }
  0xda   : > { %p5269_p4 = pmov %p5267_p2 }
  0xdb   : > { %3776 = dma.done.wait (%p5268_p5), [#allocation9], 4096  }
  0xdc   : > { %3778 = vsyncadd (%p5269_p4), [#allocation9], 4294963200  ;;  %p5270_p11 = pmov %p5267_p2 }
  0xdd   : > { %p5271_p12 = pmov %p5267_p2 }
  0xde   : > { %3780 = dma.done.wait (%p5270_p11), [#allocation12], 2048  }
  0xdf   : > { %3782 = vsyncadd (%p5271_p12), [#allocation12], 4294965248  ;;  %v470_v0 = vld [vmem:[%s4133_s21] sm:$0xff]  ;;  %v471_v1 = vld [vmem:[%s4133_s21 + $0x8] sm:$0xff]  ;;  %s3825_s12 = smov 64   ;;  %s4626_s3 = scalar_lea.vmem [#allocation16], %s4129_s6 }
  0xe0   : > { %v472_v2 = vld [vmem:[%s4133_s21 + $0x10] sm:$0xff]  ;;  %v4154_v3 = vunpack.c.l.bf16 %v470_v0  ;;  %v4156_v4 = vunpack.c.h.bf16 %v470_v0  ;;  %v4158_v5 = vunpack.c.l.bf16 %v471_v1  ;;  %v4160_v6 = vunpack.c.h.bf16 %v471_v1  ;;  %v473_v7 = vld [vmem:[%s4133_s21 + $0x18] sm:$0xff]  ;;  %v475_v12 = vld [vmem:[%s4133_s21 + $0x28] sm:$0xff]  ;;  %s4752_s18 = scalar_lea.vmem [#allocation13], %s4129_s6  ;;  %s4777_s17 = scalar_lea.vmem [#allocation14], %s4129_s6 }
  0xe1   : > { %v4163_v8 = vunpack.c.l.bf16 %v472_v2  ;;  %v4165_v9 = vunpack.c.h.bf16 %v472_v2  ;;  %v4167_v10 = vunpack.c.l.bf16 %v473_v7  ;;  %v4169_v11 = vunpack.c.h.bf16 %v473_v7  ;;  %v474_v17 = vld [vmem:[%s4133_s21 + $0x20] sm:$0xff]  ;;  %v477_v22 = vld [vmem:[%s4133_s21 + $0x38] sm:$0xff]  ;;  %v476_v27 = vld [vmem:[%s4133_s21 + $0x30] sm:$0xff]  ;;  %s3148_s26 = sshll.u32 %s3805_s30, 11  ;;  %s2695_s8 = sshll.u32 %s4777_s17, 4  ;;  %s5062_s8 = int_to_ptr.vmem [resolvable:$true] %s2695_s8 }
  0xe2   : > { %v518_v13 = vmul.f32 %v4154_v3, %v4154_v3  ;;  %v519_v14 = vmul.f32 %v4156_v4, %v4156_v4  ;;  %v520_v15 = vmul.f32 %v4158_v5, %v4158_v5  ;;  %v521_v16 = vmul.f32 %v4160_v6, %v4160_v6  ;;  %v478_v32 = vld [vmem:[%s4133_s21 + $0x40] sm:$0xff]  ;;  %v479_v38 = vld [vmem:[%s4133_s21 + $0x48] sm:$0xff]  ;;  %v481_v46 = vld [vmem:[%s4133_s21 + $0x58] sm:$0xff]  ;;  %s2714_s1 = sshll.u32 %s4626_s3, 4  ;;  %s5059_s24 = scalar_lea.hbm %s5193_s7, %s3148_s26  ;;  %s5069_s1 = int_to_ptr.vmem [resolvable:$true] %s2714_s1 }
  0xe3   : > { %v522_v18 = vmul.f32 %v4163_v8, %v4163_v8  ;;  %v523_v19 = vmul.f32 %v4165_v9, %v4165_v9  ;;  %v524_v20 = vmul.f32 %v4167_v10, %v4167_v10  ;;  %v525_v21 = vmul.f32 %v4169_v11, %v4169_v11  ;;  %v3313_v33 = vld [vmem:[#allocation7 + $0x4] ss:$24 sps:$4 sm:$0xff]   ;;  %v3317_v40 = vld [vmem:[#allocation7] ss:$24 sps:$4 sm:$0xff]   ;;  %v3319_v47 = vld [vmem:[#allocation7 + $0x34] ss:$24 sps:$4 sm:$0xff]  }
  0xe4   : > { %v550_v23 = vadd.f32 %v519_v14, %v518_v13  ;;  %v553_v24 = vadd.f32 %v521_v16, %v520_v15  ;;  %v4190_v25 = vunpack.c.l.bf16 %v475_v12  ;;  %v4192_v26 = vunpack.c.h.bf16 %v475_v12  ;;  %v3315_v39 = vld [vmem:[#allocation7 + $0xc] ss:$24 sps:$4 sm:$0xff]   ;;  %v3318_v41 = vld [vmem:[#allocation7 + $0x8] ss:$24 sps:$4 sm:$0xff]   ;;  %1315 = vmatprep.subr.bf16.mxu0 %v3313_v33  ;;  %v3321_v49 = vld [vmem:[#allocation7 + $0x3c] ss:$24 sps:$4 sm:$0xff]  }
  0xe5   : > { %v556_v28 = vadd.f32 %v523_v19, %v522_v18  ;;  %v559_v29 = vadd.f32 %v525_v21, %v524_v20  ;;  %v4195_v30 = vunpack.c.l.bf16 %v474_v17  ;;  %v4197_v31 = vunpack.c.h.bf16 %v474_v17  ;;  %v480_v48 = vld [vmem:[%s4133_s21 + $0x50] sm:$0xff]  ;;  %1428 = vmatprep.subr.bf16.mxu1 %v3315_v39  ;;  %1316 = vmatpush1.bf16.msra.mxu0 %v3317_v40  ;;  %v3325_v58 = vld [vmem:[#allocation7 + $0x64] ss:$24 sps:$4 sm:$0xff]   ;;  %v3329_v0 = vld [vmem:[#allocation7 + $0x60] ss:$24 sps:$4 sm:$0xff]   ;;  %s2676_s14 = sshll.u32 %s4752_s18, 4  ;;  %s5077_s14 = int_to_ptr.vmem [resolvable:$true] %s2676_s14 }
  0xe6   : > { %551 = vadd.xlane.f32.xlu0 %v550_v23  ;;  %v528_v34 = vmul.f32 %v4190_v25, %v4190_v25  ;;  %v529_v35 = vmul.f32 %v4192_v26, %v4192_v26  ;;  %v4204_v36 = vunpack.c.l.bf16 %v477_v22  ;;  %v4206_v37 = vunpack.c.h.bf16 %v477_v22  ;;  %1429 = vmatpush1.bf16.msra.mxu1 %v3318_v41  ;;  %v3323_v52 = vld [vmem:[#allocation7 + $0x30] ss:$24 sps:$4 sm:$0xff]   ;;  %v3327_v63 = vld [vmem:[#allocation7 + $0x6c] ss:$24 sps:$4 sm:$0xff]   ;;  %v3333_v19 = vld [vmem:[#allocation7 + $0x9c] ss:$24 sps:$4 sm:$0xff]  }
  0xe7   : > { %557 = vadd.xlane.f32.xlu1 %v556_v28  ;;  %v526_v42 = vmul.f32 %v4195_v30, %v4195_v30  ;;  %v527_v43 = vmul.f32 %v4197_v31, %v4197_v31  ;;  %v4213_v44 = vunpack.c.l.bf16 %v476_v27  ;;  %v4215_v45 = vunpack.c.h.bf16 %v476_v27  ;;  %1317 = vmatprep.subr.bf16.mxu0 %v3319_v47  ;;  %v3324_v53 = vld [vmem:[#allocation7 + $0x38] ss:$24 sps:$4 sm:$0xff]   ;;  %v3330_v2 = vld [vmem:[#allocation7 + $0x68] ss:$24 sps:$4 sm:$0xff]   ;;  %v3331_v14 = vld [vmem:[#allocation7 + $0x94] ss:$24 sps:$4 sm:$0xff]  }
  0xe8   : > { %v565_v50 = vadd.f32 %v529_v35, %v528_v34  ;;  %v4223_v56 = vunpack.c.l.bf16 %v478_v32  ;;  %v4225_v57 = vunpack.c.h.bf16 %v478_v32  ;;  %1430 = vmatprep.subr.bf16.mxu1 %v3321_v49  ;;  %v532_v59 = vmul.f32 %v4204_v36, %v4204_v36  ;;  %v483_v18 = vld [vmem:[%s4133_s21 + $0x68] sm:$0xff]  ;;  %v482_v23 = vld [vmem:[%s4133_s21 + $0x60] sm:$0xff]  ;;  %v3336_v33 = vld [vmem:[#allocation7 + $0x98] ss:$24 sps:$4 sm:$0xff]   ;;  %s5354_s23 = sld [smem:[#allocation64_spill]]  ;;  %s5355_s0 = sand.u32 1, %s3907_s11  }
  0xe9   : > { %v562_v51 = vadd.f32 %v527_v43, %v526_v42  ;;  %v530_v54 = vmul.f32 %v4213_v44, %v4213_v44  ;;  %v531_v55 = vmul.f32 %v4215_v45, %v4215_v45  ;;  %v533_v60 = vmul.f32 %v4206_v37, %v4206_v37  ;;  %1318 = vmatpush1.bf16.msra.mxu0 %v3323_v52  ;;  %v3335_v27 = vld [vmem:[#allocation7 + $0x90] ss:$24 sps:$4 sm:$0xff]   ;;  %v3337_v34 = vld [vmem:[#allocation7 + $0xc4] ss:$24 sps:$4 sm:$0xff]   ;;  %v3343_v52 = vld [vmem:[#allocation7 + $0xf4] ss:$24 sps:$4 sm:$0xff]  }
  0xea   : > { %554 = vadd.xlane.f32.xlu0 %v553_v24  ;;  %v4231_v61 = vunpack.c.l.bf16 %v479_v38  ;;  %v4233_v62 = vunpack.c.h.bf16 %v479_v38  ;;  %v4235_v1 = vunpack.c.l.bf16 %v481_v46  ;;  %v4237_v7 = vunpack.c.h.bf16 %v481_v46  ;;  %1431 = vmatpush1.bf16.msra.mxu1 %v3324_v53  ;;  %v485_v40 = vld [vmem:[%s4133_s21 + $0x78] sm:$0xff]  ;;  %v3339_v41 = vld [vmem:[#allocation7 + $0xcc] ss:$24 sps:$4 sm:$0xff]   ;;  %v3342_v49 = vld [vmem:[#allocation7 + $0xc8] ss:$24 sps:$4 sm:$0xff]   ;;  %s5081_s2 = scalar_lea.sflag [#allocation15], %s5355_s0 }
  0xeb   : > { %560 = vadd.xlane.f32.xlu1 %v559_v29  ;;  %v4239_v12 = vunpack.c.l.bf16 %v480_v48  ;;  %v4241_v13 = vunpack.c.h.bf16 %v480_v48  ;;  %1319 = vmatprep.subr.bf16.mxu0 %v3325_v58  ;;  %v568_v15 = vadd.f32 %v531_v55, %v530_v54  ;;  %v534_v16 = vmul.f32 %v4223_v56, %v4223_v56  ;;  %v484_v47 = vld [vmem:[%s4133_s21 + $0x70] sm:$0xff]  ;;  %v3341_v48 = vld [vmem:[#allocation7 + $0xc0] ss:$24 sps:$4 sm:$0xff]   ;;  %s5353_s21 = sld [smem:[#allocation65_spill]]  ;;  %s3659_s6 = scalar_lea.vmem %s5062_s8, 2048 }
  0xec   : > { %v535_v17 = vmul.f32 %v4225_v57, %v4225_v57  ;;  %1432 = vmatprep.subr.bf16.mxu1 %v3327_v63  ;;  %v571_v20 = vadd.f32 %v533_v60, %v532_v59  ;;  %v536_v21 = vmul.f32 %v4231_v61, %v4231_v61  ;;  %v537_v22 = vmul.f32 %v4233_v62, %v4233_v62  ;;  %v3345_v59 = vld [vmem:[#allocation7 + $0xfc] ss:$24 sps:$4 sm:$0xff]   ;;  %p3660_p6 = scmp.ne.s32.totalorder %s5062_s8, %s3659_s6  ;;  %p5356_p0 = scmp.ne.s32.totalorder %s5261_s20, 0 }
  0xed   : > { %v540_v24 = vmul.f32 %v4235_v1, %v4235_v1  ;;  %1320 = vmatpush1.bf16.msra.mxu0 %v3329_v0  ;;  %v541_v28 = vmul.f32 %v4237_v7, %v4237_v7  ;;  %v538_v29 = vmul.f32 %v4239_v12, %v4239_v12  ;;  %v539_v32 = vmul.f32 %v4241_v13, %v4241_v13  ;;  %s3826_s19 = smov [#allocation14]  }
  0xee   : > { %563 = vadd.xlane.f32.xlu0 %v562_v51  ;;  %1433 = vmatpush1.bf16.msra.mxu1 %v3330_v2  ;;  %v574_v35 = vadd.f32 %v535_v17, %v534_v16  ;;  %v4261_v38 = vunpack.c.l.bf16 %v482_v23  ;;  %v4263_v39 = vunpack.c.h.bf16 %v482_v23  ;;  %v577_v42 = vadd.f32 %v537_v22, %v536_v21  ;;  %v3349_v16 = vld [vmem:[#allocation7 + $0x124] ss:$24 sps:$4 sm:$0xff]   ;;  %s5075_s15 = scalar_lea.hbm %s5354_s23, %s3148_s26  ;;  %p3661_p8 = pnand %p3660_p6, %p5356_p0 }
  0xef   : > { %566 = vadd.xlane.f32.xlu1 %v565_v50  ;;  %1321 = vmatprep.subr.bf16.mxu0 %v3331_v14  ;;  %v4266_v43 = vunpack.c.l.bf16 %v483_v18  ;;  %v4268_v46 = vunpack.c.h.bf16 %v483_v18  ;;  %v583_v50 = vadd.f32 %v541_v28, %v540_v24  ;;  %v580_v51 = vadd.f32 %v539_v32, %v538_v29  ;;  %v3347_v14 = vld [vmem:[#allocation7 + $0xf0] ss:$24 sps:$4 sm:$0xff]   ;;  %v3353_v24 = vld [vmem:[#allocation7 + $0x120] ss:$24 sps:$4 sm:$0xff]   ;;  %v3355_v28 = vld [vmem:[#allocation7 + $0x154] ss:$24 sps:$4 sm:$0xff]  }
  0xf0   : > { %1434 = vmatprep.subr.bf16.mxu1 %v3333_v19  ;;  %v542_v53 = vmul.f32 %v4261_v38, %v4261_v38  ;;  %v543_v54 = vmul.f32 %v4263_v39, %v4263_v39  ;;  %v4275_v55 = vunpack.c.l.bf16 %v484_v47  ;;  %v4277_v58 = vunpack.c.h.bf16 %v484_v47  ;;  %v3357_v32 = vld [vmem:[#allocation7 + $0x15c] ss:$24 sps:$4 sm:$0xff]   ;;  %v3366_v47 = vld [vmem:[#allocation7 + $0x188] ss:$24 sps:$4 sm:$0xff]   ;;  %p3662_p9 = pneg %p3661_p8  ;;  %s3663_s4 = sshll.u32 %s3826_s19, 4  ;;  %s3664_s4 = int_to_ptr.vmem [resolvable:$false] %s3663_s4 }
  0xf1   : > { %1322 = vmatpush1.bf16.msra.mxu0 %v3335_v27  ;;  %v544_v60 = vmul.f32 %v4266_v43, %v4266_v43  ;;  %v545_v63 = vmul.f32 %v4268_v46, %v4268_v46  ;;  %v4283_v0 = vunpack.c.l.bf16 %v485_v40  ;;  %v4285_v2 = vunpack.c.h.bf16 %v485_v40  ;;  %v3354_v27 = vld [vmem:[#allocation7 + $0x128] ss:$24 sps:$4 sm:$0xff]   ;;  %v3361_v40 = vld [vmem:[#allocation7 + $0x184] ss:$24 sps:$4 sm:$0xff]   ;;  %p3666_p1 = scmp.lt.s32.totalorder %s5062_s8, %s3664_s4 }
  0xf2   : > { %569 = vadd.xlane.f32.xlu0 %v568_v15  ;;  %1435 = vmatpush1.bf16.msra.mxu1 %v3336_v33  ;;  %v3348_v15 = vld [vmem:[#allocation7 + $0xf8] ss:$24 sps:$4 sm:$0xff]   ;;  %v586_v17 = vadd.f32 %v543_v54, %v542_v53  ;;  %v546_v18 = vmul.f32 %v4275_v55, %v4275_v55  ;;  %v547_v19 = vmul.f32 %v4277_v58, %v4277_v58  ;;  %v3375_v53 = vld [vmem:[#allocation7 + $0x1ec] ss:$24 sps:$4 sm:$0xff]  }
  0xf3   : > { %572 = vadd.xlane.f32.xlu1 %v571_v20  ;;  %1323 = vmatprep.subr.bf16.mxu0 %v3337_v34  ;;  %v3351_v20 = vld [vmem:[#allocation7 + $0x12c] ss:$24 sps:$4 sm:$0xff]   ;;  %v589_v21 = vadd.f32 %v545_v63, %v544_v60  ;;  %v548_v22 = vmul.f32 %v4283_v0, %v4283_v0  ;;  %v549_v23 = vmul.f32 %v4285_v2, %v4285_v2  ;;  %v3359_v34 = vld [vmem:[#allocation7 + $0x150] ss:$24 sps:$4 sm:$0xff]   ;;  %v3377_v54 = vld [vmem:[#allocation7 + $0x1e0] ss:$24 sps:$4 sm:$0xff]  }
  0xf4   : > { %1436 = vmatprep.subr.bf16.mxu1 %v3339_v41  ;;  %v592_v29 = vadd.f32 %v547_v19, %v546_v18  ;;  %v3363_v41 = vld [vmem:[#allocation7 + $0x18c] ss:$24 sps:$4 sm:$0xff]   ;;  %v3381_v63 = vld [vmem:[#allocation7 + $0x21c] ss:$24 sps:$4 sm:$0xff]   ;;  %v3389_v18 = vld [vmem:[#allocation7 + $0x240] ss:$24 sps:$4 sm:$0xff]  }
  0xf5   : > { %1324 = vmatpush1.bf16.msra.mxu0 %v3341_v48  ;;  %v595_v33 = vadd.f32 %v549_v23, %v548_v22  ;;  %v3367_v48 = vld [vmem:[#allocation7 + $0x1b4] ss:$24 sps:$4 sm:$0xff]   ;;  %v3390_v19 = vld [vmem:[#allocation7 + $0x248] ss:$24 sps:$4 sm:$0xff]   ;;  %v3396_v23 = vld [vmem:[#allocation7 + $0x278] ss:$24 sps:$4 sm:$0xff]  }
  0xf6   : > { %575 = vadd.xlane.f32.xlu0 %v574_v35  ;;  %1437 = vmatpush1.bf16.msra.mxu1 %v3342_v49  ;;  %v3360_v35 = vld [vmem:[#allocation7 + $0x158] ss:$24 sps:$4 sm:$0xff]   ;;  %v3369_v49 = vld [vmem:[#allocation7 + $0x1bc] ss:$24 sps:$4 sm:$0xff]  }
  0xf7   : > { %578 = vadd.xlane.f32.xlu1 %v577_v42  ;;  %1325 = vmatprep.subr.bf16.mxu0 %v3343_v52  ;;  %v3365_v42 = vld [vmem:[#allocation7 + $0x180] ss:$24 sps:$4 sm:$0xff]   ;;  %v3373_v52 = vld [vmem:[#allocation7 + $0x1e4] ss:$24 sps:$4 sm:$0xff]   ;;  %v3379_v60 = vld [vmem:[#allocation7 + $0x214] ss:$24 sps:$4 sm:$0xff]  }
  0xf8   : > { %1438 = vmatprep.subr.bf16.mxu1 %v3345_v59  ;;  %v3378_v59 = vld [vmem:[#allocation7 + $0x1e8] ss:$24 sps:$4 sm:$0xff]  }
  0xf9   : > { %1326 = vmatpush1.bf16.msra.mxu0 %v3347_v14  ;;  %v3383_v14 = vld [vmem:[#allocation7 + $0x210] ss:$24 sps:$4 sm:$0xff]  }
  0xfa   : > { %581 = vadd.xlane.f32.xlu0 %v580_v51  ;;  %1439 = vmatpush1.bf16.msra.mxu1 %v3348_v15  ;;  %v3372_v51 = vld [vmem:[#allocation7 + $0x1b8] ss:$24 sps:$4 sm:$0xff]  }
  0xfb   : > { %584 = vadd.xlane.f32.xlu1 %v583_v50  ;;  %1327 = vmatprep.subr.bf16.mxu0 %v3349_v16  ;;  %v3371_v50 = vld [vmem:[#allocation7 + $0x1b0] ss:$24 sps:$4 sm:$0xff]   ;;  %v3385_v16 = vld [vmem:[#allocation7 + $0x244] ss:$24 sps:$4 sm:$0xff]  }
  0xfc   : > { %1440 = vmatprep.subr.bf16.mxu1 %v3351_v20  ;;  %v3384_v15 = vld [vmem:[#allocation7 + $0x218] ss:$24 sps:$4 sm:$0xff]   ;;  %v3391_v20 = vld [vmem:[#allocation7 + $0x274] ss:$24 sps:$4 sm:$0xff]  }
  0xfd   : > { %1328 = vmatpush1.bf16.msra.mxu0 %v3353_v24  ;;  %v3395_v22 = vld [vmem:[#allocation7 + $0x270] ss:$24 sps:$4 sm:$0xff]   ;;  %v3397_v24 = vld [vmem:[#allocation7 + $0x2a4] ss:$24 sps:$4 sm:$0xff]  }
  0xfe   : > { %587 = vadd.xlane.f32.xlu0 %v586_v17  ;;  %1441 = vmatpush1.bf16.msra.mxu1 %v3354_v27  ;;  %v3387_v17 = vld [vmem:[#allocation7 + $0x24c] ss:$24 sps:$4 sm:$0xff]  }
  0xff   : > { %590 = vadd.xlane.f32.xlu1 %v589_v21  ;;  %1329 = vmatprep.subr.bf16.mxu0 %v3355_v28  ;;  %v3393_v21 = vld [vmem:[#allocation7 + $0x27c] ss:$24 sps:$4 sm:$0xff]   ;;  %v3399_v27 = vld [vmem:[#allocation7 + $0x2ac] ss:$24 sps:$4 sm:$0xff]   ;;  %v3401_v28 = vld [vmem:[#allocation7 + $0x2a0] ss:$24 sps:$4 sm:$0xff]  }
 0x100   : > { %1442 = vmatprep.subr.bf16.mxu1 %v3357_v32  ;;  %v3403_v32 = vld [vmem:[#allocation7 + $0x2d4] ss:$24 sps:$4 sm:$0xff]  }
 0x101   : > { %1330 = vmatpush1.bf16.msra.mxu0 %v3359_v34  ;;  %v3407_v34 = vld [vmem:[#allocation7 + $0x2d0] ss:$24 sps:$4 sm:$0xff]  }
 0x102   : > { %593 = vadd.xlane.f32.xlu0 %v592_v29  ;;  %1443 = vmatpush1.bf16.msra.mxu1 %v3360_v35  ;;  %v3402_v29 = vld [vmem:[#allocation7 + $0x2a8] ss:$24 sps:$4 sm:$0xff]   ;;  %v3408_v35 = vld [vmem:[#allocation7 + $0x2d8] ss:$24 sps:$4 sm:$0xff]  }
 0x103   : > { %596 = vadd.xlane.f32.xlu1 %v595_v33  ;;  %1331 = vmatprep.subr.bf16.mxu0 %v3361_v40  ;;  %v3405_v33 = vld [vmem:[#allocation7 + $0x2dc] ss:$24 sps:$4 sm:$0xff]  }
 0x104   : > { %1444 = vmatprep.subr.bf16.mxu1 %v3363_v41  ;;  %v3411_v40 = vld [vmem:[#allocation7 + $0x14] ss:$24 sps:$4 sm:$0xff]  }
 0x105   : > { %1332 = vmatpush1.bf16.msra.mxu0 %v3365_v42 }
 0x106   : > { %1445 = vmatpush1.bf16.msra.mxu1 %v3366_v47  ;;  %1333 = vmatprep.subr.bf16.mxu0 %v3367_v48 }
 0x107   : > { %1446 = vmatprep.subr.bf16.mxu1 %v3369_v49 }
 0x109   : > { %1334 = vmatpush1.bf16.msra.mxu0 %v3371_v50 }
 0x10a   : > { %1447 = vmatpush1.bf16.msra.mxu1 %v3372_v51  ;;  %1335 = vmatprep.subr.bf16.mxu0 %v3373_v52 }
 0x10b   : > { %1448 = vmatprep.subr.bf16.mxu1 %v3375_v53 }
 0x10d   : > { %1336 = vmatpush1.bf16.msra.mxu0 %v3377_v54  ;;  %v5205_v54 = vlaneseq }
 0x10e   : > { %1449 = vmatpush1.bf16.msra.mxu1 %v3378_v59  ;;  %1337 = vmatprep.subr.bf16.mxu0 %v3379_v60 }
 0x10f   : > { %1450 = vmatprep.subr.bf16.mxu1 %v3381_v63 }
 0x111   : > { %1338 = vmatpush1.bf16.msra.mxu0 %v3383_v14 }
 0x112   : > { %1451 = vmatpush1.bf16.msra.mxu1 %v3384_v15  ;;  %1339 = vmatprep.subr.bf16.mxu0 %v3385_v16 }
 0x113   : > { %1452 = vmatprep.subr.bf16.mxu1 %v3387_v17  ;;  %v682_v17 = vshrl.u32 %v5205_v54, 7 }
 0x115   : > { %1340 = vmatpush1.bf16.msra.mxu0 %v3389_v18 }
 0x116   : > { %1453 = vmatpush1.bf16.msra.mxu1 %v3390_v19  ;;  %1341 = vmatprep.subr.bf16.mxu0 %v3391_v20 }
 0x117   : > { %1454 = vmatprep.subr.bf16.mxu1 %v3393_v21 }
 0x119   : > { %1342 = vmatpush1.bf16.msra.mxu0 %v3395_v22  ;;  %v687_v22 = vsub.s32 1, %v682_v17 }
 0x11a   : > { %1455 = vmatpush1.bf16.msra.mxu1 %v3396_v23  ;;  %1343 = vmatprep.subr.bf16.mxu0 %v3397_v24 }
 0x11b   : > { %1456 = vmatprep.subr.bf16.mxu1 %v3399_v27  ;;  %v679_v27 = vld [vmem:[#allocation5] sm:$0x3] }
 0x11d   : > { %1344 = vmatpush1.bf16.msra.mxu0 %v3401_v28  ;;  %v683_v28 = vsub.s32 0, %v682_v17 }
 0x11e   : > { %1457 = vmatpush1.bf16.msra.mxu1 %v3402_v29  ;;  %1345 = vmatprep.subr.bf16.mxu0 %v3403_v32 }
 0x11f   : > { %1458 = vmatprep.subr.bf16.mxu1 %v3405_v33 }
 0x121   : > { %1346 = vmatpush1.bf16.msra.mxu0 %v3407_v34 }
 0x122   : > { %1459 = vmatpush1.bf16.msra.mxu1 %v3408_v35  ;;  %1541 = vmatprep.subr.bf16.mxu0 %v3411_v40 }
 0x123   : > { %3151 = vmatprep.subr.bf16.mxu1 %v3411_v40  ;;  %v4297_v40 = vrot.slane %v679_v27, %v687_v22 }
 0x173   : > { %v552_v41 = vpop.xlane.xlu0 %551 }
 0x174   : > { %v599_v42 = vmul.f32 0.00390625, %v552_v41  ;;  %v558_v47 = vpop.xlane.xlu1 %557 }
 0x175   : > { %v601_v48 = vmul.f32 0.00390625, %v558_v47 }
 0x176   : > { %v615_v49 = vadd.f32 1e-05, %v599_v42 }
 0x177   : > { %v555_v50 = vpop.xlane.xlu0 %554  ;;  %v617_v51 = vadd.f32 1e-05, %v601_v48  ;;  %v4300_v48 = vrot.slane %v679_v27, %v683_v28 }
 0x178   : > { %3457 = vrsqrt.f32 %v615_v49  ;;  %v600_v52 = vmul.f32 0.00390625, %v555_v50  ;;  %v561_v53 = vpop.xlane.xlu1 %560 }
 0x179   : > { %3459 = vrsqrt.f32 %v617_v51  ;;  %v602_v59 = vmul.f32 0.00390625, %v561_v53 }
 0x17a   : > { %v616_v60 = vadd.f32 1e-05, %v600_v52 }
 0x17b   : > { %v618_v63 = vadd.f32 1e-05, %v602_v59  ;;  %v564_v14 = vpop.xlane.xlu0 %563 }
 0x17c   : > { %3461 = vrsqrt.f32 %v616_v60  ;;  %v567_v15 = vpop.xlane.xlu1 %566  ;;  %v603_v16 = vmul.f32 0.00390625, %v564_v14 }
 0x17d   : > { %3463 = vrsqrt.f32 %v618_v63  ;;  %v604_v18 = vmul.f32 0.00390625, %v567_v15 }
 0x17e   : > { %v619_v19 = vadd.f32 1e-05, %v603_v16 }
 0x17f   : > { %v620_v20 = vadd.f32 1e-05, %v604_v18  ;;  %v570_v21 = vpop.xlane.xlu0 %569 }
 0x180   : > { %3465 = vrsqrt.f32 %v619_v19  ;;  %v573_v23 = vpop.xlane.xlu1 %572  ;;  %v605_v24 = vmul.f32 0.00390625, %v570_v21  ;;  %v3409_v21 = vld [vmem:[#allocation7 + $0x10] ss:$24 sps:$4 sm:$0xff]  }
 0x181   : > { %3467 = vrsqrt.f32 %v620_v20  ;;  %v606_v29 = vmul.f32 0.00390625, %v573_v23  ;;  %v3414_v23 = vld [vmem:[#allocation7 + $0x44] ss:$24 sps:$4 sm:$0xff]  }
 0x182   : > { %v3458_v32 = vpop.eup %3457  ;;  %v621_v34 = vadd.f32 1e-05, %v605_v24 }
 0x183   : > { %v3460_v33 = vpop.eup %3459  ;;  %v648_v35 = vmul.f32 %v3458_v32, %v4156_v4  ;;  %v622_v41 = vadd.f32 1e-05, %v606_v29  ;;  %v576_v42 = vpop.xlane.xlu0 %575  ;;  %v647_v47 = vmul.f32 %v3458_v32, %v4154_v3 }
 0x184   : > { %v652_v49 = vmul.f32 %v3460_v33, %v4165_v9  ;;  %v579_v50 = vpop.xlane.xlu1 %578  ;;  %3469 = vrsqrt.f32 %v621_v34  ;;  %v607_v60 = vmul.f32 0.00390625, %v576_v42  ;;  %v3412_v34 = vld [vmem:[#allocation7 + $0x40] ss:$24 sps:$4 sm:$0xff]  }
 0x185   : > { %v692_v4 = vmul.f32 %v4297_v40, %v648_v35  ;;  %3471 = vrsqrt.f32 %v622_v41  ;;  %v608_v14 = vmul.f32 0.00390625, %v579_v50  ;;  %v691_v15 = vmul.f32 %v4300_v48, %v647_v47  ;;  %v3417_v41 = vld [vmem:[#allocation7 + $0x74] ss:$24 sps:$4 sm:$0xff]  }
 0x186   : > { %v3462_v51 = vpop.eup %3461  ;;  %v696_v16 = vmul.f32 %v4297_v40, %v652_v49  ;;  %v623_v22 = vadd.f32 1e-05, %v607_v60  ;;  %v3420_v60 = vld [vmem:[#allocation7 + $0xa4] ss:$24 sps:$4 sm:$0xff]  }
 0x187   : > { %v3464_v52 = vpop.eup %3463  ;;  %v650_v53 = vmul.f32 %v3462_v51, %v4160_v6  ;;  %v649_v59 = vmul.f32 %v3462_v51, %v4158_v5  ;;  %v651_v5 = vmul.f32 %v3460_v33, %v4163_v8  ;;  %v624_v24 = vadd.f32 1e-05, %v608_v14  ;;  %v582_v27 = vpop.xlane.xlu0 %581 }
 0x188   : > { %v654_v63 = vmul.f32 %v3464_v52, %v4169_v11  ;;  %v653_v18 = vmul.f32 %v3464_v52, %v4167_v10  ;;  %v585_v29 = vpop.xlane.xlu1 %584  ;;  %3473 = vrsqrt.f32 %v623_v22  ;;  %v609_v35 = vmul.f32 0.00390625, %v582_v27 }
 0x189   : > { %v694_v3 = vmul.f32 %v4297_v40, %v650_v53  ;;  %v693_v9 = vmul.f32 %v4300_v48, %v649_v59  ;;  %v695_v32 = vmul.f32 %v4300_v48, %v651_v5  ;;  %3475 = vrsqrt.f32 %v624_v24  ;;  %v3415_v53 = vld [vmem:[#allocation7 + $0x70] ss:$24 sps:$4 sm:$0xff]  }
 0x18a   : > { %v3466_v17 = vpop.eup %3465  ;;  %v698_v6 = vmul.f32 %v4297_v40, %v654_v63  ;;  %v697_v33 = vmul.f32 %v4300_v48, %v653_v18  ;;  %v625_v59 = vadd.f32 1e-05, %v609_v35  ;;  %v3421_v24 = vld [vmem:[#allocation7 + $0xd0] ss:$24 sps:$4 sm:$0xff]  }
 0x18b   : > { %v3468_v19 = vpop.eup %3467  ;;  %v4314_v20 = vpack.c.bf16 %v694_v3, %v692_v4  ;;  %v4316_v11 = vpack.c.bf16 %v693_v9, %v691_v15  ;;  %v656_v8 = vmul.f32 %v3466_v17, %v4197_v31  ;;  %v610_v31 = vmul.f32 0.00390625, %v585_v29  ;;  %v588_v9 = vpop.xlane.xlu0 %587 }
 0x18c   : > { %v4320_v28 = vpack.c.bf16 %v698_v6, %v696_v16  ;;  %v658_v10 = vmul.f32 %v3468_v19, %v4192_v26  ;;  %v4332_v50 = vpack.c.bf16 %v697_v33, %v695_v32  ;;  %v655_v51 = vmul.f32 %v3466_v17, %v4195_v30  ;;  %v591_v63 = vpop.xlane.xlu1 %590  ;;  %v3418_v16 = vld [vmem:[#allocation7 + $0xa0] ss:$24 sps:$4 sm:$0xff]   ;;  %v3423_v6 = vld [vmem:[#allocation7 + $0xd4] ss:$24 sps:$4 sm:$0xff]  }
 0x18d   : > { %1347 = vmatprep.mubr.bf16.mxu0 %v4314_v20  ;;  %1460 = vmatprep.mubr.bf16.mxu1 %v4314_v20  ;;  %v700_v42 = vmul.f32 %v4297_v40, %v656_v8  ;;  %v657_v52 = vmul.f32 %v3468_v19, %v4190_v25  ;;  %v626_v4 = vadd.f32 1e-05, %v610_v31  ;;  %3477 = vrsqrt.f32 %v625_v59  ;;  %v3426_v8 = vld [vmem:[#allocation7 + $0x104] ss:$24 sps:$4 sm:$0xff]   ;;  %v3427_v59 = vld [vmem:[#allocation7 + $0x130] ss:$24 sps:$4 sm:$0xff]  }
 0x18e   : > { %1348 = vmatmul.mubr.bf16.vlgmr.msra.gmra.mrb[0].mxu0 %v4316_v11  ;;  %1461 = vmatmul.mubr.bf16.vlgmr.msra.gmra.mrb[0].mxu1 %v4316_v11  ;;  %v3470_v26 = vpop.eup %3469  ;;  %v702_v47 = vmul.f32 %v4297_v40, %v658_v10  ;;  %v699_v25 = vmul.f32 %v4300_v48, %v655_v51  ;;  %v612_v17 = vmul.f32 0.00390625, %v591_v63 }
 0x18f   : > { %1542 = vmatpush1.bf16.msra.mxu0 %v3409_v21  ;;  %3167 = vmatpush1.bf16.msra.mxu1 %v3409_v21  ;;  %v3472_v49 = vpop.eup %3471  ;;  %v660_v3 = vmul.f32 %v3470_v26, %v4215_v45  ;;  %v701_v30 = vmul.f32 %v4300_v48, %v657_v52  ;;  %3479 = vrsqrt.f32 %v626_v4  ;;  %v611_v45 = vmul.f32 0.00390625, %v588_v9  ;;  %v594_v35 = vpop.xlane.xlu0 %593  ;;  %v3432_v4 = vld [vmem:[#allocation7 + $0x164] ss:$24 sps:$4 sm:$0xff]  }
 0x190   : > { %1543 = vmatprep.subr.bf16.mxu0 %v3414_v23  ;;  %3152 = vmatprep.subr.bf16.mxu1 %v3414_v23  ;;  %v4336_v14 = vpack.c.bf16 %v702_v47, %v700_v42  ;;  %v662_v15 = vmul.f32 %v3472_v49, %v4206_v37  ;;  %v659_v22 = vmul.f32 %v3470_v26, %v4213_v44  ;;  %v628_v27 = vadd.f32 1e-05, %v612_v17  ;;  %v597_v29 = vpop.xlane.xlu1 %596  ;;  %v3429_v26 = vld [vmem:[#allocation7 + $0x134] ss:$24 sps:$4 sm:$0xff]  }
 0x191   : > { %1357 = vmatprep.mubr.bf16.mxu0 %v4320_v28  ;;  %1470 = vmatprep.mubr.bf16.mxu1 %v4320_v28  ;;  %v704_v5 = vmul.f32 %v4297_v40, %v660_v3  ;;  %v4348_v21 = vpack.c.bf16 %v701_v30, %v699_v25  ;;  %v661_v23 = vmul.f32 %v3472_v49, %v4204_v36  ;;  %v627_v10 = vadd.f32 1e-05, %v611_v45  ;;  %v3430_v25 = vld [vmem:[#allocation7 + $0x160] ss:$24 sps:$4 sm:$0xff]   ;;  %v3435_v30 = vld [vmem:[#allocation7 + $0x194] ss:$24 sps:$4 sm:$0xff]  }
 0x192   : > { %v3474_v37 = vpop.eup %3473  ;;  %v706_v18 = vmul.f32 %v4297_v40, %v662_v15  ;;  %v703_v36 = vmul.f32 %v4300_v48, %v659_v22  ;;  %3481 = vrsqrt.f32 %v628_v27  ;;  %v614_v31 = vmul.f32 0.00390625, %v597_v29  ;;  %v3441_v27 = vld [vmem:[#allocation7 + $0x1f4] ss:$24 sps:$4 sm:$0xff]  }
 0x193   : > { %1544 = vmatpush1.bf16.msra.mxu0 %v3412_v34  ;;  %3168 = vmatpush1.bf16.msra.mxu1 %v3412_v34  ;;  %v3476_v19 = vpop.eup %3475  ;;  %v664_v33 = vmul.f32 %v3474_v37, %v4225_v57  ;;  %v705_v44 = vmul.f32 %v4300_v48, %v661_v23  ;;  %3483 = vrsqrt.f32 %v627_v10  ;;  %v613_v57 = vmul.f32 0.00390625, %v594_v35  ;;  %v3439_v35 = vld [vmem:[#allocation7 + $0x1f0] ss:$24 sps:$4 sm:$0xff]  }
 0x194   : > { %1545 = vmatprep.subr.bf16.mxu0 %v3417_v41  ;;  %3153 = vmatprep.subr.bf16.mxu1 %v3417_v41  ;;  %v4352_v32 = vpack.c.bf16 %v706_v18, %v704_v5  ;;  %v666_v34 = vmul.f32 %v3476_v19, %v4233_v62  ;;  %v3424_v41 = vld [vmem:[#allocation7 + $0x100] ss:$24 sps:$4 sm:$0xff]   ;;  %v663_v52 = vmul.f32 %v3474_v37, %v4223_v56  ;;  %v3433_v5 = vld [vmem:[#allocation7 + $0x190] ss:$24 sps:$4 sm:$0xff]   ;;  %v3438_v18 = vld [vmem:[#allocation7 + $0x1c4] ss:$24 sps:$4 sm:$0xff]  }
 0x195   : > { %v708_v42 = vmul.f32 %v4297_v40, %v664_v33  ;;  %v4364_v51 = vpack.c.bf16 %v705_v44, %v703_v36  ;;  %v629_v63 = vadd.f32 1e-05, %v613_v57  ;;  %v3444_v36 = vld [vmem:[#allocation7 + $0x224] ss:$24 sps:$4 sm:$0xff]   ;;  %v3447_v57 = vld [vmem:[#allocation7 + $0x254] ss:$24 sps:$4 sm:$0xff]  }
 0x196   : > { %1358 = vmatmul.mubr.bf16.gmra.mrb[4].mxu0 %v4332_v50  ;;  %1471 = vmatmul.mubr.bf16.gmra.mrb[4].mxu1 %v4332_v50  ;;  %v710_v47 = vmul.f32 %v4297_v40, %v666_v34  ;;  %v707_v56 = vmul.f32 %v4300_v48, %v663_v52  ;;  %v3450_v52 = vld [vmem:[#allocation7 + $0x284] ss:$24 sps:$4 sm:$0xff]  }
 0x197   : > { %1546 = vmatpush1.bf16.msra.mxu0 %v3415_v53  ;;  %3169 = vmatpush1.bf16.msra.mxu1 %v3415_v53  ;;  %v3478_v62 = vpop.eup %3477  ;;  %v665_v53 = vmul.f32 %v3476_v19, %v4231_v61 }
 0x198   : > { %1547 = vmatprep.subr.bf16.mxu0 %v3420_v60  ;;  %3154 = vmatprep.subr.bf16.mxu1 %v3420_v60  ;;  %v630_v60 = vadd.f32 1e-05, %v614_v31  ;;  %v4368_v3 = vpack.c.bf16 %v710_v47, %v708_v42  ;;  %v668_v15 = vmul.f32 %v3478_v62, %v4241_v13  ;;  %v667_v45 = vmul.f32 %v3478_v62, %v4239_v12 }
 0x199   : > { %1367 = vmatprep.mubr.bf16.mxu0 %v4336_v14  ;;  %1480 = vmatprep.mubr.bf16.mxu1 %v4336_v14  ;;  %v3480_v49 = vpop.eup %3479  ;;  %v709_v61 = vmul.f32 %v4300_v48, %v665_v53 }
 0x19a   : > { %v670_v9 = vmul.f32 %v3480_v49, %v4237_v7  ;;  %3485 = vrsqrt.f32 %v630_v60  ;;  %v712_v7 = vmul.f32 %v4297_v40, %v668_v15  ;;  %v669_v37 = vmul.f32 %v3480_v49, %v4235_v1  ;;  %v3445_v49 = vld [vmem:[#allocation7 + $0x250] ss:$24 sps:$4 sm:$0xff]  }
 0x19b   : > { %1548 = vmatpush1.bf16.msra.mxu0 %v3418_v16  ;;  %3170 = vmatpush1.bf16.msra.mxu1 %v3418_v16  ;;  %3487 = vrsqrt.f32 %v629_v63  ;;  %v711_v12 = vmul.f32 %v4300_v48, %v667_v45  ;;  %v3456_v63 = vld [vmem:[#allocation7 + $0x2e4] ss:$24 sps:$4 sm:$0xff]  }
 0x19c   : > { %1549 = vmatprep.subr.bf16.mxu0 %v3423_v6  ;;  %3155 = vmatprep.subr.bf16.mxu1 %v3423_v6  ;;  %v3482_v16 = vpop.eup %3481  ;;  %v714_v13 = vmul.f32 %v4297_v40, %v670_v9  ;;  %v4380_v6 = vpack.c.bf16 %v709_v61, %v707_v56  ;;  %v713_v1 = vmul.f32 %v4300_v48, %v669_v37 }
 0x19d   : > { %v3484_v17 = vpop.eup %3483  ;;  %v674_v23 = vmul.f32 %v3482_v16, %v4268_v46  ;;  %v673_v34 = vmul.f32 %v3482_v16, %v4266_v43 }
 0x19e   : > { %1368 = vmatmul.mubr.bf16.gmra.mrb[8].mxu0 %v4348_v21  ;;  %1481 = vmatmul.mubr.bf16.gmra.mrb[8].mxu1 %v4348_v21  ;;  %v4384_v19 = vpack.c.bf16 %v714_v13, %v712_v7  ;;  %v672_v22 = vmul.f32 %v3484_v17, %v4263_v39  ;;  %v4396_v29 = vpack.c.bf16 %v713_v1, %v711_v12 }
 0x19f   : > { %1550 = vmatpush1.bf16.msra.mxu0 %v3421_v24  ;;  %3171 = vmatpush1.bf16.msra.mxu1 %v3421_v24  ;;  %v3436_v24 = vld [vmem:[#allocation7 + $0x1c0] ss:$24 sps:$4 sm:$0xff]   ;;  %v718_v46 = vmul.f32 %v4297_v40, %v674_v23  ;;  %v671_v33 = vmul.f32 %v3484_v17, %v4261_v38  ;;  %v717_v43 = vmul.f32 %v4300_v48, %v673_v34 }
 0x1a0   : > { %1551 = vmatprep.subr.bf16.mxu0 %v3426_v8  ;;  %3156 = vmatprep.subr.bf16.mxu1 %v3426_v8  ;;  %v716_v39 = vmul.f32 %v4297_v40, %v672_v22 }
 0x1a1   : > { %1377 = vmatprep.mubr.bf16.mxu0 %v4352_v32  ;;  %1490 = vmatprep.mubr.bf16.mxu1 %v4352_v32  ;;  %v715_v38 = vmul.f32 %v4300_v48, %v671_v33 }
 0x1a2   : > { %v4400_v44 = vpack.c.bf16 %v718_v46, %v716_v39 }
 0x1a3   : > { %1552 = vmatpush1.bf16.msra.mxu0 %v3424_v41  ;;  %3172 = vmatpush1.bf16.msra.mxu1 %v3424_v41  ;;  %v735_v62 = vpack.c.bf16 %v717_v43, %v715_v38 }
 0x1a4   : > { %1553 = vmatprep.subr.bf16.mxu0 %v3429_v26  ;;  %3157 = vmatprep.subr.bf16.mxu1 %v3429_v26  ;;  %v3486_v8 = vpop.eup %3485  ;;  %v3442_v26 = vld [vmem:[#allocation7 + $0x220] ss:$24 sps:$4 sm:$0xff]  }
 0x1a5   : > { %v3488_v10 = vpop.eup %3487  ;;  %v678_v31 = vmul.f32 %v3486_v8, %v4285_v2  ;;  %v677_v47 = vmul.f32 %v3486_v8, %v4283_v0 }
 0x1a6   : > { %1378 = vmatmul.mubr.bf16.gmra.mrb[12].mxu0 %v4364_v51  ;;  %1491 = vmatmul.mubr.bf16.gmra.mrb[12].mxu1 %v4364_v51  ;;  %v676_v41 = vmul.f32 %v3488_v10, %v4277_v58  ;;  %v675_v42 = vmul.f32 %v3488_v10, %v4275_v55  ;;  %v3453_v55 = vld [vmem:[#allocation7 + $0x2b4] ss:$24 sps:$4 sm:$0xff]  }
 0x1a7   : > { %1554 = vmatpush1.bf16.msra.mxu0 %v3427_v59  ;;  %3173 = vmatpush1.bf16.msra.mxu1 %v3427_v59  ;;  %v722_v2 = vmul.f32 %v4297_v40, %v678_v31  ;;  %v721_v60 = vmul.f32 %v4300_v48, %v677_v47 }
 0x1a8   : > { %1555 = vmatprep.subr.bf16.mxu0 %v3432_v4  ;;  %3158 = vmatprep.subr.bf16.mxu1 %v3432_v4  ;;  %v720_v58 = vmul.f32 %v4297_v40, %v676_v41  ;;  %v719_v59 = vmul.f32 %v4300_v48, %v675_v42  ;;  %v3448_v40 = vld [vmem:[#allocation7 + $0x280] ss:$24 sps:$4 sm:$0xff]   ;;  %v3451_v4 = vld [vmem:[#allocation7 + $0x2b0] ss:$24 sps:$4 sm:$0xff]  }
 0x1a9   : > { %1387 = vmatprep.mubr.bf16.mxu0 %v4368_v3  ;;  %1500 = vmatprep.mubr.bf16.mxu1 %v4368_v3  ;;  %v3454_v48 = vld [vmem:[#allocation7 + $0x2e0] ss:$24 sps:$4 sm:$0xff]  }
 0x1aa   : > { %v738_v53 = vpack.c.bf16 %v722_v2, %v720_v58  ;;  %v737_v0 = vpack.c.bf16 %v721_v60, %v719_v59 }
 0x1ab   : > { %1556 = vmatpush1.bf16.msra.mxu0 %v3430_v25  ;;  %3174 = vmatpush1.bf16.msra.mxu1 %v3430_v25 }
 0x1ac   : > { %1557 = vmatprep.subr.bf16.mxu0 %v3435_v30  ;;  %3159 = vmatprep.subr.bf16.mxu1 %v3435_v30 }
 0x1ae   : > { %1388 = vmatmul.mubr.bf16.gmra.mrb[16].mxu0 %v4380_v6  ;;  %1501 = vmatmul.mubr.bf16.gmra.mrb[16].mxu1 %v4380_v6 }
 0x1af   : > { %1558 = vmatpush1.bf16.msra.mxu0 %v3433_v5  ;;  %3175 = vmatpush1.bf16.msra.mxu1 %v3433_v5 }
 0x1b0   : > { %1559 = vmatprep.subr.bf16.mxu0 %v3438_v18  ;;  %3160 = vmatprep.subr.bf16.mxu1 %v3438_v18 }
 0x1b1   : > { %1397 = vmatprep.mubr.bf16.mxu0 %v4384_v19  ;;  %1510 = vmatprep.mubr.bf16.mxu1 %v4384_v19 }
 0x1b3   : > { %1560 = vmatpush1.bf16.msra.mxu0 %v3436_v24  ;;  %3176 = vmatpush1.bf16.msra.mxu1 %v3436_v24 }
 0x1b4   : > { %1561 = vmatprep.subr.bf16.mxu0 %v3441_v27  ;;  %3161 = vmatprep.subr.bf16.mxu1 %v3441_v27 }
 0x1b6   : > { %1398 = vmatmul.mubr.bf16.gmra.mrb[20].mxu0 %v4396_v29  ;;  %1511 = vmatmul.mubr.bf16.gmra.mrb[20].mxu1 %v4396_v29 }
 0x1b7   : > { %1562 = vmatpush1.bf16.msra.mxu0 %v3439_v35  ;;  %3177 = vmatpush1.bf16.msra.mxu1 %v3439_v35 }
 0x1b8   : > { %1563 = vmatprep.subr.bf16.mxu0 %v3444_v36  ;;  %3162 = vmatprep.subr.bf16.mxu1 %v3444_v36 }
 0x1b9   : > { %1407 = vmatprep.mubr.bf16.mxu0 %v4400_v44  ;;  %1520 = vmatprep.mubr.bf16.mxu1 %v4400_v44 }
 0x1bb   : > { %1564 = vmatpush1.bf16.msra.mxu0 %v3442_v26  ;;  %3178 = vmatpush1.bf16.msra.mxu1 %v3442_v26 }
 0x1bc   : > { %1565 = vmatprep.subr.bf16.mxu0 %v3447_v57  ;;  %3163 = vmatprep.subr.bf16.mxu1 %v3447_v57 }
 0x1be   : > { %1408 = vmatmul.mubr.bf16.gmra.mrb[24].mxu0 %v735_v62  ;;  %1521 = vmatmul.mubr.bf16.gmra.mrb[24].mxu1 %v735_v62 }
 0x1bf   : > { %1566 = vmatpush1.bf16.msra.mxu0 %v3445_v49  ;;  %3179 = vmatpush1.bf16.msra.mxu1 %v3445_v49 }
 0x1c0   : > { %1567 = vmatprep.subr.bf16.mxu0 %v3450_v52  ;;  %3164 = vmatprep.subr.bf16.mxu1 %v3450_v52 }
 0x1c1   : > { %1417 = vmatprep.mubr.bf16.mxu0 %v738_v53  ;;  %1530 = vmatprep.mubr.bf16.mxu1 %v738_v53 }
 0x1c3   : > { %1568 = vmatpush1.bf16.msra.mxu0 %v3448_v40  ;;  %3180 = vmatpush1.bf16.msra.mxu1 %v3448_v40 }
 0x1c4   : > { %1569 = vmatprep.subr.bf16.mxu0 %v3453_v55  ;;  %3165 = vmatprep.subr.bf16.mxu1 %v3453_v55 }
 0x1c6   : > { %1418 = vmatmul.mubr.bf16.gmra.mrb[28].mxu0 %v737_v0  ;;  %1531 = vmatmul.mubr.bf16.gmra.mrb[28].mxu1 %v737_v0 }
 0x1c7   : > { %1570 = vmatpush1.bf16.msra.mxu0 %v3451_v4  ;;  %3181 = vmatpush1.bf16.msra.mxu1 %v3451_v4 }
 0x1c8   : > { %1573 = vmatprep.mubr.bf16.mxu0 %v4314_v20  ;;  %1571 = vmatprep.subr.bf16.mxu0 %v3456_v63 }
 0x1c9   : > { %3166 = vmatprep.subr.bf16.mxu1 %v3456_v63  ;;  %1613 = vmatprep.mubr.bf16.mxu1 %v4368_v3 }
 0x1cb   : > { %1572 = vmatpush1.bf16.msra.mxu0 %v3454_v48  ;;  %3182 = vmatpush1.bf16.msra.mxu1 %v3454_v48 }
 0x1ce   : > { %1574 = vmatmul.mubr.bf16.vlgmr.msra.gmra.mrb[32].mxu0 %v4316_v11  ;;  %1614 = vmatmul.mubr.bf16.vlgmr.msra.gmra.mrb[32].mxu1 %v4380_v6 }
 0x1cf   : > { %1583 = vmatprep.mubr.bf16.mxu0 %v4320_v28  ;;  %1623 = vmatprep.mubr.bf16.mxu1 %v4384_v19 }
 0x1d6   : > { %1584 = vmatmul.mubr.bf16.gmra.mrb[36].mxu0 %v4332_v50  ;;  %1624 = vmatmul.mubr.bf16.gmra.mrb[36].mxu1 %v4396_v29 }
 0x1d7   : > { %1593 = vmatprep.mubr.bf16.mxu0 %v4336_v14  ;;  %1633 = vmatprep.mubr.bf16.mxu1 %v4400_v44 }
 0x1de   : > { %1594 = vmatmul.mubr.bf16.gmra.mrb[40].mxu0 %v4348_v21  ;;  %1634 = vmatmul.mubr.bf16.gmra.mrb[40].mxu1 %v735_v62 }
 0x1df   : > { %1603 = vmatprep.mubr.bf16.mxu0 %v4352_v32  ;;  %1643 = vmatprep.mubr.bf16.mxu1 %v738_v53 }
 0x1e6   : > { %1604 = vmatmul.mubr.bf16.gmra.mrb[44].mxu0 %v4364_v51  ;;  %1644 = vmatmul.mubr.bf16.gmra.mrb[44].mxu1 %v737_v0 }
 0x261   : > { %v4429_v20 = vpop.f32.mrb[0].mxu0  ;;  %v4431_v11 = vpop.f32.mrb[0].mxu1 }
 0x262   : > { %v4433_v28 = vpop.f32.mrb[1].mxu1  ;;  %1766 = vrot.lane.b32.xlu0 %v4429_v20, %s3825_s12  ;;  %v4437_v50 = vpop.f32.mrb[1].mxu0 }
 0x263   : > { %v4439_v14 = vpop.f32.mrb[2].mxu0  ;;  %v4441_v21 = vpop.f32.mrb[2].mxu1 }
 0x264   : > { %v4443_v32 = vpop.f32.mrb[3].mxu1  ;;  %1768 = vrot.lane.b32.xlu1 %v4439_v14, %s3825_s12  ;;  %v4447_v51 = vpop.f32.mrb[3].mxu0 }
 0x266   : > { %2201 = vrot.lane.b32.xlu0 %v4431_v11, %s3825_s12 }
 0x268   : > { %2203 = vrot.lane.b32.xlu1 %v4441_v21, %s3825_s12 }
 0x269   : > { %v4453_v3 = vpop.f32.mrb[4].mxu0  ;;  %v4455_v15 = vpop.f32.mrb[4].mxu1 }
 0x26a   : > { %1798 = vrot.lane.b32.xlu0 %v4437_v50, %s3825_s12  ;;  %v4459_v9 = vpop.f32.mrb[5].mxu1  ;;  %v4461_v56 = vpop.f32.mrb[5].mxu0 }
 0x26b   : > { %v4463_v61 = vpop.f32.mrb[6].mxu0  ;;  %v4465_v25 = vpop.f32.mrb[6].mxu1 }
 0x26c   : > { %1800 = vrot.lane.b32.xlu1 %v4447_v51, %s3825_s12  ;;  %v4469_v30 = vpop.f32.mrb[7].mxu1  ;;  %v4471_v16 = vpop.f32.mrb[7].mxu0 }
 0x26e   : > { %2233 = vrot.lane.b32.xlu0 %v4433_v28, %s3825_s12 }
 0x270   : > { %2235 = vrot.lane.b32.xlu1 %v4443_v32, %s3825_s12 }
 0x271   : > { %v4477_v7 = vpop.f32.mrb[8].mxu0  ;;  %v4479_v13 = vpop.f32.mrb[8].mxu1 }
 0x272   : > { %2205 = vrot.lane.b32.xlu0 %v4455_v15, %s3825_s12  ;;  %v4483_v17 = vpop.f32.mrb[9].mxu1  ;;  %v4485_v6 = vpop.f32.mrb[9].mxu0 }
 0x273   : > { %v4487_v45 = vpop.f32.mrb[10].mxu0  ;;  %v4489_v37 = vpop.f32.mrb[10].mxu1 }
 0x274   : > { %5272 = vst [vmem:[#allocation23_spill] sm:$0xff] %v4487_v45  ;;  %5273 = vst [vmem:[#allocation24_spill] sm:$0xff] %v4489_v37  ;;  %1770 = vrot.lane.b32.xlu1 %v4453_v3, %s3825_s12  ;;  %v4493_v5 = vpop.f32.mrb[11].mxu0  ;;  %v4495_v18 = vpop.f32.mrb[11].mxu1 }
 0x275   : > { %5274 = vst [vmem:[#allocation25_spill] sm:$0xff] %v4493_v5  ;;  %5275 = vst [vmem:[#allocation26_spill] sm:$0xff] %v4495_v18 }
 0x276   : > { %1802 = vrot.lane.b32.xlu0 %v4461_v56, %s3825_s12 }
 0x278   : > { %1772 = vrot.lane.b32.xlu1 %v4463_v61, %s3825_s12 }
 0x279   : > { %v4501_v19 = vpop.f32.mrb[12].mxu0  ;;  %v4503_v22 = vpop.f32.mrb[12].mxu1 }
 0x27a   : > { %5276 = vst [vmem:[#allocation27_spill] sm:$0xff] %v4501_v19  ;;  %5277 = vst [vmem:[#allocation28_spill] sm:$0xff] %v4503_v22  ;;  %2237 = vrot.lane.b32.xlu0 %v4459_v9, %s3825_s12  ;;  %v4507_v23 = vpop.f32.mrb[13].mxu1  ;;  %v4509_v12 = vpop.f32.mrb[13].mxu0 }
 0x27b   : > { %5278 = vst [vmem:[#allocation29_spill] sm:$0xff] %v4507_v23  ;;  %5279 = vst [vmem:[#allocation30_spill] sm:$0xff] %v4509_v12  ;;  %v4511_v1 = vpop.f32.mrb[14].mxu0  ;;  %v4513_v24 = vpop.f32.mrb[14].mxu1 }
 0x27c   : > { %5280 = vst [vmem:[#allocation31_spill] sm:$0xff] %v4511_v1  ;;  %5281 = vst [vmem:[#allocation32_spill] sm:$0xff] %v4513_v24  ;;  %2207 = vrot.lane.b32.xlu1 %v4465_v25, %s3825_s12  ;;  %v4517_v27 = vpop.f32.mrb[15].mxu0  ;;  %v4519_v8 = vpop.f32.mrb[15].mxu1 }
 0x27e   : > { %1774 = vrot.lane.b32.xlu0 %v4477_v7, %s3825_s12 }
 0x280   : > { %1804 = vrot.lane.b32.xlu1 %v4471_v16, %s3825_s12 }
 0x281   : > { %v4525_v39 = vpop.f32.mrb[16].mxu0  ;;  %v4527_v46 = vpop.f32.mrb[16].mxu1 }
 0x282   : > { %5282 = vst [vmem:[#allocation33_spill] sm:$0xff] %v4525_v39  ;;  %5283 = vst [vmem:[#allocation34_spill] sm:$0xff] %v4527_v46  ;;  %2209 = vrot.lane.b32.xlu0 %v4479_v13, %s3825_s12  ;;  %v4531_v10 = vpop.f32.mrb[17].mxu0  ;;  %v4533_v29 = vpop.f32.mrb[17].mxu1 }
 0x283   : > { %v4535_v33 = vpop.f32.mrb[18].mxu0  ;;  %v4537_v34 = vpop.f32.mrb[18].mxu1 }
 0x284   : > { %2239 = vrot.lane.b32.xlu1 %v4469_v30, %s3825_s12  ;;  %v4541_v35 = vpop.f32.mrb[19].mxu0  ;;  %v4543_v36 = vpop.f32.mrb[19].mxu1 }
 0x285   : > { %5284 = vst [vmem:[#allocation35_spill] sm:$0xff] %v4543_v36 }
 0x286   : > { %1806 = vrot.lane.b32.xlu0 %v4485_v6, %s3825_s12 }
 0x288   : > { %1776 = vrot.lane.b32.xlu1 %v4487_v45, %s3825_s12 }
 0x289   : > { %v4549_v44 = vpop.f32.mrb[20].mxu0  ;;  %v4551_v41 = vpop.f32.mrb[20].mxu1 }
 0x28a   : > { %5285 = vst [vmem:[#allocation36_spill] sm:$0xff] %v4549_v44  ;;  %5286 = vst [vmem:[#allocation37_spill] sm:$0xff] %v4551_v41  ;;  %2241 = vrot.lane.b32.xlu0 %v4483_v17, %s3825_s12  ;;  %v4555_v31 = vpop.f32.mrb[21].mxu0  ;;  %v4557_v38 = vpop.f32.mrb[21].mxu1 }
 0x28b   : > { %5287 = vst [vmem:[#allocation38_spill] sm:$0xff] %v4555_v31  ;;  %5288 = vst [vmem:[#allocation39_spill] sm:$0xff] %v4557_v38  ;;  %v4559_v43 = vpop.f32.mrb[22].mxu0  ;;  %v4561_v26 = vpop.f32.mrb[22].mxu1 }
 0x28c   : > { %5289 = vst [vmem:[#allocation40_spill] sm:$0xff] %v4559_v43  ;;  %5290 = vst [vmem:[#allocation41_spill] sm:$0xff] %v4561_v26  ;;  %2211 = vrot.lane.b32.xlu1 %v4489_v37, %s3825_s12  ;;  %v4565_v57 = vpop.f32.mrb[23].mxu0  ;;  %v4567_v58 = vpop.f32.mrb[23].mxu1 }
 0x28d   : > { %5291 = vst [vmem:[#allocation42_spill] sm:$0xff] %v4565_v57  ;;  %5292 = vst [vmem:[#allocation43_spill] sm:$0xff] %v4567_v58 }
 0x28e   : > { %1778 = vrot.lane.b32.xlu0 %v4501_v19, %s3825_s12 }
 0x290   : > { %1808 = vrot.lane.b32.xlu1 %v4493_v5, %s3825_s12 }
 0x291   : > { %v4573_v2 = vpop.f32.mrb[24].mxu0  ;;  %v4575_v62 = vpop.f32.mrb[24].mxu1 }
 0x292   : > { %5293 = vst [vmem:[#allocation44_spill] sm:$0xff] %v4573_v2  ;;  %5294 = vst [vmem:[#allocation45_spill] sm:$0xff] %v4575_v62  ;;  %2213 = vrot.lane.b32.xlu0 %v4503_v22, %s3825_s12  ;;  %v4579_v42 = vpop.f32.mrb[25].mxu0  ;;  %v4581_v47 = vpop.f32.mrb[25].mxu1 }
 0x293   : > { %5295 = vst [vmem:[#allocation46_spill] sm:$0xff] %v4579_v42  ;;  %5296 = vst [vmem:[#allocation47_spill] sm:$0xff] %v4581_v47  ;;  %v4583_v49 = vpop.f32.mrb[26].mxu0  ;;  %v4585_v52 = vpop.f32.mrb[26].mxu1 }
 0x294   : > { %5297 = vst [vmem:[#allocation48_spill] sm:$0xff] %v4583_v49  ;;  %5298 = vst [vmem:[#allocation49_spill] sm:$0xff] %v4585_v52  ;;  %2243 = vrot.lane.b32.xlu1 %v4495_v18, %s3825_s12  ;;  %v4589_v53 = vpop.f32.mrb[27].mxu0  ;;  %v4591_v59 = vpop.f32.mrb[27].mxu1 }
 0x295   : > { %5299 = vst [vmem:[#allocation50_spill] sm:$0xff] %v4589_v53  ;;  %5300 = vst [vmem:[#allocation51_spill] sm:$0xff] %v4591_v59 }
 0x296   : > { %1810 = vrot.lane.b32.xlu0 %v4509_v12, %s3825_s12 }
 0x298   : > { %1780 = vrot.lane.b32.xlu1 %v4511_v1, %s3825_s12 }
 0x299   : > { %v4597_v60 = vpop.f32.mrb[28].mxu0  ;;  %v4599_v40 = vpop.f32.mrb[28].mxu1 }
 0x29a   : > { %5301 = vst [vmem:[#allocation52_spill] sm:$0xff] %v4597_v60  ;;  %5302 = vst [vmem:[#allocation53_spill] sm:$0xff] %v4599_v40  ;;  %2245 = vrot.lane.b32.xlu0 %v4507_v23, %s3825_s12  ;;  %v4603_v55 = vpop.f32.mrb[29].mxu0  ;;  %v4605_v0 = vpop.f32.mrb[29].mxu1 }
 0x29b   : > { %5303 = vst [vmem:[#allocation54_spill] sm:$0xff] %v4603_v55  ;;  %5304 = vst [vmem:[#allocation55_spill] sm:$0xff] %v4605_v0  ;;  %v4607_v4 = vpop.f32.mrb[30].mxu0  ;;  %v4609_v63 = vpop.f32.mrb[30].mxu1 }
 0x29c   : > { %5305 = vst [vmem:[#allocation56_spill] sm:$0xff] %v4607_v4  ;;  %5306 = vst [vmem:[#allocation57_spill] sm:$0xff] %v4609_v63  ;;  %2215 = vrot.lane.b32.xlu1 %v4513_v24, %s3825_s12  ;;  %v4613_v48 = vpop.f32.mrb[31].mxu0  ;;  %v4615_v54 = vpop.f32.mrb[31].mxu1 }
 0x29d   : > { %5307 = vst [vmem:[#allocation58_spill] sm:$0xff] %v4615_v54 }
 0x29e   : > { %1782 = vrot.lane.b32.xlu0 %v4525_v39, %s3825_s12 }
 0x2a0   : > { %1812 = vrot.lane.b32.xlu1 %v4517_v27, %s3825_s12 }
 0x2a1   : > { %v1575_v1 = vpop.f32.mrb[32].mxu0  ;;  %v1615_v12 = vpop.f32.mrb[32].mxu1 }
 0x2a2   : > { %2217 = vrot.lane.b32.xlu0 %v4527_v46, %s3825_s12  ;;  %v1577_v23 = vpop.f32.mrb[33].mxu0  ;;  %v1617_v22 = vpop.f32.mrb[33].mxu1 }
 0x2a3   : > { %v3132_v19 = vpack.c.bf16 %v1577_v23, %v1575_v1  ;;  %v3140_v24 = vpack.c.bf16 %v1617_v22, %v1615_v12  ;;  %v1579_v18 = vpop.f32.mrb[34].mxu0  ;;  %v1619_v5 = vpop.f32.mrb[34].mxu1 }
 0x2a4   : > { %2247 = vrot.lane.b32.xlu1 %v4519_v8, %s3825_s12  ;;  %v1581_v37 = vpop.f32.mrb[35].mxu0  ;;  %v1621_v45 = vpop.f32.mrb[35].mxu1 }
 0x2a5   : > { %2633 = vst [vmem:[%s4626_s3] sm:$0xff] %v3132_v19  ;;  %2641 = vst [vmem:[%s4626_s3 + $0x40] sm:$0xff] %v3140_v24  ;;  %v3133_v46 = vpack.c.bf16 %v1581_v37, %v1579_v18  ;;  %v3141_v39 = vpack.c.bf16 %v1621_v45, %v1619_v5 }
 0x2a6   : > { %1814 = vrot.lane.b32.xlu0 %v4531_v10, %s3825_s12 }
 0x2a7   : > { %2634 = vst [vmem:[%s4626_s3 + $0x8] sm:$0xff] %v3133_v46  ;;  %2642 = vst [vmem:[%s4626_s3 + $0x48] sm:$0xff] %v3141_v39 }
 0x2a8   : > { %1784 = vrot.lane.b32.xlu1 %v4535_v33, %s3825_s12 }
 0x2a9   : > { %v1585_v22 = vpop.f32.mrb[36].mxu0  ;;  %v1625_v23 = vpop.f32.mrb[36].mxu1 }
 0x2aa   : > { %2249 = vrot.lane.b32.xlu0 %v4533_v29, %s3825_s12  ;;  %v1587_v19 = vpop.f32.mrb[37].mxu0  ;;  %v1627_v37 = vpop.f32.mrb[37].mxu1 }
 0x2ab   : > { %v3134_v45 = vpack.c.bf16 %v1587_v19, %v1585_v22  ;;  %v1589_v5 = vpop.f32.mrb[38].mxu0  ;;  %v3142_v18 = vpack.c.bf16 %v1627_v37, %v1625_v23  ;;  %v1629_v12 = vpop.f32.mrb[38].mxu1 }
 0x2ac   : > { %2219 = vrot.lane.b32.xlu1 %v4537_v34, %s3825_s12  ;;  %v1591_v1 = vpop.f32.mrb[39].mxu0  ;;  %v1631_v24 = vpop.f32.mrb[39].mxu1 }
 0x2ad   : > { %2635 = vst [vmem:[%s4626_s3 + $0x10] sm:$0xff] %v3134_v45  ;;  %v3135_v39 = vpack.c.bf16 %v1591_v1, %v1589_v5  ;;  %2643 = vst [vmem:[%s4626_s3 + $0x50] sm:$0xff] %v3142_v18  ;;  %v3143_v46 = vpack.c.bf16 %v1631_v24, %v1629_v12 }
 0x2ae   : > { %1786 = vrot.lane.b32.xlu0 %v4549_v44, %s3825_s12  ;;  %v4743_v44 = vld [vmem:[#allocation10 + $0x10] sm:$0xff] }
 0x2af   : > { %2636 = vst [vmem:[%s4626_s3 + $0x18] sm:$0xff] %v3135_v39  ;;  %2644 = vst [vmem:[%s4626_s3 + $0x58] sm:$0xff] %v3143_v46 }
 0x2b0   : > { %1816 = vrot.lane.b32.xlu1 %v4541_v35, %s3825_s12 }
 0x2b1   : > { %v1595_v22 = vpop.f32.mrb[40].mxu0  ;;  %v1635_v23 = vpop.f32.mrb[40].mxu1 }
 0x2b2   : > { %2221 = vrot.lane.b32.xlu0 %v4551_v41, %s3825_s12  ;;  %v1597_v19 = vpop.f32.mrb[41].mxu0  ;;  %v1637_v37 = vpop.f32.mrb[41].mxu1 }
 0x2b3   : > { %v3136_v45 = vpack.c.bf16 %v1597_v19, %v1595_v22  ;;  %v1599_v5 = vpop.f32.mrb[42].mxu0  ;;  %v3144_v18 = vpack.c.bf16 %v1637_v37, %v1635_v23  ;;  %v1639_v12 = vpop.f32.mrb[42].mxu1 }
 0x2b4   : > { %2251 = vrot.lane.b32.xlu1 %v4543_v36, %s3825_s12  ;;  %v1601_v1 = vpop.f32.mrb[43].mxu0  ;;  %v1641_v24 = vpop.f32.mrb[43].mxu1 }
 0x2b5   : > { %2637 = vst [vmem:[%s4626_s3 + $0x20] sm:$0xff] %v3136_v45  ;;  %v3137_v39 = vpack.c.bf16 %v1601_v1, %v1599_v5  ;;  %2645 = vst [vmem:[%s4626_s3 + $0x60] sm:$0xff] %v3144_v18  ;;  %v3145_v46 = vpack.c.bf16 %v1641_v24, %v1639_v12 }
 0x2b6   : > { %1818 = vrot.lane.b32.xlu0 %v4555_v31, %s3825_s12 }
 0x2b7   : > { %2638 = vst [vmem:[%s4626_s3 + $0x28] sm:$0xff] %v3137_v39  ;;  %2646 = vst [vmem:[%s4626_s3 + $0x68] sm:$0xff] %v3145_v46 }
 0x2b8   : > { %1788 = vrot.lane.b32.xlu1 %v4559_v43, %s3825_s12 }
 0x2b9   : > { %v1605_v22 = vpop.f32.mrb[44].mxu0  ;;  %v1645_v23 = vpop.f32.mrb[44].mxu1 }
 0x2ba   : > { %2253 = vrot.lane.b32.xlu0 %v4557_v38, %s3825_s12  ;;  %v1607_v19 = vpop.f32.mrb[45].mxu0  ;;  %v1647_v37 = vpop.f32.mrb[45].mxu1 }
 0x2bb   : > { %v3138_v45 = vpack.c.bf16 %v1607_v19, %v1605_v22  ;;  %v1609_v5 = vpop.f32.mrb[46].mxu0  ;;  %v3146_v18 = vpack.c.bf16 %v1647_v37, %v1645_v23  ;;  %v1649_v12 = vpop.f32.mrb[46].mxu1  ;;  %v5308_v22 = vlaneseq  ;;  %v1654_v19 = vld [vmem:[#allocation8] sm:$0xff] }
 0x2bc   : > { %2223 = vrot.lane.b32.xlu1 %v4561_v26, %s3825_s12  ;;  %v1611_v1 = vpop.f32.mrb[47].mxu0  ;;  %v1651_v24 = vpop.f32.mrb[47].mxu1 }
 0x2bd   : > { %2639 = vst [vmem:[%s4626_s3 + $0x30] sm:$0xff] %v3138_v45  ;;  %v3139_v39 = vpack.c.bf16 %v1611_v1, %v1609_v5  ;;  %2647 = vst [vmem:[%s4626_s3 + $0x70] sm:$0xff] %v3146_v18  ;;  %v3147_v46 = vpack.c.bf16 %v1651_v24, %v1649_v12  ;;  %v4691_v23 = vand.u32 127, %v5308_v22  ;;  %v1655_v45 = vld [vmem:[#allocation8 + $0x8] sm:$0xff]  ;;  %v4695_v5 = vld [vmem:[#allocation8 + $0x10] sm:$0xff]  ;;  %v1702_v1 = vunpack.c.l.bf16 %v1654_v19 }
 0x2be   : > { %1790 = vrot.lane.b32.xlu0 %v4573_v2, %s3825_s12  ;;  %v1686_v12 = vld [vmem:[#allocation11] sm:$0xff]  ;;  %v1704_v22 = vunpack.c.l.bf16 %v1655_v45 }
 0x2bf   : > { %2640 = vst [vmem:[%s4626_s3 + $0x38] sm:$0xff] %v3139_v39  ;;  %2648 = vst [vmem:[%s4626_s3 + $0x78] sm:$0xff] %v3147_v46  ;;  %v1670_v24 = vld [vmem:[#allocation10] sm:$0xff]  ;;  %v4699_v39 = vld [vmem:[#allocation11 + $0x8] sm:$0xff]  ;;  %vm1832_vm0 = vcmp.lt.s32.totalorder %v4691_v23, 64  ;;  %v1703_v46 = vunpack.c.h.bf16 %v1654_v19 }
 0x2c0   : > { %1820 = vrot.lane.b32.xlu1 %v4565_v57, %s3825_s12  ;;  %v1962_v19 = vunpack.c.h.bf16 %v1670_v24  ;;  %v1868_v2 = vunpack.c.h.bf16 %v4699_v39 }
 0x2c1   : > { %v2170_v57 = vmul.f32 %v1703_v46, %v4433_v28 }
 0x2c2   : > { %2225 = vrot.lane.b32.xlu0 %v4575_v62, %s3825_s12  ;;  %v1867_v62 = vunpack.c.l.bf16 %v4699_v39  ;;  %v2171_v39 = vmul.f32 %v1704_v22, %v4441_v21 }
 0x2c4   : > { %2255 = vrot.lane.b32.xlu1 %v4567_v58, %s3825_s12  ;;  %v4715_v58 = vld [vmem:[#allocation11 + $0x10] sm:$0xff] }
 0x2c6   : > { %1822 = vrot.lane.b32.xlu0 %v4579_v42, %s3825_s12  ;;  %v1961_v42 = vunpack.c.l.bf16 %v1670_v24  ;;  %v1736_v24 = vmul.f32 %v1704_v22, %v4439_v14 }
 0x2c8   : > { %1792 = vrot.lane.b32.xlu1 %v4583_v49, %s3825_s12 }
 0x2ca   : > { %2257 = vrot.lane.b32.xlu0 %v4581_v47, %s3825_s12  ;;  %v1866_v47 = vunpack.c.h.bf16 %v1686_v12 }
 0x2cc   : > { %2227 = vrot.lane.b32.xlu1 %v4585_v52, %s3825_s12  ;;  %v1865_v52 = vunpack.c.l.bf16 %v1686_v12  ;;  %v1735_v12 = vmul.f32 %v1703_v46, %v4437_v50 }
 0x2ce   : > { %1794 = vrot.lane.b32.xlu0 %v4597_v60, %s3825_s12 }
 0x2d0   : > { %1824 = vrot.lane.b32.xlu1 %v4589_v53, %s3825_s12 }
 0x2d2   : > { %2229 = vrot.lane.b32.xlu0 %v4599_v40, %s3825_s12  ;;  %v4704_v40 = vld [vmem:[#allocation10 + $0x8] sm:$0xff] }
 0x2d3   : > { %v1964_v53 = vunpack.c.h.bf16 %v4704_v40 }
 0x2d4   : > { %2259 = vrot.lane.b32.xlu1 %v4591_v59, %s3825_s12  ;;  %v1767_v37 = vpop.permute.xlu0 %1766  ;;  %v1705_v59 = vunpack.c.h.bf16 %v1655_v45 }
 0x2d6   : > { %v1769_v18 = vpop.permute.xlu1 %1768  ;;  %2261 = vrot.lane.b32.xlu0 %v4605_v0, %s3825_s12  ;;  %v2169_v0 = vmul.f32 %v1702_v1, %v4431_v11  ;;  %v2172_v45 = vmul.f32 %v1705_v59, %v4443_v32  ;;  %v1737_v28 = vmul.f32 %v1705_v59, %v4447_v51  ;;  %v5309_v59 = vunpack.c.l.bf16 %v4704_v40 }
 0x2d8   : > { %1796 = vrot.lane.b32.xlu1 %v4607_v4, %s3825_s12  ;;  %v2202_v60 = vpop.permute.xlu0 %2201  ;;  %v1734_v4 = vmul.f32 %v1702_v1, %v4429_v20 }
 0x2da   : > { %v2204_v49 = vpop.permute.xlu1 %2203  ;;  %1826 = vrot.lane.b32.xlu0 %v4603_v55, %s3825_s12 }
 0x2dc   : > { %2231 = vrot.lane.b32.xlu1 %v4609_v63, %s3825_s12  ;;  %v1799_v20 = vpop.permute.xlu0 %1798 }
 0x2dd   : > { %v1833_v55 = vsel %vm1832_vm0, %v1767_v37, %v1799_v20  ;;  %v1849_v11 = vsel %vm1832_vm0, %v1799_v20, %v1767_v37 }
 0x2de   : > { %v1897_v1 = vmul.f32 %v1865_v52, %v1849_v11  ;;  %v1898_v50 = vmul.f32 %v1866_v47, %v1833_v55  ;;  %v1801_v46 = vpop.permute.xlu1 %1800  ;;  %v1993_v26 = vmul.f32 %v1961_v42, %v1833_v55  ;;  %v1994_v63 = vmul.f32 %v1962_v19, %v1849_v11 }
 0x2df   : > { %v1834_v21 = vsel %vm1832_vm0, %v1769_v18, %v1801_v46  ;;  %v1850_v32 = vsel %vm1832_vm0, %v1801_v46, %v1769_v18 }
 0x2e0   : > { %v1929_v22 = vadd.f32 %v1897_v1, %v1734_v4  ;;  %v1930_v43 = vadd.f32 %v1898_v50, %v1735_v12  ;;  %v1899_v38 = vmul.f32 %v1867_v62, %v1850_v32  ;;  %v1900_v31 = vmul.f32 %v1868_v2, %v1834_v21  ;;  %2263 = vrot.lane.b32.xlu1 %v4615_v54, %s3825_s12  ;;  %v2234_v51 = vpop.permute.xlu0 %2233 }
 0x2e1   : > { %v1995_v37 = vmul.f32 %v5309_v59, %v1834_v21  ;;  %v1996_v20 = vmul.f32 %v1964_v53, %v1850_v32  ;;  %v2265_v55 = vsel %vm1832_vm0, %v2202_v60, %v2234_v51  ;;  %v2281_v11 = vsel %vm1832_vm0, %v2234_v51, %v2202_v60 }
 0x2e2   : > { %v2025_v14 = vadd.f32 %v1993_v26, %v1929_v22  ;;  %v2026_v18 = vadd.f32 %v1994_v63, %v1930_v43  ;;  %v1931_v4 = vadd.f32 %v1899_v38, %v1736_v24  ;;  %v1932_v12 = vadd.f32 %v1900_v31, %v1737_v28  ;;  %v2236_v1 = vpop.permute.xlu1 %2235 }
 0x2e3   : > { %v2297_v50 = vmul.f32 %v2281_v11, %v1865_v52  ;;  %v2298_v46 = vmul.f32 %v2265_v55, %v1866_v47  ;;  %v2361_v54 = vmul.f32 %v2265_v55, %v1961_v42  ;;  %v2362_v41 = vmul.f32 %v2281_v11, %v1962_v19 }
 0x2e4   : > { %v3100_v21 = vpack.c.bf16 %v2026_v18, %v2025_v14  ;;  %v2027_v32 = vadd.f32 %v1995_v37, %v1931_v4  ;;  %v2028_v59 = vadd.f32 %v1996_v20, %v1932_v12  ;;  %v2266_v36 = vsel %vm1832_vm0, %v2204_v49, %v2236_v1  ;;  %1828 = vrot.lane.b32.xlu1 %v4613_v48, %s3825_s12  ;;  %v2206_v43 = vpop.permute.xlu0 %2205  ;;  %v4760_v14 = vld [vmem:[#allocation8 + $0x18] sm:$0xff]  ;;  %s5067_s12 = scalar_lea.hbm %s5353_s21, %s3148_s26 }
 0x2e5   : > { %v2329_v38 = vadd.f32 %v2297_v50, %v2169_v0  ;;  %v2330_v31 = vadd.f32 %v2298_v46, %v2170_v57  ;;  %v2282_v26 = vsel %vm1832_vm0, %v2236_v1, %v2204_v49  ;;  %v2300_v47 = vmul.f32 %v2266_v36, %v1868_v2 }
 0x2e6   : > { %2153 = vst [vmem:[%s4752_s18] sm:$0xff] %v3100_v21  ;;  %v3101_v42 = vpack.c.bf16 %v2028_v59, %v2027_v32  ;;  %v2299_v52 = vmul.f32 %v2282_v26, %v1867_v62  ;;  %v1771_v60 = vpop.permute.xlu1 %1770  ;;  %v1870_v63 = vunpack.c.h.bf16 %v4715_v58  ;;  %v1965_v19 = vunpack.c.l.bf16 %v4743_v44 }
 0x2e7   : > { %v2393_v24 = vadd.f32 %v2361_v54, %v2329_v38  ;;  %v2394_v28 = vadd.f32 %v2362_v41, %v2330_v31  ;;  %v2332_v0 = vadd.f32 %v2300_v47, %v2172_v45  ;;  %v2364_v57 = vmul.f32 %v2282_v26, %v1964_v53 }
 0x2e8   : > { %v5310_v49 = vunpack.c.l.bf16 %v4695_v5  ;;  %2154 = vst [vmem:[%s4752_s18 + $0x8] sm:$0xff] %v3101_v42  ;;  %v2331_v22 = vadd.f32 %v2299_v52, %v2171_v39  ;;  %v5311_v62 = vunpack.c.l.bf16 %v4704_v40  ;;  %v1966_v37 = vunpack.c.h.bf16 %v4743_v44  ;;  %v1803_v20 = vpop.permute.xlu0 %1802  ;;  %v4790_v42 = vld [vmem:[#allocation8 + $0x20] sm:$0xff]  ;;  %v4792_v52 = vld [vmem:[#allocation8 + $0x28] sm:$0xff] }
 0x2e9   : > { %v3116_v55 = vpack.c.bf16 %v2394_v28, %v2393_v24  ;;  %v2396_v54 = vadd.f32 %v2364_v57, %v2332_v0  ;;  %v1835_v41 = vsel %vm1832_vm0, %v1771_v60, %v1803_v20  ;;  %v1851_v53 = vsel %vm1832_vm0, %v1803_v20, %v1771_v60 }
 0x2ea   : > { %v1738_v2 = vmul.f32 %v5310_v49, %v4453_v3  ;;  %v2363_v51 = vmul.f32 %v2266_v36, %v5311_v62  ;;  %v5312_v3 = vunpack.c.h.bf16 %v4695_v5  ;;  %v5313_v39 = vunpack.c.l.bf16 %v4715_v58  ;;  %v1773_v18 = vpop.permute.xlu1 %1772 }
 0x2eb   : > { %v1902_v36 = vmul.f32 %v1870_v63, %v1835_v41  ;;  %v1708_v44 = vunpack.c.l.bf16 %v4760_v14  ;;  %2521 = vst [vmem:[%s4777_s17] sm:$0xff] %v3116_v55  ;;  %v1997_v4 = vmul.f32 %v1965_v19, %v1835_v41  ;;  %v1998_v46 = vmul.f32 %v1966_v37, %v1851_v53 }
 0x2ec   : > { %v1739_v45 = vmul.f32 %v5312_v3, %v4461_v56  ;;  %v2395_v11 = vadd.f32 %v2363_v51, %v2331_v22  ;;  %v1901_v40 = vmul.f32 %v5313_v39, %v1851_v53  ;;  %v2238_v21 = vpop.permute.xlu0 %2237  ;;  %v1689_v56 = vld [vmem:[#allocation11 + $0x18] sm:$0xff]  ;;  %v5314_v32 = vmov %v5310_v49 }
 0x2ed   : > { %v2173_v59 = vmul.f32 %v5314_v32, %v4455_v15  ;;  %v5315_v38 = vmov %v5312_v3  ;;  %v2267_v26 = vsel %vm1832_vm0, %v2206_v43, %v2238_v21  ;;  %v2283_v47 = vsel %vm1832_vm0, %v2238_v21, %v2206_v43  ;;  %v1673_v49 = vld [vmem:[#allocation10 + $0x18] sm:$0xff] }
 0x2ee   : > { %v3117_v12 = vpack.c.bf16 %v2396_v54, %v2395_v11  ;;  %v1933_v1 = vadd.f32 %v1901_v40, %v1738_v2  ;;  %v1934_v50 = vadd.f32 %v1902_v36, %v1739_v45  ;;  %v2174_v31 = vmul.f32 %v5315_v38, %v4459_v9  ;;  %v2208_v5 = vpop.permute.xlu1 %2207  ;;  %v1690_v45 = vld [vmem:[#allocation11 + $0x20] sm:$0xff] }
 0x2ef   : > { %v5316_v28 = vmov %v5313_v39  ;;  %v2302_v0 = vmul.f32 %v2267_v26, %v1870_v63  ;;  %v1709_v9 = vunpack.c.h.bf16 %v4760_v14  ;;  %v2365_v57 = vmul.f32 %v2267_v26, %v1965_v19 }
 0x2f0   : > { %2522 = vst [vmem:[%s4777_s17 + $0x8] sm:$0xff] %v3117_v12  ;;  %v2029_v60 = vadd.f32 %v1997_v4, %v1933_v1  ;;  %v2030_v24 = vadd.f32 %v1998_v46, %v1934_v50  ;;  %v2301_v15 = vmul.f32 %v2283_v47, %v5316_v28  ;;  %v1871_v2 = vunpack.c.l.bf16 %v1689_v56  ;;  %v1775_v55 = vpop.permute.xlu0 %1774  ;;  %v1674_v46 = vld [vmem:[#allocation10 + $0x20] sm:$0xff] }
 0x2f1   : > { %v1872_v22 = vunpack.c.h.bf16 %v1689_v56  ;;  %v2334_v51 = vadd.f32 %v2302_v0, %v2174_v31  ;;  %v2366_v20 = vmul.f32 %v2283_v47, %v1966_v37  ;;  %v1710_v54 = vunpack.c.l.bf16 %v4790_v42 }
 0x2f2   : > { %v3102_v43 = vpack.c.bf16 %v2030_v24, %v2029_v60  ;;  %v2333_v62 = vadd.f32 %v2301_v15, %v2173_v59  ;;  %v1711_v41 = vunpack.c.h.bf16 %v4790_v42  ;;  %v1712_v58 = vunpack.c.l.bf16 %v4792_v52  ;;  %v1805_v19 = vpop.permute.xlu1 %1804 }
 0x2f3   : > { %v2398_v53 = vadd.f32 %v2366_v20, %v2334_v51  ;;  %v1967_v3 = vunpack.c.l.bf16 %v1673_v49  ;;  %v1968_v14 = vunpack.c.h.bf16 %v1673_v49  ;;  %v1740_v11 = vmul.f32 %v1708_v44, %v4463_v61 }
 0x2f4   : > { %2155 = vst [vmem:[%s4752_s18 + $0x10] sm:$0xff] %v3102_v43  ;;  %v2397_v63 = vadd.f32 %v2365_v57, %v2333_v62  ;;  %v2175_v39 = vmul.f32 %v1708_v44, %v4465_v25  ;;  %v1836_v37 = vsel %vm1832_vm0, %v1773_v18, %v1805_v19  ;;  %v1852_v40 = vsel %vm1832_vm0, %v1805_v19, %v1773_v18  ;;  %v2210_v50 = vpop.permute.xlu0 %2209 }
 0x2f5   : > { %v1741_v36 = vmul.f32 %v1709_v9, %v4471_v16  ;;  %v1903_v12 = vmul.f32 %v1871_v2, %v1852_v40  ;;  %v1904_v1 = vmul.f32 %v1872_v22, %v1836_v37  ;;  %v2176_v21 = vmul.f32 %v1709_v9, %v4469_v30 }
 0x2f6   : > { %v3118_v4 = vpack.c.bf16 %v2398_v53, %v2397_v63  ;;  %v1742_v56 = vmul.f32 %v1710_v54, %v4477_v7  ;;  %v1873_v61 = vunpack.c.l.bf16 %v1690_v45  ;;  %v1874_v32 = vunpack.c.h.bf16 %v1690_v45  ;;  %v2240_v31 = vpop.permute.xlu1 %2239  ;;  %v1691_v45 = vld [vmem:[#allocation11 + $0x28] sm:$0xff] }
 0x2f7   : > { %v1935_v25 = vadd.f32 %v1903_v12, %v1740_v11  ;;  %v1936_v44 = vadd.f32 %v1904_v1, %v1741_v36  ;;  %v1999_v59 = vmul.f32 %v1967_v3, %v1836_v37  ;;  %v2000_v38 = vmul.f32 %v1968_v14, %v1852_v40  ;;  %v1675_v1 = vld [vmem:[#allocation10 + $0x28] sm:$0xff] }
 0x2f8   : > { %2523 = vst [vmem:[%s4777_s17 + $0x10] sm:$0xff] %v3118_v4  ;;  %v2268_v16 = vsel %vm1832_vm0, %v2208_v5, %v2240_v31  ;;  %v2284_v18 = vsel %vm1832_vm0, %v2240_v31, %v2208_v5  ;;  %v1969_v26 = vunpack.c.l.bf16 %v1674_v46  ;;  %v1970_v47 = vunpack.c.h.bf16 %v1674_v46  ;;  %v1807_v24 = vpop.permute.xlu0 %1806 }
 0x2f9   : > { %v2031_v42 = vadd.f32 %v1999_v59, %v1935_v25  ;;  %v2032_v30 = vadd.f32 %v2000_v38, %v1936_v44  ;;  %v2303_v60 = vmul.f32 %v2284_v18, %v1871_v2  ;;  %v2304_v7 = vmul.f32 %v2268_v16, %v1872_v22 }
 0x2fa   : > { %v2367_v28 = vmul.f32 %v2268_v16, %v1967_v3  ;;  %v2368_v15 = vmul.f32 %v2284_v18, %v1968_v14  ;;  %v1837_v0 = vsel %vm1832_vm0, %v1775_v55, %v1807_v24  ;;  %v1853_v9 = vsel %vm1832_vm0, %v1807_v24, %v1775_v55  ;;  %v1777_v62 = vpop.permute.xlu1 %1776  ;;  %v5317_v24 = vld [vmem:[#allocation23_spill] sm:$0xff] }
 0x2fb   : > { %v3103_v57 = vpack.c.bf16 %v2032_v30, %v2031_v42  ;;  %v2335_v49 = vadd.f32 %v2303_v60, %v2175_v39  ;;  %v2336_v43 = vadd.f32 %v2304_v7, %v2176_v21  ;;  %v1905_v5 = vmul.f32 %v1873_v61, %v1853_v9  ;;  %v1692_v7 = vld [vmem:[#allocation11 + $0x30] sm:$0xff] }
 0x2fc   : > { %v2177_v51 = vmul.f32 %v1710_v54, %v4479_v13  ;;  %v2178_v2 = vmul.f32 %v1711_v41, %v4483_v17  ;;  %v1743_v22 = vmul.f32 %v1711_v41, %v4485_v6  ;;  %v1906_v20 = vmul.f32 %v1874_v32, %v1837_v0  ;;  %v2242_v19 = vpop.permute.xlu0 %2241  ;;  %v4828_v17 = vld [vmem:[#allocation8 + $0x30] sm:$0xff]  ;;  %v4830_v6 = vld [vmem:[#allocation8 + $0x38] sm:$0xff] }
 0x2fd   : > { %2156 = vst [vmem:[%s4752_s18 + $0x18] sm:$0xff] %v3103_v57  ;;  %v2399_v63 = vadd.f32 %v2367_v28, %v2335_v49  ;;  %v2400_v53 = vadd.f32 %v2368_v15, %v2336_v43  ;;  %v1937_v3 = vadd.f32 %v1905_v5, %v1742_v56  ;;  %v2001_v14 = vmul.f32 %v1969_v26, %v1837_v0 }
 0x2fe   : > { %v1938_v55 = vadd.f32 %v1906_v20, %v1743_v22  ;;  %v2002_v11 = vmul.f32 %v1970_v47, %v1853_v9  ;;  %v2269_v39 = vsel %vm1832_vm0, %v2210_v50, %v2242_v19  ;;  %v2285_v13 = vsel %vm1832_vm0, %v2242_v19, %v2210_v50  ;;  %v2212_v36 = vpop.permute.xlu1 %2211  ;;  %v5319_v9 = vld [vmem:[#allocation25_spill] sm:$0xff]  ;;  %v5320_v22 = vld [vmem:[#allocation26_spill] sm:$0xff] }
 0x2ff   : > { %v3119_v54 = vpack.c.bf16 %v2400_v53, %v2399_v63  ;;  %v2033_v41 = vadd.f32 %v2001_v14, %v1937_v3  ;;  %v2305_v37 = vmul.f32 %v2285_v13, %v1873_v61  ;;  %v2306_v40 = vmul.f32 %v2269_v39, %v1874_v32  ;;  %v5321_v63 = vld [vmem:[#allocation27_spill] sm:$0xff] }
 0x300   : > { %v1713_v4 = vunpack.c.h.bf16 %v4792_v52  ;;  %v2034_v12 = vadd.f32 %v2002_v11, %v1938_v55  ;;  %v1875_v46 = vunpack.c.l.bf16 %v1691_v45  ;;  %v1876_v21 = vunpack.c.h.bf16 %v1691_v45  ;;  %v1779_v59 = vpop.permute.xlu0 %1778 }
 0x301   : > { %2524 = vst [vmem:[%s4777_s17 + $0x18] sm:$0xff] %v3119_v54  ;;  %v2337_v56 = vadd.f32 %v2305_v37, %v2177_v51  ;;  %v2338_v25 = vadd.f32 %v2306_v40, %v2178_v2  ;;  %v2369_v50 = vmul.f32 %v2269_v39, %v1969_v26  ;;  %v2370_v44 = vmul.f32 %v2285_v13, %v1970_v47  ;;  %v5318_v47 = vld [vmem:[#allocation24_spill] sm:$0xff]  ;;  %v1676_v2 = vld [vmem:[#allocation10 + $0x30] sm:$0xff] }
 0x302   : > { %v1714_v38 = vunpack.c.l.bf16 %v4828_v17  ;;  %v1715_v31 = vunpack.c.h.bf16 %v4828_v17  ;;  %v1716_v61 = vunpack.c.l.bf16 %v4830_v6  ;;  %v3104_v32 = vpack.c.bf16 %v2034_v12, %v2033_v41  ;;  %v1809_v60 = vpop.permute.xlu1 %1808 }
 0x303   : > { %v2401_v16 = vadd.f32 %v2369_v50, %v2337_v56  ;;  %v2402_v18 = vadd.f32 %v2370_v44, %v2338_v25  ;;  %v1971_v42 = vunpack.c.l.bf16 %v1675_v1  ;;  %v1972_v30 = vunpack.c.h.bf16 %v1675_v1 }
 0x304   : > { %v1744_v26 = vmul.f32 %v1712_v58, %v5317_v24  ;;  %v2179_v28 = vmul.f32 %v1712_v58, %v5318_v47  ;;  %2157 = vst [vmem:[%s4752_s18 + $0x20] sm:$0xff] %v3104_v32  ;;  %v1838_v15 = vsel %vm1832_vm0, %v1777_v62, %v1809_v60  ;;  %v1854_v0 = vsel %vm1832_vm0, %v1809_v60, %v1777_v62  ;;  %v2214_v51 = vpop.permute.xlu0 %2213  ;;  %v5323_v60 = vld [vmem:[#allocation29_spill] sm:$0xff] }
 0x305   : > { %v1745_v57 = vmul.f32 %v1713_v4, %v5319_v9  ;;  %v3120_v49 = vpack.c.bf16 %v2402_v18, %v2401_v16  ;;  %v1907_v43 = vmul.f32 %v1875_v46, %v1854_v0  ;;  %v1908_v5 = vmul.f32 %v1876_v21, %v1838_v15  ;;  %v5322_v16 = vld [vmem:[#allocation28_spill] sm:$0xff] }
 0x306   : > { %v2180_v20 = vmul.f32 %v1713_v4, %v5320_v22  ;;  %v1746_v53 = vmul.f32 %v1714_v38, %v5321_v63  ;;  %v1877_v52 = vunpack.c.l.bf16 %v1692_v7  ;;  %v1878_v58 = vunpack.c.h.bf16 %v1692_v7  ;;  %v2244_v55 = vpop.permute.xlu1 %2243  ;;  %v5324_v7 = vld [vmem:[#allocation30_spill] sm:$0xff] }
 0x307   : > { %2525 = vst [vmem:[%s4777_s17 + $0x20] sm:$0xff] %v3120_v49  ;;  %v1939_v3 = vadd.f32 %v1907_v43, %v1744_v26  ;;  %v1940_v14 = vadd.f32 %v1908_v5, %v1745_v57  ;;  %v2003_v19 = vmul.f32 %v1971_v42, %v1838_v15  ;;  %v2004_v45 = vmul.f32 %v1972_v30, %v1854_v0  ;;  %v1693_v0 = vld [vmem:[#allocation11 + $0x38] sm:$0xff]  ;;  %v4868_v57 = vld [vmem:[#allocation8 + $0x40] sm:$0xff] }
 0x308   : > { %v2270_v62 = vsel %vm1832_vm0, %v2212_v36, %v2244_v55  ;;  %v2286_v11 = vsel %vm1832_vm0, %v2244_v55, %v2212_v36  ;;  %v1973_v39 = vunpack.c.l.bf16 %v1676_v2  ;;  %v1974_v13 = vunpack.c.h.bf16 %v1676_v2  ;;  %v1811_v40 = vpop.permute.xlu0 %1810 }
 0x309   : > { %v2035_v17 = vadd.f32 %v2003_v19, %v1939_v3  ;;  %v2036_v54 = vadd.f32 %v2004_v45, %v1940_v14  ;;  %v2307_v41 = vmul.f32 %v2286_v11, %v1875_v46  ;;  %v2308_v37 = vmul.f32 %v2270_v62, %v1876_v21 }
 0x30a   : > { %v2371_v4 = vmul.f32 %v2270_v62, %v1971_v42  ;;  %v2372_v12 = vmul.f32 %v2286_v11, %v1972_v30  ;;  %v1839_v1 = vsel %vm1832_vm0, %v1779_v59, %v1811_v40  ;;  %v1855_v56 = vsel %vm1832_vm0, %v1811_v40, %v1779_v59  ;;  %v1781_v32 = vpop.permute.xlu1 %1780 }
 0x30b   : > { %v3105_v25 = vpack.c.bf16 %v2036_v54, %v2035_v17  ;;  %v2339_v50 = vadd.f32 %v2307_v41, %v2179_v28  ;;  %v2340_v44 = vadd.f32 %v2308_v37, %v2180_v20  ;;  %v1909_v36 = vmul.f32 %v1877_v52, %v1855_v56 }
 0x30c   : > { %v2181_v18 = vmul.f32 %v1714_v38, %v5322_v16  ;;  %v2182_v46 = vmul.f32 %v1715_v31, %v5323_v60  ;;  %v1747_v21 = vmul.f32 %v1715_v31, %v5324_v7  ;;  %v1910_v24 = vmul.f32 %v1878_v58, %v1839_v1  ;;  %v2246_v15 = vpop.permute.xlu0 %2245  ;;  %v4870_v31 = vld [vmem:[#allocation8 + $0x48] sm:$0xff] }
 0x30d   : > { %2158 = vst [vmem:[%s4752_s18 + $0x28] sm:$0xff] %v3105_v25  ;;  %v2403_v42 = vadd.f32 %v2371_v4, %v2339_v50  ;;  %v2404_v30 = vadd.f32 %v2372_v12, %v2340_v44  ;;  %v1941_v26 = vadd.f32 %v1909_v36, %v1746_v53  ;;  %v2005_v47 = vmul.f32 %v1973_v39, %v1839_v1  ;;  %v1677_v53 = vld [vmem:[#allocation10 + $0x38] sm:$0xff]  ;;  %v1694_v12 = vld [vmem:[#allocation11 + $0x40] sm:$0xff] }
 0x30e   : > { %v1942_v59 = vadd.f32 %v1910_v24, %v1747_v21  ;;  %v2006_v28 = vmul.f32 %v1974_v13, %v1855_v56  ;;  %v2271_v9 = vsel %vm1832_vm0, %v2214_v51, %v2246_v15  ;;  %v2287_v38 = vsel %vm1832_vm0, %v2246_v15, %v2214_v51  ;;  %v2216_v22 = vpop.permute.xlu1 %2215  ;;  %v5325_v1 = vld [vmem:[#allocation31_spill] sm:$0xff]  ;;  %v5327_v21 = vld [vmem:[#allocation33_spill] sm:$0xff] }
 0x30f   : > { %v3121_v49 = vpack.c.bf16 %v2404_v30, %v2403_v42  ;;  %v2037_v43 = vadd.f32 %v2005_v47, %v1941_v26  ;;  %v2309_v5 = vmul.f32 %v2287_v38, %v1877_v52  ;;  %v2310_v2 = vmul.f32 %v2271_v9, %v1878_v58 }
 0x310   : > { %v1717_v20 = vunpack.c.h.bf16 %v4830_v6  ;;  %v2038_v63 = vadd.f32 %v2006_v28, %v1942_v59  ;;  %v1879_v3 = vunpack.c.l.bf16 %v1693_v0  ;;  %v1880_v14 = vunpack.c.h.bf16 %v1693_v0  ;;  %v1783_v62 = vpop.permute.xlu0 %1782 }
 0x311   : > { %2526 = vst [vmem:[%s4777_s17 + $0x28] sm:$0xff] %v3121_v49  ;;  %v2341_v19 = vadd.f32 %v2309_v5, %v2181_v18  ;;  %v2342_v45 = vadd.f32 %v2310_v2, %v2182_v46  ;;  %v2373_v51 = vmul.f32 %v2271_v9, %v1973_v39  ;;  %v2374_v55 = vmul.f32 %v2287_v38, %v1974_v13  ;;  %v5326_v13 = vld [vmem:[#allocation32_spill] sm:$0xff]  ;;  %v1678_v46 = vld [vmem:[#allocation10 + $0x40] sm:$0xff] }
 0x312   : > { %v1718_v11 = vunpack.c.l.bf16 %v4868_v57  ;;  %v1719_v17 = vunpack.c.h.bf16 %v4868_v57  ;;  %v1720_v52 = vunpack.c.l.bf16 %v4870_v31  ;;  %v3106_v58 = vpack.c.bf16 %v2038_v63, %v2037_v43  ;;  %v1813_v4 = vpop.permute.xlu1 %1812 }
 0x313   : > { %v2405_v54 = vadd.f32 %v2373_v51, %v2341_v19  ;;  %v2406_v41 = vadd.f32 %v2374_v55, %v2342_v45  ;;  %v1975_v37 = vunpack.c.l.bf16 %v1677_v53  ;;  %v1976_v40 = vunpack.c.h.bf16 %v1677_v53  ;;  %v5328_v45 = vld [vmem:[#allocation34_spill] sm:$0xff] }
 0x314   : > { %v1748_v39 = vmul.f32 %v1716_v61, %v5325_v1  ;;  %v2183_v56 = vmul.f32 %v1716_v61, %v5326_v13  ;;  %2159 = vst [vmem:[%s4752_s18 + $0x30] sm:$0xff] %v3106_v58  ;;  %v1840_v25 = vsel %vm1832_vm0, %v1781_v32, %v1813_v4  ;;  %v1856_v50 = vsel %vm1832_vm0, %v1813_v4, %v1781_v32  ;;  %v2218_v60 = vpop.permute.xlu0 %2217  ;;  %v1695_v4 = vld [vmem:[#allocation11 + $0x48] sm:$0xff] }
 0x315   : > { %v1749_v44 = vmul.f32 %v1717_v20, %v4517_v27  ;;  %v3122_v36 = vpack.c.bf16 %v2406_v41, %v2405_v54  ;;  %v1911_v16 = vmul.f32 %v1879_v3, %v1856_v50  ;;  %v1912_v18 = vmul.f32 %v1880_v14, %v1840_v25 }
 0x316   : > { %v2184_v7 = vmul.f32 %v1717_v20, %v4519_v8  ;;  %v1750_v24 = vmul.f32 %v1718_v11, %v5327_v21  ;;  %v1881_v6 = vunpack.c.l.bf16 %v1694_v12  ;;  %v1882_v61 = vunpack.c.h.bf16 %v1694_v12  ;;  %v2248_v15 = vpop.permute.xlu1 %2247 }
 0x317   : > { %2527 = vst [vmem:[%s4777_s17 + $0x30] sm:$0xff] %v3122_v36  ;;  %v1943_v42 = vadd.f32 %v1911_v16, %v1748_v39  ;;  %v1944_v30 = vadd.f32 %v1912_v18, %v1749_v44  ;;  %v2007_v26 = vmul.f32 %v1975_v37, %v1840_v25  ;;  %v2008_v47 = vmul.f32 %v1976_v40, %v1856_v50  ;;  %v1679_v36 = vld [vmem:[#allocation10 + $0x48] sm:$0xff] }
 0x318   : > { %v2272_v27 = vsel %vm1832_vm0, %v2216_v22, %v2248_v15  ;;  %v2288_v32 = vsel %vm1832_vm0, %v2248_v15, %v2216_v22  ;;  %v1977_v0 = vunpack.c.l.bf16 %v1678_v46  ;;  %v1978_v59 = vunpack.c.h.bf16 %v1678_v46  ;;  %v1815_v57 = vpop.permute.xlu0 %1814 }
 0x319   : > { %v2039_v28 = vadd.f32 %v2007_v26, %v1943_v42  ;;  %v2040_v8 = vadd.f32 %v2008_v47, %v1944_v30  ;;  %v2311_v9 = vmul.f32 %v2288_v32, %v1879_v3  ;;  %v2312_v38 = vmul.f32 %v2272_v27, %v1880_v14 }
 0x31a   : > { %v2375_v49 = vmul.f32 %v2272_v27, %v1975_v37  ;;  %v2376_v43 = vmul.f32 %v2288_v32, %v1976_v40  ;;  %v1841_v5 = vsel %vm1832_vm0, %v1783_v62, %v1815_v57  ;;  %v1857_v2 = vsel %vm1832_vm0, %v1815_v57, %v1783_v62  ;;  %v1785_v19 = vpop.permute.xlu1 %1784 }
 0x31b   : > { %v3107_v20 = vpack.c.bf16 %v2040_v8, %v2039_v28  ;;  %v2343_v63 = vadd.f32 %v2311_v9, %v2183_v56  ;;  %v2344_v53 = vadd.f32 %v2312_v38, %v2184_v7  ;;  %v1913_v22 = vmul.f32 %v1881_v6, %v1857_v2  ;;  %v1696_v28 = vld [vmem:[#allocation11 + $0x50] sm:$0xff] }
 0x31c   : > { %v2185_v51 = vmul.f32 %v1718_v11, %v5328_v45  ;;  %v1751_v3 = vmul.f32 %v1719_v17, %v4531_v10  ;;  %v2186_v14 = vmul.f32 %v1719_v17, %v4533_v29  ;;  %v1914_v55 = vmul.f32 %v1882_v61, %v1841_v5  ;;  %v2250_v40 = vpop.permute.xlu0 %2249  ;;  %v4908_v10 = vld [vmem:[#allocation8 + $0x50] sm:$0xff]  ;;  %v4910_v29 = vld [vmem:[#allocation8 + $0x58] sm:$0xff] }
 0x31d   : > { %2160 = vst [vmem:[%s4752_s18 + $0x38] sm:$0xff] %v3107_v20  ;;  %v2407_v58 = vadd.f32 %v2375_v49, %v2343_v63  ;;  %v2408_v54 = vadd.f32 %v2376_v43, %v2344_v53  ;;  %v1945_v41 = vadd.f32 %v1913_v22, %v1750_v24  ;;  %v2009_v37 = vmul.f32 %v1977_v0, %v1841_v5  ;;  %v5329_v20 = vld [vmem:[#allocation35_spill] sm:$0xff]  ;;  %v5330_v63 = vld [vmem:[#allocation36_spill] sm:$0xff] }
 0x31e   : > { %v1946_v62 = vadd.f32 %v1914_v55, %v1751_v3  ;;  %v2010_v12 = vmul.f32 %v1978_v59, %v1857_v2  ;;  %v2273_v1 = vsel %vm1832_vm0, %v2218_v60, %v2250_v40  ;;  %v2289_v11 = vsel %vm1832_vm0, %v2250_v40, %v2218_v60  ;;  %v2220_v25 = vpop.permute.xlu1 %2219  ;;  %v1680_v2 = vld [vmem:[#allocation10 + $0x50] sm:$0xff] }
 0x31f   : > { %v3123_v17 = vpack.c.bf16 %v2408_v54, %v2407_v58  ;;  %v2041_v39 = vadd.f32 %v2009_v37, %v1945_v41  ;;  %v2313_v13 = vmul.f32 %v2289_v11, %v1881_v6  ;;  %v2314_v56 = vmul.f32 %v2273_v1, %v1882_v61 }
 0x320   : > { %v1721_v50 = vunpack.c.h.bf16 %v4870_v31  ;;  %v2042_v44 = vadd.f32 %v2010_v12, %v1946_v62  ;;  %v1883_v16 = vunpack.c.l.bf16 %v1695_v4  ;;  %v1884_v18 = vunpack.c.h.bf16 %v1695_v4  ;;  %v1787_v24 = vpop.permute.xlu0 %1786 }
 0x321   : > { %2528 = vst [vmem:[%s4777_s17 + $0x38] sm:$0xff] %v3123_v17  ;;  %v2345_v46 = vadd.f32 %v2313_v13, %v2185_v51  ;;  %v2346_v7 = vadd.f32 %v2314_v56, %v2186_v14  ;;  %v2377_v60 = vmul.f32 %v2273_v1, %v1977_v0  ;;  %v2378_v21 = vmul.f32 %v2289_v11, %v1978_v59  ;;  %v5331_v56 = vld [vmem:[#allocation37_spill] sm:$0xff] }
 0x322   : > { %v1722_v42 = vunpack.c.l.bf16 %v4908_v10  ;;  %v1723_v30 = vunpack.c.h.bf16 %v4908_v10  ;;  %v1724_v6 = vunpack.c.l.bf16 %v4910_v29  ;;  %v3108_v61 = vpack.c.bf16 %v2042_v44, %v2041_v39  ;;  %v1817_v32 = vpop.permute.xlu1 %1816 }
 0x323   : > { %v2409_v26 = vadd.f32 %v2377_v60, %v2345_v46  ;;  %v2410_v47 = vadd.f32 %v2378_v21, %v2346_v7  ;;  %v1979_v15 = vunpack.c.l.bf16 %v1679_v36  ;;  %v1980_v27 = vunpack.c.h.bf16 %v1679_v36  ;;  %v5333_v36 = vld [vmem:[#allocation39_spill] sm:$0xff] }
 0x324   : > { %v1752_v0 = vmul.f32 %v1720_v52, %v4535_v33  ;;  %v2187_v59 = vmul.f32 %v1720_v52, %v4537_v34  ;;  %2161 = vst [vmem:[%s4752_s18 + $0x40] sm:$0xff] %v3108_v61  ;;  %v1842_v8 = vsel %vm1832_vm0, %v1785_v19, %v1817_v32  ;;  %v1858_v9 = vsel %vm1832_vm0, %v1817_v32, %v1785_v19  ;;  %v2222_v5 = vpop.permute.xlu0 %2221 }
 0x325   : > { %v1753_v38 = vmul.f32 %v1721_v50, %v4541_v35  ;;  %v3124_v57 = vpack.c.bf16 %v2410_v47, %v2409_v26  ;;  %v1915_v49 = vmul.f32 %v1883_v16, %v1858_v9  ;;  %v1916_v43 = vmul.f32 %v1884_v18, %v1842_v8  ;;  %v1697_v26 = vld [vmem:[#allocation11 + $0x58] sm:$0xff] }
 0x326   : > { %v2188_v33 = vmul.f32 %v1721_v50, %v5329_v20  ;;  %v1754_v53 = vmul.f32 %v1722_v42, %v5330_v63  ;;  %v1885_v31 = vunpack.c.l.bf16 %v1696_v28  ;;  %v1886_v34 = vunpack.c.h.bf16 %v1696_v28  ;;  %v2252_v3 = vpop.permute.xlu1 %2251  ;;  %v5332_v50 = vld [vmem:[#allocation38_spill] sm:$0xff] }
 0x327   : > { %2529 = vst [vmem:[%s4777_s17 + $0x40] sm:$0xff] %v3124_v57  ;;  %v1947_v52 = vadd.f32 %v1915_v49, %v1752_v0  ;;  %v1948_v22 = vadd.f32 %v1916_v43, %v1753_v38  ;;  %v2011_v45 = vmul.f32 %v1979_v15, %v1842_v8  ;;  %v2012_v51 = vmul.f32 %v1980_v27, %v1858_v9  ;;  %v1681_v57 = vld [vmem:[#allocation10 + $0x58] sm:$0xff] }
 0x328   : > { %v2274_v35 = vsel %vm1832_vm0, %v2220_v25, %v2252_v3  ;;  %v2290_v19 = vsel %vm1832_vm0, %v2252_v3, %v2220_v25  ;;  %v1981_v14 = vunpack.c.l.bf16 %v1680_v2  ;;  %v1982_v55 = vunpack.c.h.bf16 %v1680_v2  ;;  %v1819_v40 = vpop.permute.xlu0 %1818 }
 0x329   : > { %v2043_v58 = vadd.f32 %v2011_v45, %v1947_v52  ;;  %v2044_v54 = vadd.f32 %v2012_v51, %v1948_v22  ;;  %v2315_v41 = vmul.f32 %v2290_v19, %v1883_v16  ;;  %v2316_v37 = vmul.f32 %v2274_v35, %v1884_v18 }
 0x32a   : > { %v2379_v4 = vmul.f32 %v2274_v35, %v1979_v15  ;;  %v2380_v62 = vmul.f32 %v2290_v19, %v1980_v27  ;;  %v1843_v12 = vsel %vm1832_vm0, %v1787_v24, %v1819_v40  ;;  %v1859_v1 = vsel %vm1832_vm0, %v1819_v40, %v1787_v24  ;;  %v1789_v13 = vpop.permute.xlu1 %1788  ;;  %v4948_v27 = vld [vmem:[#allocation8 + $0x60] sm:$0xff]  ;;  %v5336_v40 = vld [vmem:[#allocation42_spill] sm:$0xff] }
 0x32b   : > { %v3109_v11 = vpack.c.bf16 %v2044_v54, %v2043_v58  ;;  %v2347_v10 = vadd.f32 %v2315_v41, %v2187_v59  ;;  %v2348_v17 = vadd.f32 %v2316_v37, %v2188_v33  ;;  %v1917_v39 = vmul.f32 %v1885_v31, %v1859_v1  ;;  %v1698_v19 = vld [vmem:[#allocation11 + $0x60] sm:$0xff]  ;;  %v5334_v58 = vld [vmem:[#allocation40_spill] sm:$0xff] }
 0x32c   : > { %v2189_v25 = vmul.f32 %v1722_v42, %v5331_v56  ;;  %v1755_v44 = vmul.f32 %v1723_v30, %v5332_v50  ;;  %v2190_v16 = vmul.f32 %v1723_v30, %v5333_v36  ;;  %v1918_v18 = vmul.f32 %v1886_v34, %v1843_v12  ;;  %v2254_v61 = vpop.permute.xlu0 %2253  ;;  %v4950_v30 = vld [vmem:[#allocation8 + $0x68] sm:$0xff] }
 0x32d   : > { %2162 = vst [vmem:[%s4752_s18 + $0x48] sm:$0xff] %v3109_v11  ;;  %v2411_v46 = vadd.f32 %v2379_v4, %v2347_v10  ;;  %v2412_v7 = vadd.f32 %v2380_v62, %v2348_v17  ;;  %v1949_v60 = vadd.f32 %v1917_v39, %v1754_v53  ;;  %v2013_v21 = vmul.f32 %v1981_v14, %v1843_v12  ;;  %v1682_v10 = vld [vmem:[#allocation10 + $0x60] sm:$0xff]  ;;  %v5338_v56 = vld [vmem:[#allocation44_spill] sm:$0xff] }
 0x32e   : > { %v1950_v24 = vadd.f32 %v1918_v18, %v1755_v44  ;;  %v2014_v47 = vmul.f32 %v1982_v55, %v1859_v1  ;;  %v2275_v15 = vsel %vm1832_vm0, %v2222_v5, %v2254_v61  ;;  %v2291_v42 = vsel %vm1832_vm0, %v2254_v61, %v2222_v5  ;;  %v2224_v8 = vpop.permute.xlu1 %2223  ;;  %v5337_v17 = vld [vmem:[#allocation43_spill] sm:$0xff] }
 0x32f   : > { %v3125_v32 = vpack.c.bf16 %v2412_v7, %v2411_v46  ;;  %v2045_v28 = vadd.f32 %v2013_v21, %v1949_v60  ;;  %v2317_v0 = vmul.f32 %v2291_v42, %v1885_v31  ;;  %v2318_v59 = vmul.f32 %v2275_v15, %v1886_v34 }
 0x330   : > { %v1725_v9 = vunpack.c.h.bf16 %v4910_v29  ;;  %v2046_v38 = vadd.f32 %v2014_v47, %v1950_v24  ;;  %v1887_v49 = vunpack.c.l.bf16 %v1697_v26  ;;  %v1888_v43 = vunpack.c.h.bf16 %v1697_v26  ;;  %v1791_v63 = vpop.permute.xlu0 %1790 }
 0x331   : > { %2530 = vst [vmem:[%s4777_s17 + $0x48] sm:$0xff] %v3125_v32  ;;  %v2349_v2 = vadd.f32 %v2317_v0, %v2189_v25  ;;  %v2350_v20 = vadd.f32 %v2318_v59, %v2190_v16  ;;  %v2381_v5 = vmul.f32 %v2275_v15, %v1981_v14  ;;  %v2382_v33 = vmul.f32 %v2291_v42, %v1982_v55  ;;  %v5335_v55 = vld [vmem:[#allocation41_spill] sm:$0xff] }
 0x332   : > { %v1726_v53 = vunpack.c.l.bf16 %v4948_v27  ;;  %v1727_v52 = vunpack.c.h.bf16 %v4948_v27  ;;  %v1728_v31 = vunpack.c.l.bf16 %v4950_v30  ;;  %v3110_v34 = vpack.c.bf16 %v2046_v38, %v2045_v28  ;;  %v1821_v35 = vpop.permute.xlu1 %1820  ;;  %v5339_v38 = vld [vmem:[#allocation45_spill] sm:$0xff] }
 0x333   : > { %v2413_v22 = vadd.f32 %v2381_v5, %v2349_v2  ;;  %v2414_v45 = vadd.f32 %v2382_v33, %v2350_v20  ;;  %v1983_v51 = vunpack.c.l.bf16 %v1681_v57  ;;  %v1984_v3 = vunpack.c.h.bf16 %v1681_v57  ;;  %v5340_v2 = vld [vmem:[#allocation46_spill] sm:$0xff]  ;;  %v5341_v20 = vld [vmem:[#allocation47_spill] sm:$0xff] }
 0x334   : > { %v1756_v14 = vmul.f32 %v1724_v6, %v5334_v58  ;;  %v2191_v54 = vmul.f32 %v1724_v6, %v5335_v55  ;;  %2163 = vst [vmem:[%s4752_s18 + $0x50] sm:$0xff] %v3110_v34  ;;  %v1844_v41 = vsel %vm1832_vm0, %v1789_v13, %v1821_v35  ;;  %v1860_v37 = vsel %vm1832_vm0, %v1821_v35, %v1789_v13  ;;  %v2226_v11 = vpop.permute.xlu0 %2225  ;;  %v4988_v58 = vld [vmem:[#allocation8 + $0x70] sm:$0xff] }
 0x335   : > { %v1757_v4 = vmul.f32 %v1725_v9, %v5336_v40  ;;  %v3126_v62 = vpack.c.bf16 %v2414_v45, %v2413_v22  ;;  %v1919_v12 = vmul.f32 %v1887_v49, %v1860_v37  ;;  %v1920_v1 = vmul.f32 %v1888_v43, %v1844_v41 }
 0x336   : > { %v2192_v39 = vmul.f32 %v1725_v9, %v5337_v17  ;;  %v1758_v25 = vmul.f32 %v1726_v53, %v5338_v56  ;;  %v1889_v29 = vunpack.c.l.bf16 %v1698_v19  ;;  %v1890_v6 = vunpack.c.h.bf16 %v1698_v19  ;;  %v2256_v18 = vpop.permute.xlu1 %2255 }
 0x337   : > { %2531 = vst [vmem:[%s4777_s17 + $0x50] sm:$0xff] %v3126_v62  ;;  %v1951_v50 = vadd.f32 %v1919_v12, %v1756_v14  ;;  %v1952_v44 = vadd.f32 %v1920_v1, %v1757_v4  ;;  %v2015_v36 = vmul.f32 %v1983_v51, %v1844_v41  ;;  %v2016_v16 = vmul.f32 %v1984_v3, %v1860_v37  ;;  %v1683_v62 = vld [vmem:[#allocation10 + $0x68] sm:$0xff] }
 0x338   : > { %v2276_v13 = vsel %vm1832_vm0, %v2224_v8, %v2256_v18  ;;  %v2292_v46 = vsel %vm1832_vm0, %v2256_v18, %v2224_v8  ;;  %v1985_v7 = vunpack.c.l.bf16 %v1682_v10  ;;  %v1986_v60 = vunpack.c.h.bf16 %v1682_v10  ;;  %v1823_v47 = vpop.permute.xlu0 %1822 }
 0x339   : > { %v2047_v21 = vadd.f32 %v2015_v36, %v1951_v50  ;;  %v2048_v61 = vadd.f32 %v2016_v16, %v1952_v44  ;;  %v2319_v26 = vmul.f32 %v2292_v46, %v1887_v49  ;;  %v2320_v24 = vmul.f32 %v2276_v13, %v1888_v43 }
 0x33a   : > { %v2383_v15 = vmul.f32 %v2276_v13, %v1983_v51  ;;  %v2384_v42 = vmul.f32 %v2292_v46, %v1984_v3  ;;  %v1845_v27 = vsel %vm1832_vm0, %v1791_v63, %v1823_v47  ;;  %v1861_v32 = vsel %vm1832_vm0, %v1823_v47, %v1791_v63  ;;  %v1793_v9 = vpop.permute.xlu1 %1792  ;;  %v1699_v3 = vld [vmem:[#allocation11 + $0x68] sm:$0xff]  ;;  %v1700_v46 = vld [vmem:[#allocation11 + $0x70] sm:$0xff]  ;;  %v5344_v47 = vld [vmem:[#allocation50_spill] sm:$0xff] }
 0x33b   : > { %v3111_v28 = vpack.c.bf16 %v2048_v61, %v2047_v21  ;;  %v2351_v0 = vadd.f32 %v2319_v26, %v2191_v54  ;;  %v2352_v59 = vadd.f32 %v2320_v24, %v2192_v39  ;;  %v1921_v8 = vmul.f32 %v1889_v29, %v1861_v32  ;;  %v5342_v21 = vld [vmem:[#allocation48_spill] sm:$0xff] }
 0x33c   : > { %v2193_v57 = vmul.f32 %v1726_v53, %v5339_v38  ;;  %v1759_v49 = vmul.f32 %v1727_v52, %v5340_v2  ;;  %v2194_v43 = vmul.f32 %v1727_v52, %v5341_v20  ;;  %v1922_v5 = vmul.f32 %v1890_v6, %v1845_v27  ;;  %v2258_v51 = vpop.permute.xlu0 %2257  ;;  %v4990_v52 = vld [vmem:[#allocation8 + $0x78] sm:$0xff]  ;;  %v5346_v38 = vld [vmem:[#allocation53_spill] sm:$0xff] }
 0x33d   : > { %2164 = vst [vmem:[%s4752_s18 + $0x58] sm:$0xff] %v3111_v28  ;;  %v2415_v33 = vadd.f32 %v2383_v15, %v2351_v0  ;;  %v2416_v34 = vadd.f32 %v2384_v42, %v2352_v59  ;;  %v1953_v22 = vadd.f32 %v1921_v8, %v1758_v25  ;;  %v2017_v45 = vmul.f32 %v1985_v7, %v1845_v27  ;;  %v1684_v0 = vld [vmem:[#allocation10 + $0x70] sm:$0xff]  ;;  %v5345_v59 = vld [vmem:[#allocation51_spill] sm:$0xff] }
 0x33e   : > { %v1954_v63 = vadd.f32 %v1922_v5, %v1759_v49  ;;  %v2018_v35 = vmul.f32 %v1986_v60, %v1861_v32  ;;  %v2277_v19 = vsel %vm1832_vm0, %v2226_v11, %v2258_v51  ;;  %v2293_v53 = vsel %vm1832_vm0, %v2258_v51, %v2226_v11  ;;  %v2228_v37 = vpop.permute.xlu1 %2227 }
 0x33f   : > { %v3127_v14 = vpack.c.bf16 %v2416_v34, %v2415_v33  ;;  %v2049_v55 = vadd.f32 %v2017_v45, %v1953_v22  ;;  %v2321_v54 = vmul.f32 %v2293_v53, %v1889_v29  ;;  %v2322_v41 = vmul.f32 %v2277_v19, %v1890_v6 }
 0x340   : > { %v1729_v40 = vunpack.c.h.bf16 %v4950_v30  ;;  %v2050_v4 = vadd.f32 %v2018_v35, %v1954_v63  ;;  %v1891_v12 = vunpack.c.l.bf16 %v1699_v3  ;;  %v1892_v1 = vunpack.c.h.bf16 %v1699_v3  ;;  %v4994_v56 = vpop.permute.xlu0 %1794 }
 0x341   : > { %2532 = vst [vmem:[%s4777_s17 + $0x58] sm:$0xff] %v3127_v14  ;;  %v2353_v10 = vadd.f32 %v2321_v54, %v2193_v57  ;;  %v2354_v17 = vadd.f32 %v2322_v41, %v2194_v43  ;;  %v2385_v11 = vmul.f32 %v2277_v19, %v1985_v7  ;;  %v2386_v39 = vmul.f32 %v2293_v53, %v1986_v60  ;;  %v5343_v60 = vld [vmem:[#allocation49_spill] sm:$0xff] }
 0x342   : > { %v1730_v25 = vunpack.c.l.bf16 %v4988_v58  ;;  %v1731_v29 = vunpack.c.h.bf16 %v4988_v58  ;;  %v1732_v6 = vunpack.c.l.bf16 %v4990_v52  ;;  %v3112_v50 = vpack.c.bf16 %v2050_v4, %v2049_v55  ;;  %v1825_v13 = vpop.permute.xlu1 %1824  ;;  %v5347_v4 = vld [vmem:[#allocation52_spill] sm:$0xff] }
 0x343   : > { %v2417_v44 = vadd.f32 %v2385_v11, %v2353_v10  ;;  %v2418_v36 = vadd.f32 %v2386_v39, %v2354_v17  ;;  %v1987_v16 = vunpack.c.l.bf16 %v1683_v62  ;;  %v1988_v18 = vunpack.c.h.bf16 %v1683_v62  ;;  %v5348_v10 = vld [vmem:[#allocation54_spill] sm:$0xff]  ;;  %v5349_v17 = vld [vmem:[#allocation55_spill] sm:$0xff] }
 0x344   : > { %v1760_v7 = vmul.f32 %v1728_v31, %v5342_v21  ;;  %v2195_v61 = vmul.f32 %v1728_v31, %v5343_v60  ;;  %2165 = vst [vmem:[%s4752_s18 + $0x60] sm:$0xff] %v3112_v50  ;;  %v1846_v26 = vsel %vm1832_vm0, %v1793_v9, %v1825_v13  ;;  %v1862_v24 = vsel %vm1832_vm0, %v1825_v13, %v1793_v9  ;;  %v2230_v28 = vpop.permute.xlu0 %2229 }
 0x345   : > { %v1761_v15 = vmul.f32 %v1729_v40, %v5344_v47  ;;  %v3128_v42 = vpack.c.bf16 %v2418_v36, %v2417_v44  ;;  %v1923_v27 = vmul.f32 %v1891_v12, %v1862_v24  ;;  %v1924_v32 = vmul.f32 %v1892_v1, %v1846_v26 }
 0x346   : > { %v2196_v8 = vmul.f32 %v1729_v40, %v5345_v59  ;;  %v2197_v57 = vmul.f32 %v1730_v25, %v5346_v38  ;;  %v1893_v30 = vunpack.c.l.bf16 %v1700_v46  ;;  %v1894_v31 = vunpack.c.h.bf16 %v1700_v46  ;;  %v2260_v5 = vpop.permute.xlu1 %2259 }
 0x347   : > { %2533 = vst [vmem:[%s4777_s17 + $0x60] sm:$0xff] %v3128_v42  ;;  %v1955_v2 = vadd.f32 %v1923_v27, %v1760_v7  ;;  %v1956_v49 = vadd.f32 %v1924_v32, %v1761_v15  ;;  %v2019_v20 = vmul.f32 %v1987_v16, %v1846_v26  ;;  %v2020_v43 = vmul.f32 %v1988_v18, %v1862_v24  ;;  %v1685_v15 = vld [vmem:[#allocation10 + $0x78] sm:$0xff] }
 0x348   : > { %v2278_v9 = vsel %vm1832_vm0, %v2228_v37, %v2260_v5  ;;  %v2294_v33 = vsel %vm1832_vm0, %v2260_v5, %v2228_v37  ;;  %v1989_v34 = vunpack.c.l.bf16 %v1684_v0  ;;  %v1990_v22 = vunpack.c.h.bf16 %v1684_v0  ;;  %v2262_v35 = vpop.permute.xlu0 %2261  ;;  %v5351_v5 = vld [vmem:[#allocation58_spill] sm:$0xff] }
 0x349   : > { %v2051_v45 = vadd.f32 %v2019_v20, %v1955_v2  ;;  %v2052_v51 = vadd.f32 %v2020_v43, %v1956_v49  ;;  %v2323_v3 = vmul.f32 %v2294_v33, %v1891_v12  ;;  %v2324_v63 = vmul.f32 %v2278_v9, %v1892_v1  ;;  %v5350_v2 = vld [vmem:[#allocation57_spill] sm:$0xff] }
 0x34a   : > { %v2387_v19 = vmul.f32 %v2278_v9, %v1987_v16  ;;  %v2388_v53 = vmul.f32 %v2294_v33, %v1988_v18  ;;  %v2279_v58 = vsel %vm1832_vm0, %v2230_v28, %v2262_v35  ;;  %v2295_v14 = vsel %vm1832_vm0, %v2262_v35, %v2230_v28  ;;  %v1797_v40 = vpop.permute.xlu1 %1796  ;;  %v1701_v18 = vld [vmem:[#allocation11 + $0x78] sm:$0xff] }
 0x34b   : > { %v3113_v55 = vpack.c.bf16 %v2052_v51, %v2051_v45  ;;  %v2355_v54 = vadd.f32 %v2323_v3, %v2195_v61  ;;  %v2356_v41 = vadd.f32 %v2324_v63, %v2196_v8  ;;  %v2325_v37 = vmul.f32 %v2295_v14, %v1893_v30 }
 0x34c   : > { %v1762_v62 = vmul.f32 %v1730_v25, %v5347_v4  ;;  %v1763_v12 = vmul.f32 %v1731_v29, %v5348_v10  ;;  %v2198_v1 = vmul.f32 %v1731_v29, %v5349_v17  ;;  %v2326_v11 = vmul.f32 %v2279_v58, %v1894_v31  ;;  %v1827_v16 = vpop.permute.xlu0 %1826 }
 0x34d   : > { %2166 = vst [vmem:[%s4752_s18 + $0x68] sm:$0xff] %v3113_v55  ;;  %v2419_v39 = vadd.f32 %v2387_v19, %v2355_v54  ;;  %v2420_v50 = vadd.f32 %v2388_v53, %v2356_v41  ;;  %v2357_v44 = vadd.f32 %v2325_v37, %v2197_v57  ;;  %v2389_v36 = vmul.f32 %v2279_v58, %v1989_v34  ;;  %v5352_v19 = vld [vmem:[#allocation56_spill] sm:$0xff] }
 0x34e   : > { %v2358_v13 = vadd.f32 %v2326_v11, %v2198_v1  ;;  %v2390_v46 = vmul.f32 %v2295_v14, %v1990_v22  ;;  %v1847_v21 = vsel %vm1832_vm0, %v4994_v56, %v1827_v16  ;;  %v1863_v25 = vsel %vm1832_vm0, %v1827_v16, %v4994_v56  ;;  %v2232_v26 = vpop.permute.xlu1 %2231 }
 0x34f   : > { %v3129_v29 = vpack.c.bf16 %v2420_v50, %v2419_v39  ;;  %v2421_v7 = vadd.f32 %v2389_v36, %v2357_v44  ;;  %v1925_v60 = vmul.f32 %v1893_v30, %v1863_v25  ;;  %v1926_v61 = vmul.f32 %v1894_v31, %v1847_v21 }
 0x350   : > { %v1733_v24 = vunpack.c.h.bf16 %v4990_v52  ;;  %v2422_v47 = vadd.f32 %v2390_v46, %v2358_v13  ;;  %v1895_v42 = vunpack.c.l.bf16 %v1701_v18  ;;  %v1896_v27 = vunpack.c.h.bf16 %v1701_v18 }
 0x351   : > { %2534 = vst [vmem:[%s4777_s17 + $0x68] sm:$0xff] %v3129_v29  ;;  %v1957_v32 = vadd.f32 %v1925_v60, %v1762_v62  ;;  %v1958_v28 = vadd.f32 %v1926_v61, %v1763_v12  ;;  %v2021_v0 = vmul.f32 %v1989_v34, %v1847_v21  ;;  %v2022_v59 = vmul.f32 %v1990_v22, %v1863_v25 }
 0x352   : > { %v3130_v56 = vpack.c.bf16 %v2422_v47, %v2421_v7  ;;  %v1991_v57 = vunpack.c.l.bf16 %v1685_v15  ;;  %v1992_v30 = vunpack.c.h.bf16 %v1685_v15  ;;  %v2264_v31 = vpop.permute.xlu1 %2263  ;;  %v2199_v49 = vmul.f32 %v1732_v6, %v5350_v2 }
 0x353   : > { %v2053_v8 = vadd.f32 %v2021_v0, %v1957_v32  ;;  %v2054_v38 = vadd.f32 %v2022_v59, %v1958_v28  ;;  %v2280_v20 = vsel %vm1832_vm0, %v2232_v26, %v2264_v31  ;;  %v2296_v43 = vsel %vm1832_vm0, %v2264_v31, %v2232_v26 }
 0x354   : > { %2535 = vst [vmem:[%s4777_s17 + $0x70] sm:$0xff] %v3130_v56  ;;  %v2200_v9 = vmul.f32 %v1733_v24, %v5351_v5  ;;  %v2327_v34 = vmul.f32 %v2296_v43, %v1895_v42  ;;  %v2328_v22 = vmul.f32 %v2280_v20, %v1896_v27  ;;  %v2391_v3 = vmul.f32 %v2280_v20, %v1991_v57 }
 0x355   : > { %v3114_v33 = vpack.c.bf16 %v2054_v38, %v2053_v8  ;;  %v2392_v63 = vmul.f32 %v2296_v43, %v1992_v30  ;;  %v1764_v53 = vmul.f32 %v1732_v6, %v5352_v19  ;;  %v1765_v58 = vmul.f32 %v1733_v24, %v4613_v48 }
 0x356   : > { %v2359_v45 = vadd.f32 %v2327_v34, %v2199_v49  ;;  %v2360_v51 = vadd.f32 %v2328_v22, %v2200_v9  ;;  %v1829_v35 = vpop.permute.xlu1 %1828 }
 0x357   : > { %2167 = vst [vmem:[%s4752_s18 + $0x70] sm:$0xff] %v3114_v33  ;;  %v1848_v14 = vsel %vm1832_vm0, %v1797_v40, %v1829_v35  ;;  %v1864_v55 = vsel %vm1832_vm0, %v1829_v35, %v1797_v40 }
 0x358   : > { %v2423_v54 = vadd.f32 %v2391_v3, %v2359_v45  ;;  %v2424_v41 = vadd.f32 %v2392_v63, %v2360_v51  ;;  %v1927_v37 = vmul.f32 %v1895_v42, %v1864_v55  ;;  %v1928_v4 = vmul.f32 %v1896_v27, %v1848_v14 }
 0x359   : > { %v2023_v62 = vmul.f32 %v1991_v57, %v1848_v14  ;;  %v2024_v6 = vmul.f32 %v1992_v30, %v1864_v55 }
 0x35a   : > { %v3131_v48 = vpack.c.bf16 %v2424_v41, %v2423_v54  ;;  %v1959_v52 = vadd.f32 %v1927_v37, %v1764_v53  ;;  %v1960_v23 = vadd.f32 %v1928_v4, %v1765_v58 }
 0x35c   : > { %2536 = vst [vmem:[%s4777_s17 + $0x78] sm:$0xff] %v3131_v48  ;;  %v2055_v40 = vadd.f32 %v2023_v62, %v1959_v52  ;;  %v2056_v10 = vadd.f32 %v2024_v6, %v1960_v23  ;;  %s3665_s17 = scalar_lea.vmem %s3664_s4, 4096 }
 0x35d   : > { %p3667_p3 = scmp.lt.s32.totalorder %s3665_s17, %s3659_s6 }
 0x35f   : > { %p3668_p10 = por %p3667_p3, %p3666_p1 }
 0x361   : > { %p3669_p7 = pnand %p3668_p10, %p3662_p9 }
 0x363   : > { %3672 = shalt.err (!%p3669_p7)
}
 0x364   : > { %s3673_s0 = scalar_lea.hbm %s5059_s24, 2048  ;;  %s3677_s3 = scalar_lea.hbm %s5193_s7, 4096 }
 0x365   : > { %p3674_p13 = scmp.ne.s32.totalorder %s5059_s24, %s3673_s0  ;;  %p3678_p4 = scmp.lt.u32.totalorder %s5059_s24, %s5193_s7 }
 0x366   : > { %p3679_p11 = scmp.lt.u32.totalorder %s3677_s3, %s3673_s0  ;;  %p3681_p6 = scmp.lt.u32.totalorder %s3673_s0, %s5059_s24 }
 0x367   : > { %p3675_p2 = pnand %p3674_p13, %p5356_p0 }
 0x368   : > { %p3680_p12 = por %p3679_p11, %p3678_p4 }
 0x369   : > { %p3676_p5 = pneg %p3675_p2 }
 0x36a   : > { %p3682_p8 = por %p3681_p6, %p3680_p12 }
 0x36c   : > { %p3683_p9 = pnand %p3682_p8, %p3676_p5 }
 0x36e   : > { %3686 = shalt.err (!%p3683_p9)
}
 0x36f   : > { %s3827_s6 = smov 128   ;;  %s3828_s19 = smov 8   ;;  %v3115_v12 = vpack.c.bf16 %v2056_v10, %v2055_v40 }
 0x370   : > { %3206 = dma.vmem_to_hbm [thread:$0]  (%p5356_p0), %s5062_s8, 2048, %s5059_s24, %s5081_s2, %s3827_s6, %s3827_s6, %s3828_s19  }
 0x371   : > { %s3687_s17 = scalar_lea.vmem %s5069_s1, 2048  ;;  %s3829_s0 = smov [#allocation16]  }
 0x372   : > { %p3688_p1 = scmp.ne.s32.totalorder %s5069_s1, %s3687_s17  ;;  %s3691_s11 = sshll.u32 %s3829_s0, 4  ;;  %s3692_s11 = int_to_ptr.vmem [resolvable:$false] %s3691_s11 }
 0x373   : > { %s3693_s26 = scalar_lea.vmem %s3692_s11, 4096  ;;  %p3694_p7 = scmp.lt.s32.totalorder %s5069_s1, %s3692_s11 }
 0x374   : > { %p3689_p3 = pnand %p3688_p1, %p5356_p0  ;;  %p3695_p13 = scmp.lt.s32.totalorder %s3693_s26, %s3687_s17 }
 0x376   : > { %p3690_p10 = pneg %p3689_p3  ;;  %p3696_p2 = por %p3695_p13, %p3694_p7 }
 0x378   : > { %p3697_p5 = pnand %p3696_p2, %p3690_p10 }
 0x37a   : > { %3700 = shalt.err (!%p3697_p5)
}
 0x37b   : > { %s3701_s8 = scalar_lea.hbm %s5067_s12, 2048  ;;  %s3705_s30 = scalar_lea.hbm %s5353_s21, 4096 }
 0x37c   : > { %p3702_p4 = scmp.ne.s32.totalorder %s5067_s12, %s3701_s8  ;;  %p3706_p6 = scmp.lt.u32.totalorder %s5067_s12, %s5353_s21 }
 0x37d   : > { %p3707_p8 = scmp.lt.u32.totalorder %s3705_s30, %s3701_s8  ;;  %p3709_p1 = scmp.lt.u32.totalorder %s3701_s8, %s5067_s12 }
 0x37e   : > { %p3703_p11 = pnand %p3702_p4, %p5356_p0 }
 0x37f   : > { %p3708_p9 = por %p3707_p8, %p3706_p6 }
 0x380   : > { %p3704_p12 = pneg %p3703_p11 }
 0x381   : > { %p3710_p3 = por %p3709_p1, %p3708_p9 }
 0x383   : > { %p3711_p10 = pnand %p3710_p3, %p3704_p12 }
 0x385   : > { %3714 = shalt.err (!%p3711_p10)
}
 0x386   : > { %3207 = dma.vmem_to_hbm [thread:$0]  (%p5356_p0), %s5069_s1, 2048, %s5067_s12, %s5081_s2, %s3827_s6, %s3827_s6, %s3828_s19  }
 0x387   : > { %2168 = vst [vmem:[%s4752_s18 + $0x78] sm:$0xff] %v3115_v12  ;;  %s2650_s17 = scalar_lea.sflag [#allocation4], %s4126_s13  ;;  %s3715_s11 = scalar_lea.vmem %s5077_s14, 2048 }
 0x388   : > { %p3716_p7 = scmp.ne.s32.totalorder %s5077_s14, %s3715_s11  ;;  %s3830_s26 = smov [#allocation13]  }
 0x389   : > { %s3719_s8 = sshll.u32 %s3830_s26, 4  ;;  %s3720_s8 = int_to_ptr.vmem [resolvable:$false] %s3719_s8 }
 0x38a   : > { %p3717_p13 = pnand %p3716_p7, %p5356_p0  ;;  %s3721_s24 = scalar_lea.vmem %s3720_s8, 4096 }
 0x38b   : > { %p3722_p5 = scmp.lt.s32.totalorder %s5077_s14, %s3720_s8  ;;  %p3723_p4 = scmp.lt.s32.totalorder %s3721_s24, %s3715_s11 }
 0x38c   : > { %p3718_p2 = pneg %p3717_p13 }
 0x38d   : > { %p3724_p11 = por %p3723_p4, %p3722_p5 }
 0x38f   : > { %p3725_p12 = pnand %p3724_p11, %p3718_p2 }
 0x391   : > { %3728 = shalt.err (!%p3725_p12)
}
 0x392   : > { %s3729_s2 = scalar_lea.hbm %s5075_s15, 2048  ;;  %s3733_s12 = scalar_lea.hbm %s5354_s23, 4096 }
 0x393   : > { %p3730_p6 = scmp.ne.s32.totalorder %s5075_s15, %s3729_s2  ;;  %p3734_p1 = scmp.lt.u32.totalorder %s5075_s15, %s5354_s23 }
 0x394   : > { %p3735_p3 = scmp.lt.u32.totalorder %s3733_s12, %s3729_s2  ;;  %p3737_p7 = scmp.lt.u32.totalorder %s3729_s2, %s5075_s15 }
 0x395   : > { %p3731_p8 = pnand %p3730_p6, %p5356_p0 }
 0x396   : > { %p3736_p10 = por %p3735_p3, %p3734_p1 }
 0x397   : > { %p3732_p9 = pneg %p3731_p8 }
 0x398   : > { %p3738_p13 = por %p3737_p7, %p3736_p10 }
 0x39a   : > { %p3739_p2 = pnand %p3738_p13, %p3732_p9 }
 0x39c   : > { %3742 = shalt.err (!%p3739_p2)
}
 0x39d   : > { %3205 = dma.vmem_to_hbm [thread:$0]  (%p5356_p0), %s5077_s14, 2048, %s5075_s15, %s2650_s17, %s3827_s6, %s3827_s6, %s3828_s19  }
 0x39e PF: > { %s2729_s4 = sand.u32 1, %s3793_s27   ;;  %p5357_p5 = scmp.ne.s32.totalorder %s5262_s22, 0 }
 0x39f   : > { %p5358_p4 = scmp.ge.s32.totalorder %s3813_s10, 2  ;;  %s2730_s0 = scalar_lea.sflag [#allocation4], %s2729_s4 }
 0x3a1   : > { %p3232_p11 = pnand %p5358_p4, %p5357_p5 }
 0x3a3   : > { %3784 = dma.done.wait (!%p3232_p11), %s2730_s0, 2048  }
 0x3a4   : > { %3786 = vsyncadd (!%p3232_p11), %s2730_s0, 4294965248  ;;  %s5359_s20 = sadd.s32 4294967294, %s3813_s10  }
 0x3a5   : > { %s2738_s11 = sand.u32 1, %s5359_s20  }
 0x3a6   : > { %s2739_s26 = scalar_lea.sflag [#allocation15], %s2738_s11 }
 0x3a7   : > { %3788 = dma.done.wait (!%p3232_p11), %s2739_s26, 4096  }
 0x3a8   : > { %3790 = vsyncadd (!%p3232_p11), %s2739_s26, 4294963200  ;;  %s31_s10 = sadd.s32 1, %s3813_s10   ;;  %s5360_s27 = smov %s3797_s28 }
 0x3a9   : > { %p28_p0 = scmp.ge.s32.totalorder %s31_s10, 4   ;;  %s5361_s28 = smov %s3801_s29 }
 0x3aa   : > { %s5362_s29 = smov %s4071_s16  ;;  %s5363_s30 = smov %s3809_s9 }
 0x3ab   : > { %s5364_s9 = smov %s5366_s25  ;;  %30 = sbr.rel (!%p28_p0) target bundleno = 19 (0x13), region = 144 }
 0x3b2   :  { %2753 = vsyncpa [#allocation3], 1 }
 0x3b3   :  { %2755 = vsyncpa [#allocation3 + $0x1], 1 }
 0x3b4   :  { %2756 = vsyncpa [#allocation6], 1 }
 0x3b5   :  { %2757 = vsyncpa [#allocation9], 1 }
 0x3b6   :  { %2758 = vsyncpa [#allocation12], 1 }
 0x3b7   :  { %2759 = vsyncpa [#allocation4], 1 }
 0x3b8   :  { %2761 = vsyncpa [#allocation4 + $0x1], 1 }
 0x3b9   :  { %2762 = vsyncpa [#allocation15], 1 }
 0x3ba   :  { %2764 = vsyncpa [#allocation15 + $0x1], 1 }

</bundles_post_ra>
